<compile_context>
chip_gen: v5e
topology: v5e:2x2
jax: 0.10.0
libtpu: 0.0.40
codegen_flags: <defaults>
</compile_context>

<pallas_src>
import functools

import jax
import jax.numpy as jnp
from jax import lax
from jax.experimental import pallas as pl
from jax.experimental.pallas import tpu as pltpu

EPS = 1e-5
_LANES = 128     # lane padding for packed parameter buffers
_WALIGN = 16     # bf16 sublane-tile alignment for weight-slab offsets


# ----------------------------------------------------------------------------
# Fused kernel (built as a closure over the static parameter layout)
# ----------------------------------------------------------------------------
def _make_kernel(N, L, layout):
    NL = N * L
    blocks = layout["blocks"]

    def kernel(xtap_ref, wbuf_ref, pbuf_ref, out_ref):
        # -------- memoised iota helpers (built once per trace) --------------
        pos_cache = {}

        def seq_pos(nl, C, l):
            key = (nl, C, l)
            if key not in pos_cache:
                r = lax.broadcasted_iota(jnp.int32, (nl, C), 0)
                pos_cache[key] = jnp.bitwise_and(r, l - 1)   # row mod l (l = 2^k)
            return pos_cache[key]

        smat_cache = {}

        def shift_mats(nl, l):
            key = (nl, l)
            if key not in smat_cache:
                rr = lax.broadcasted_iota(jnp.int32, (nl, nl), 0)
                cc = lax.broadcasted_iota(jnp.int32, (nl, nl), 1)
                pos = jnp.bitwise_and(rr, l - 1)
                sm = jnp.where(jnp.logical_and(cc == rr - 1, pos > 0),
                               1.0, 0.0).astype(jnp.bfloat16)
                sp = jnp.where(jnp.logical_and(cc == rr + 1, pos < l - 1),
                               1.0, 0.0).astype(jnp.bfloat16)
                smat_cache[key] = (sm, sp)
            return smat_cache[key]

        # -------- packed-parameter access ------------------------------------
        def wslab(entry):
            off, rows, cout = entry
            return wbuf_ref[off:off + rows, :cout]           # bf16 (rows, cout)

        def bn_relu(y, g, nl, cout):
            # Training-mode BatchNorm1d (batch stats over N*L, biased variance),
            # single pass (sum & sum of squares), all in f32, fused with ReLU.
            blk = pbuf_ref[g * 8:g * 8 + 8, :cout]           # f32 (8, cout)
            bias, gamma, beta = blk[0:1, :], blk[1:2, :], blk[2:3, :]
            y = y + bias
            inv_cnt = jnp.float32(1.0 / nl)
            mean = jnp.sum(y, axis=0, keepdims=True) * inv_cnt
            var = jnp.sum(y * y, axis=0, keepdims=True) * inv_cnt - mean * mean
            inv = lax.rsqrt(jnp.maximum(var, 0.0) + jnp.float32(EPS))
            return jnp.maximum((y - mean) * (inv * gamma) + beta, 0.0)

        # -------- shifted taps (x[l-1], x[l+1]) within each sequence ---------
        def shifted(x, nl, l):
            C = x.shape[1]
            if nl % 8 == 0:
                # XLU sublane rotation + sequence-edge mask (no MXU work).
                pos = seq_pos(nl, C, l)
                xm = jnp.where(pos == 0, 0.0, pltpu.roll(x, 1, axis=0))
                xp = jnp.where(pos == l - 1, 0.0, pltpu.roll(x, nl - 1, axis=0))
            else:
                # Deep levels (nl == 4): fall back to tiny shift-matrix matmuls.
                sm, sp = shift_mats(nl, l)
                xb = x.astype(jnp.bfloat16)
                xm = jnp.dot(sm, xb, preferred_element_type=jnp.float32)
                xp = jnp.dot(sp, xb, preferred_element_type=jnp.float32)
            return xm, xp

        # -------- Conv1d(k=3, pad=1) as ONE tap-stacked MXU matmul -----------
        def conv3(x, entry, nl, l):
            off, rows, cout = entry
            if l == 1:
                # Every position is its own length-1 sequence: both padding
                # taps are zero, only the centre tap contributes.
                cin = rows // 3
                w_mid = wbuf_ref[off + cin:off + 2 * cin, :cout]
                return jnp.dot(x.astype(jnp.bfloat16), w_mid,
                               preferred_element_type=jnp.float32)
            xm, xp = shifted(x, nl, l)
            x3 = jnp.concatenate([xm, x, xp], axis=1).astype(jnp.bfloat16)
            return jnp.dot(x3, wslab(entry),
                           preferred_element_type=jnp.float32)

        def conv_block(x, nl, l, blk, skip=None):
            cout = blk["w1"][2]
            y = conv3(x, blk["w1"], nl, l)
            if skip is not None:
                # torch.cat([up, skip], dim=1) folded: weight split along Cin.
                y = y + conv3(skip, blk["w1s"], nl, l)
            y = bn_relu(y, blk["g1"], nl, cout)
            y = conv3(y, blk["w2"], nl, l)
            return bn_relu(y, blk["g2"], nl, cout)

        # -------- MaxPool1d(2,2) / Upsample(x2, nearest) ----------------------
        def pool2(x, nl):
            m = nl // 2
            r = lax.broadcasted_iota(jnp.int32, (m, nl), 0)
            c = lax.broadcasted_iota(jnp.int32, (m, nl), 1)
            de = jnp.where(c == 2 * r, 1.0, 0.0).astype(jnp.bfloat16)
            do = jnp.where(c == 2 * r + 1, 1.0, 0.0).astype(jnp.bfloat16)
            xb = x.astype(jnp.bfloat16)
            return jnp.maximum(
                jnp.dot(de, xb, preferred_element_type=jnp.float32),
                jnp.dot(do, xb, preferred_element_type=jnp.float32))

        def up2(x, nl):
            m = 2 * nl
            r = lax.broadcasted_iota(jnp.int32, (m, nl), 0)
            c = lax.broadcasted_iota(jnp.int32, (m, nl), 1)
            dup = jnp.where(c == jnp.right_shift(r, 1), 1.0, 0.0
                            ).astype(jnp.bfloat16)
            return jnp.dot(dup, x.astype(jnp.bfloat16),
                           preferred_element_type=jnp.float32)

        # ------------------------------ encoder -------------------------------
        b = blocks
        cout0 = b[0]["w1"][2]
        # Block 0 first conv: its input taps were precomputed in the wrapper.
        y = jnp.dot(xtap_ref[...], wslab(b[0]["w1"]),
                    preferred_element_type=jnp.float32)
        y = bn_relu(y, b[0]["g1"], NL, cout0)
        y = conv3(y, b[0]["w2"], NL, L)
        c1 = bn_relu(y, b[0]["g2"], NL, cout0)

        c2 = conv_block(pool2(c1, NL), NL // 2, L // 2, b[1])
        c3 = conv_block(pool2(c2, NL // 2), NL // 4, L // 4, b[2])
        c4 = conv_block(pool2(c3, NL // 4), NL // 8, L // 8, b[3])
        c5 = conv_block(pool2(c4, NL // 8), NL // 16, L // 16, b[4])

        # ------------------------------ decoder -------------------------------
        u6 = conv_block(up2(c5, NL // 16), NL // 8, L // 8, b[5], skip=c4)
        u7 = conv_block(up2(u6, NL // 8), NL // 4, L // 4, b[6], skip=c3)
        u8 = conv_block(up2(u7, NL // 4), NL // 2, L // 2, b[7], skip=c2)
        u9 = conv_block(up2(u8, NL // 2), NL, L, b[8], skip=c1)

        # -------------------------- final 1x1 conv ----------------------------
        fw_off, fw_rows, _ = layout["final_w"]
        fw = wbuf_ref[fw_off:fw_off + fw_rows, :1]
        fg = layout["final_g"]
        fb = pbuf_ref[fg * 8:fg * 8 + 1, 0:1]
        out_ref[...] = jnp.dot(u9.astype(jnp.bfloat16), fw,
                               preferred_element_type=jnp.float32) + fb

    return kernel


# ----------------------------------------------------------------------------
# Wrapper
# ----------------------------------------------------------------------------
def unet1d_forward(x_ncl, wbuf, pbuf, *, layout):
    """x_ncl: PyTorch-layout (N, C, L) input.  Returns (N, 1, L) f32."""
    N, C, L = x_ncl.shape
    assert L >= 16 and (L & (L - 1)) == 0, "L must be a power of two >= 16"
    NL = N * L

    # Channels-last; precompute the first conv's stacked taps (respecting the
    # per-sequence zero padding) lane-dense in the wrapper.
    x = jnp.transpose(x_ncl, (0, 2, 1)).astype(jnp.float32)          # (N, L, C)
    xm = jnp.pad(x, ((0, 0), (1, 0), (0, 0)))[:, :L, :]              # x[l-1]
    xp = jnp.pad(x, ((0, 0), (0, 1), (0, 0)))[:, 1:, :]              # x[l+1]
    x_tap = jnp.concatenate([xm, x, xp], axis=2).reshape(NL, 3 * C)
    x_tap = x_tap.astype(jnp.bfloat16)

    kernel = _make_kernel(N, L, layout)
    out = pl.pallas_call(
        kernel,
        out_shape=jax.ShapeDtypeStruct((NL, 1), jnp.float32),
        in_specs=[pl.BlockSpec(memory_space=pltpu.MemorySpace.VMEM)] * 3,
        out_specs=pl.BlockSpec(memory_space=pltpu.MemorySpace.VMEM),
    )(x_tap, wbuf, pbuf)
    return out.reshape(N, 1, L)


# ----------------------------------------------------------------------------
# Parameter init (PyTorch layouts) and packing into 2 kernel buffers
# ----------------------------------------------------------------------------
def init_params(key, n_channel=1, base_filters=8):
    """Synthetic params in true PyTorch layouts: Conv1d weight (Cout, Cin, K)."""
    bf = base_filters
    specs = [
        ("conv1", n_channel, bf), ("conv2", bf, 2 * bf), ("conv3", 2 * bf, 4 * bf),
        ("conv4", 4 * bf, 8 * bf), ("conv5", 8 * bf, 16 * bf),
        ("up6", 24 * bf, 8 * bf), ("up7", 12 * bf, 4 * bf),
        ("up8", 6 * bf, 2 * bf), ("up9", 3 * bf, bf),
    ]
    keys = jax.random.split(key, 2 * len(specs) + 1)
    params = {}
    for i, (name, cin, cout) in enumerate(specs):
        params[name] = {
            "conv1_w": 0.2 * jax.random.normal(keys[2 * i], (cout, cin, 3), jnp.float32),
            "conv1_b": jnp.zeros((cout,), jnp.float32),
            "bn1_g": jnp.ones((cout,), jnp.float32),
            "bn1_b": jnp.zeros((cout,), jnp.float32),
            "conv2_w": 0.2 * jax.random.normal(keys[2 * i + 1], (cout, cout, 3), jnp.float32),
            "conv2_b": jnp.zeros((cout,), jnp.float32),
            "bn2_g": jnp.ones((cout,), jnp.float32),
            "bn2_b": jnp.zeros((cout,), jnp.float32),
        }
    params["final_w"] = 0.2 * jax.random.normal(keys[-1], (1, bf, 1), jnp.float32)
    params["final_b"] = jnp.zeros((1,), jnp.float32)
    return params


def pack_params(params, n_channel=1, base_filters=8):
    """Pack all weights into one bf16 lane-dense slab and all bias/BN params
    into one f32 slab; return (wbuf, pbuf, static layout dict)."""
    bf = base_filters
    cfg = [
        ("conv1", n_channel, 0, bf),
        ("conv2", bf, 0, 2 * bf),
        ("conv3", 2 * bf, 0, 4 * bf),
        ("conv4", 4 * bf, 0, 8 * bf),
        ("conv5", 8 * bf, 0, 16 * bf),
        ("up6", 16 * bf, 8 * bf, 8 * bf),   # (up channels, skip channels, out)
        ("up7", 8 * bf, 4 * bf, 4 * bf),
        ("up8", 4 * bf, 2 * bf, 2 * bf),
        ("up9", 2 * bf, bf, bf),
    ]
    w_chunks, p_chunks = [], []
    w_rows = 0

    def add_wslab(mat):                      # mat: (rows, cout) f32
        nonlocal w_rows
        rows, cout = int(mat.shape[0]), int(mat.shape[1])
        off = w_rows
        slab = jnp.zeros((rows, _LANES), jnp.float32).at[:, :cout].set(mat)
        w_chunks.append(slab)
        pad = (-(off + rows)) % _WALIGN      # keep every slab offset 16-aligned
        if pad:
            w_chunks.append(jnp.zeros((pad, _LANES), jnp.float32))
        w_rows = off + rows + pad
        return (off, rows, cout)

    def add_pgroup(vecs, cout):              # rows 0..: bias, gamma, beta
        g = len(p_chunks)
        blk = jnp.zeros((8, _LANES), jnp.float32)
        for r, v in enumerate(vecs):
            blk = blk.at[r, :cout].set(v)
        p_chunks.append(blk)
        return g

    def stack_taps(w):                       # torch (cout, cin, 3) -> (3*cin, cout)
        return jnp.concatenate([w[:, :, k].T for k in range(3)], axis=0)

    blocks = []
    for name, cin_m, cin_s, cout in cfg:
        p = params[name]
        w1 = p["conv1_w"]                    # (cout, cin_m + cin_s, 3)
        entry = {"w1": add_wslab(stack_taps(w1[:, :cin_m, :]))}
        if cin_s:
            entry["w1s"] = add_wslab(stack_taps(w1[:, cin_m:, :]))
        entry["g1"] = add_pgroup([p["conv1_b"], p["bn1_g"], p["bn1_b"]], cout)
        entry["w2"] = add_wslab(stack_taps(p["conv2_w"]))
        entry["g2"] = add_pgroup([p["conv2_b"], p["bn2_g"], p["bn2_b"]], cout)
        blocks.append(entry)

    final_w = add_wslab(params["final_w"][:, :, 0].T)        # (bf, 1)
    final_g = add_pgroup([params["final_b"]], 1)

    wbuf = jnp.concatenate(w_chunks, axis=0).astype(jnp.bfloat16)
    pbuf = jnp.concatenate(p_chunks, axis=0)                 # f32
    layout = {"blocks": blocks, "final_w": final_w, "final_g": final_g}
    return wbuf, pbuf, layout


# ----------------------------------------------------------------------------
if __name__ == "__main__":
    N, C_IN, LENGTH, BASE_FILTERS = 2, 1, 16, 8

    key = jax.random.PRNGKey(0)
    k_in, k_par = jax.random.split(key)
    x = jax.random.normal(k_in, (N, C_IN, LENGTH), jnp.float32)   # PyTorch NCL
    params = init_params(k_par, n_channel=C_IN, base_filters=BASE_FILTERS)
    wbuf, pbuf, layout = pack_params(params, n_channel=C_IN,
                                     base_filters=BASE_FILTERS)

    fwd = jax.jit(functools.partial(unet1d_forward, layout=layout))
    out = fwd(x, wbuf, pbuf)
    jax.block_until_ready(out)

    assert out.shape == (N, 1, LENGTH), out.shape
    assert out.dtype == jnp.float32
    assert bool(jnp.all(jnp.isfinite(out)))
    print("KERNEL_OK")
</pallas_src>

<mosaic_0001>
module attributes {stable_mosaic.version = 11 : i64} {
  func.func @kernel(%arg0: memref<32x3xbf16, #tpu.memory_space<vmem>>, %arg1: memref<2608x128xbf16, #tpu.memory_space<vmem>>, %arg2: memref<152x128xf32, #tpu.memory_space<vmem>>, %arg3: memref<32x1xf32, #tpu.memory_space<vmem>>) attributes {dimension_semantics = [], scalar_prefetch = 0 : i64, scratch_operands = 0 : i64, tpu.core_type = #tpu.core_type<tc>} {
    %c0 = arith.constant 0 : index
    %c0_0 = arith.constant 0 : index
    %0 = vector.load %arg0[%c0, %c0_0] : memref<32x3xbf16, #tpu.memory_space<vmem>>, vector<32x3xbf16>
    %c0_1 = arith.constant 0 : index
    %c0_2 = arith.constant 0 : index
    %1 = vector.load %arg1[%c0_1, %c0_2] : memref<2608x128xbf16, #tpu.memory_space<vmem>>, vector<3x8xbf16>
    %cst = arith.constant dense<0.000000e+00> : vector<32x8xf32>
    %2 = tpu.matmul %0, %1, %cst {dimension_numbers = #tpu.dot_dimension_numbers<[1], [0], [0], [1], [0, 0, 1, 1], [], []>} : vector<32x3xbf16>, vector<3x8xbf16>, vector<32x8xf32> -> vector<32x8xf32>
    %c0_3 = arith.constant 0 : index
    %c0_4 = arith.constant 0 : index
    %3 = vector.load %arg2[%c0_3, %c0_4] : memref<152x128xf32, #tpu.memory_space<vmem>>, vector<8x8xf32>
    %4 = vector.extract_strided_slice %3 {offsets = [0, 0], sizes = [1, 8], strides = [1, 1]} : vector<8x8xf32> to vector<1x8xf32>
    %5 = vector.extract_strided_slice %3 {offsets = [1, 0], sizes = [1, 8], strides = [1, 1]} : vector<8x8xf32> to vector<1x8xf32>
    %6 = vector.extract_strided_slice %3 {offsets = [2, 0], sizes = [1, 8], strides = [1, 1]} : vector<8x8xf32> to vector<1x8xf32>
    %7 = vector.broadcast %4 : vector<1x8xf32> to vector<32x8xf32>
    %8 = arith.addf %2, %7 : vector<32x8xf32>
    %cst_5 = arith.constant dense<0.000000e+00> : vector<8xf32>
    %9 = vector.multi_reduction <add>, %8, %cst_5 [0] : vector<32x8xf32> to vector<8xf32>
    %10 = vector.shape_cast %9 : vector<8xf32> to vector<1x8xf32>
    %cst_6 = arith.constant 3.125000e-02 : f32
    %11 = vector.broadcast %cst_6 : f32 to vector<1x8xf32>
    %12 = arith.mulf %10, %11 : vector<1x8xf32>
    %13 = arith.mulf %8, %8 : vector<32x8xf32>
    %cst_7 = arith.constant dense<0.000000e+00> : vector<8xf32>
    %14 = vector.multi_reduction <add>, %13, %cst_7 [0] : vector<32x8xf32> to vector<8xf32>
    %15 = vector.shape_cast %14 : vector<8xf32> to vector<1x8xf32>
    %cst_8 = arith.constant 3.125000e-02 : f32
    %16 = vector.broadcast %cst_8 : f32 to vector<1x8xf32>
    %17 = arith.mulf %15, %16 : vector<1x8xf32>
    %18 = arith.mulf %12, %12 : vector<1x8xf32>
    %19 = arith.subf %17, %18 : vector<1x8xf32>
    %cst_9 = arith.constant 0.000000e+00 : f32
    %20 = vector.broadcast %cst_9 : f32 to vector<1x8xf32>
    %21 = arith.maximumf %19, %20 : vector<1x8xf32>
    %cst_10 = arith.constant 9.99999974E-6 : f32
    %22 = vector.broadcast %cst_10 : f32 to vector<1x8xf32>
    %23 = arith.addf %21, %22 : vector<1x8xf32>
    %24 = math.rsqrt %23 : vector<1x8xf32>
    %25 = vector.broadcast %12 : vector<1x8xf32> to vector<32x8xf32>
    %26 = arith.subf %8, %25 : vector<32x8xf32>
    %27 = arith.mulf %24, %5 : vector<1x8xf32>
    %28 = vector.broadcast %27 : vector<1x8xf32> to vector<32x8xf32>
    %29 = arith.mulf %26, %28 : vector<32x8xf32>
    %30 = vector.broadcast %6 : vector<1x8xf32> to vector<32x8xf32>
    %31 = arith.addf %29, %30 : vector<32x8xf32>
    %cst_11 = arith.constant 0.000000e+00 : f32
    %32 = vector.broadcast %cst_11 : f32 to vector<32x8xf32>
    %33 = arith.maximumf %31, %32 : vector<32x8xf32>
    %34 = tpu.iota {dimensions = array<i32: 0>} : vector<32x8xi32>
    %c15_i32 = arith.constant 15 : i32
    %35 = vector.broadcast %c15_i32 : i32 to vector<32x8xi32>
    %36 = arith.andi %34, %35 : vector<32x8xi32>
    %c0_i32 = arith.constant 0 : i32
    %37 = vector.broadcast %c0_i32 : i32 to vector<32x8xi32>
    %38 = arith.cmpi eq, %36, %37 : vector<32x8xi32>
    %c1_i32 = arith.constant 1 : i32
    %39 = tpu.dynamic_rotate %33 by %c1_i32 dim 0 : vector<32x8xf32>, i32 -> vector<32x8xf32>
    %cst_12 = arith.constant 0.000000e+00 : f32
    %40 = vector.broadcast %cst_12 : f32 to vector<32x8xf32>
    %41 = arith.select %38, %40, %39 : vector<32x8xi1>, vector<32x8xf32>
    %c15_i32_13 = arith.constant 15 : i32
    %42 = vector.broadcast %c15_i32_13 : i32 to vector<32x8xi32>
    %43 = arith.cmpi eq, %36, %42 : vector<32x8xi32>
    %c31_i32 = arith.constant 31 : i32
    %44 = tpu.dynamic_rotate %33 by %c31_i32 dim 0 : vector<32x8xf32>, i32 -> vector<32x8xf32>
    %cst_14 = arith.constant 0.000000e+00 : f32
    %45 = vector.broadcast %cst_14 : f32 to vector<32x8xf32>
    %46 = arith.select %43, %45, %44 : vector<32x8xi1>, vector<32x8xf32>
    %47 = tpu.concatenate %41, %33, %46 in 1 : vector<32x8xf32>, vector<32x8xf32>, vector<32x8xf32> -> vector<32x24xf32>
    %48 = arith.truncf %47 : vector<32x24xf32> to vector<32x24xbf16>
    %c16 = arith.constant 16 : index
    %c0_15 = arith.constant 0 : index
    %49 = vector.load %arg1[%c16, %c0_15] : memref<2608x128xbf16, #tpu.memory_space<vmem>>, vector<24x8xbf16>
    %cst_16 = arith.constant dense<0.000000e+00> : vector<32x8xf32>
    %50 = tpu.matmul %48, %49, %cst_16 {dimension_numbers = #tpu.dot_dimension_numbers<[1], [0], [0], [1], [0, 0, 1, 1], [], []>} : vector<32x24xbf16>, vector<24x8xbf16>, vector<32x8xf32> -> vector<32x8xf32>
    %c8 = arith.constant 8 : index
    %c0_17 = arith.constant 0 : index
    %51 = vector.load %arg2[%c8, %c0_17] : memref<152x128xf32, #tpu.memory_space<vmem>>, vector<8x8xf32>
    %52 = vector.extract_strided_slice %51 {offsets = [0, 0], sizes = [1, 8], strides = [1, 1]} : vector<8x8xf32> to vector<1x8xf32>
    %53 = vector.extract_strided_slice %51 {offsets = [1, 0], sizes = [1, 8], strides = [1, 1]} : vector<8x8xf32> to vector<1x8xf32>
    %54 = vector.extract_strided_slice %51 {offsets = [2, 0], sizes = [1, 8], strides = [1, 1]} : vector<8x8xf32> to vector<1x8xf32>
    %55 = vector.broadcast %52 : vector<1x8xf32> to vector<32x8xf32>
    %56 = arith.addf %50, %55 : vector<32x8xf32>
    %cst_18 = arith.constant dense<0.000000e+00> : vector<8xf32>
    %57 = vector.multi_reduction <add>, %56, %cst_18 [0] : vector<32x8xf32> to vector<8xf32>
    %58 = vector.shape_cast %57 : vector<8xf32> to vector<1x8xf32>
    %cst_19 = arith.constant 3.125000e-02 : f32
    %59 = vector.broadcast %cst_19 : f32 to vector<1x8xf32>
    %60 = arith.mulf %58, %59 : vector<1x8xf32>
    %61 = arith.mulf %56, %56 : vector<32x8xf32>
    %cst_20 = arith.constant dense<0.000000e+00> : vector<8xf32>
    %62 = vector.multi_reduction <add>, %61, %cst_20 [0] : vector<32x8xf32> to vector<8xf32>
    %63 = vector.shape_cast %62 : vector<8xf32> to vector<1x8xf32>
    %cst_21 = arith.constant 3.125000e-02 : f32
    %64 = vector.broadcast %cst_21 : f32 to vector<1x8xf32>
    %65 = arith.mulf %63, %64 : vector<1x8xf32>
    %66 = arith.mulf %60, %60 : vector<1x8xf32>
    %67 = arith.subf %65, %66 : vector<1x8xf32>
    %cst_22 = arith.constant 0.000000e+00 : f32
    %68 = vector.broadcast %cst_22 : f32 to vector<1x8xf32>
    %69 = arith.maximumf %67, %68 : vector<1x8xf32>
    %cst_23 = arith.constant 9.99999974E-6 : f32
    %70 = vector.broadcast %cst_23 : f32 to vector<1x8xf32>
    %71 = arith.addf %69, %70 : vector<1x8xf32>
    %72 = math.rsqrt %71 : vector<1x8xf32>
    %73 = vector.broadcast %60 : vector<1x8xf32> to vector<32x8xf32>
    %74 = arith.subf %56, %73 : vector<32x8xf32>
    %75 = arith.mulf %72, %53 : vector<1x8xf32>
    %76 = vector.broadcast %75 : vector<1x8xf32> to vector<32x8xf32>
    %77 = arith.mulf %74, %76 : vector<32x8xf32>
    %78 = vector.broadcast %54 : vector<1x8xf32> to vector<32x8xf32>
    %79 = arith.addf %77, %78 : vector<32x8xf32>
    %cst_24 = arith.constant 0.000000e+00 : f32
    %80 = vector.broadcast %cst_24 : f32 to vector<32x8xf32>
    %81 = arith.maximumf %79, %80 : vector<32x8xf32>
    %82 = tpu.iota {dimensions = array<i32: 0>} : vector<16x32xi32>
    %83 = tpu.iota {dimensions = array<i32: 1>} : vector<16x32xi32>
    %c2_i32 = arith.constant 2 : i32
    %84 = vector.broadcast %c2_i32 : i32 to vector<16x32xi32>
    %85 = arith.muli %84, %82 : vector<16x32xi32>
    %86 = arith.cmpi eq, %83, %85 : vector<16x32xi32>
    %cst_25 = arith.constant 1.000000e+00 : f32
    %cst_26 = arith.constant 0.000000e+00 : f32
    %87 = vector.broadcast %cst_25 : f32 to vector<16x32xf32>
    %88 = vector.broadcast %cst_26 : f32 to vector<16x32xf32>
    %89 = arith.select %86, %87, %88 : vector<16x32xi1>, vector<16x32xf32>
    %90 = arith.truncf %89 : vector<16x32xf32> to vector<16x32xbf16>
    %c2_i32_27 = arith.constant 2 : i32
    %91 = vector.broadcast %c2_i32_27 : i32 to vector<16x32xi32>
    %92 = arith.muli %91, %82 : vector<16x32xi32>
    %c1_i32_28 = arith.constant 1 : i32
    %93 = vector.broadcast %c1_i32_28 : i32 to vector<16x32xi32>
    %94 = arith.addi %92, %93 : vector<16x32xi32>
    %95 = arith.cmpi eq, %83, %94 : vector<16x32xi32>
    %cst_29 = arith.constant 1.000000e+00 : f32
    %cst_30 = arith.constant 0.000000e+00 : f32
    %96 = vector.broadcast %cst_29 : f32 to vector<16x32xf32>
    %97 = vector.broadcast %cst_30 : f32 to vector<16x32xf32>
    %98 = arith.select %95, %96, %97 : vector<16x32xi1>, vector<16x32xf32>
    %99 = arith.truncf %98 : vector<16x32xf32> to vector<16x32xbf16>
    %100 = arith.truncf %81 : vector<32x8xf32> to vector<32x8xbf16>
    %cst_31 = arith.constant dense<0.000000e+00> : vector<16x8xf32>
    %101 = tpu.matmul %90, %100, %cst_31 {dimension_numbers = #tpu.dot_dimension_numbers<[1], [0], [0], [1], [0, 0, 1, 1], [], []>} : vector<16x32xbf16>, vector<32x8xbf16>, vector<16x8xf32> -> vector<16x8xf32>
    %cst_32 = arith.constant dense<0.000000e+00> : vector<16x8xf32>
    %102 = tpu.matmul %99, %100, %cst_32 {dimension_numbers = #tpu.dot_dimension_numbers<[1], [0], [0], [1], [0, 0, 1, 1], [], []>} : vector<16x32xbf16>, vector<32x8xbf16>, vector<16x8xf32> -> vector<16x8xf32>
    %103 = arith.maximumf %101, %102 : vector<16x8xf32>
    %104 = tpu.iota {dimensions = array<i32: 0>} : vector<16x8xi32>
    %c7_i32 = arith.constant 7 : i32
    %105 = vector.broadcast %c7_i32 : i32 to vector<16x8xi32>
    %106 = arith.andi %104, %105 : vector<16x8xi32>
    %c0_i32_33 = arith.constant 0 : i32
    %107 = vector.broadcast %c0_i32_33 : i32 to vector<16x8xi32>
    %108 = arith.cmpi eq, %106, %107 : vector<16x8xi32>
    %c1_i32_34 = arith.constant 1 : i32
    %109 = tpu.dynamic_rotate %103 by %c1_i32_34 dim 0 : vector<16x8xf32>, i32 -> vector<16x8xf32>
    %cst_35 = arith.constant 0.000000e+00 : f32
    %110 = vector.broadcast %cst_35 : f32 to vector<16x8xf32>
    %111 = arith.select %108, %110, %109 : vector<16x8xi1>, vector<16x8xf32>
    %c7_i32_36 = arith.constant 7 : i32
    %112 = vector.broadcast %c7_i32_36 : i32 to vector<16x8xi32>
    %113 = arith.cmpi eq, %106, %112 : vector<16x8xi32>
    %c15_i32_37 = arith.constant 15 : i32
    %114 = tpu.dynamic_rotate %103 by %c15_i32_37 dim 0 : vector<16x8xf32>, i32 -> vector<16x8xf32>
    %cst_38 = arith.constant 0.000000e+00 : f32
    %115 = vector.broadcast %cst_38 : f32 to vector<16x8xf32>
    %116 = arith.select %113, %115, %114 : vector<16x8xi1>, vector<16x8xf32>
    %117 = tpu.concatenate %111, %103, %116 in 1 : vector<16x8xf32>, vector<16x8xf32>, vector<16x8xf32> -> vector<16x24xf32>
    %118 = arith.truncf %117 : vector<16x24xf32> to vector<16x24xbf16>
    %c48 = arith.constant 48 : index
    %c0_39 = arith.constant 0 : index
    %119 = vector.load %arg1[%c48, %c0_39] : memref<2608x128xbf16, #tpu.memory_space<vmem>>, vector<24x16xbf16>
    %cst_40 = arith.constant dense<0.000000e+00> : vector<16x16xf32>
    %120 = tpu.matmul %118, %119, %cst_40 {dimension_numbers = #tpu.dot_dimension_numbers<[1], [0], [0], [1], [0, 0, 1, 1], [], []>} : vector<16x24xbf16>, vector<24x16xbf16>, vector<16x16xf32> -> vector<16x16xf32>
    %c16_41 = arith.constant 16 : index
    %c0_42 = arith.constant 0 : index
    %121 = vector.load %arg2[%c16_41, %c0_42] : memref<152x128xf32, #tpu.memory_space<vmem>>, vector<8x16xf32>
    %122 = vector.extract_strided_slice %121 {offsets = [0, 0], sizes = [1, 16], strides = [1, 1]} : vector<8x16xf32> to vector<1x16xf32>
    %123 = vector.extract_strided_slice %121 {offsets = [1, 0], sizes = [1, 16], strides = [1, 1]} : vector<8x16xf32> to vector<1x16xf32>
    %124 = vector.extract_strided_slice %121 {offsets = [2, 0], sizes = [1, 16], strides = [1, 1]} : vector<8x16xf32> to vector<1x16xf32>
    %125 = vector.broadcast %122 : vector<1x16xf32> to vector<16x16xf32>
    %126 = arith.addf %120, %125 : vector<16x16xf32>
    %cst_43 = arith.constant dense<0.000000e+00> : vector<16xf32>
    %127 = vector.multi_reduction <add>, %126, %cst_43 [0] : vector<16x16xf32> to vector<16xf32>
    %128 = vector.shape_cast %127 : vector<16xf32> to vector<1x16xf32>
    %cst_44 = arith.constant 6.250000e-02 : f32
    %129 = vector.broadcast %cst_44 : f32 to vector<1x16xf32>
    %130 = arith.mulf %128, %129 : vector<1x16xf32>
    %131 = arith.mulf %126, %126 : vector<16x16xf32>
    %cst_45 = arith.constant dense<0.000000e+00> : vector<16xf32>
    %132 = vector.multi_reduction <add>, %131, %cst_45 [0] : vector<16x16xf32> to vector<16xf32>
    %133 = vector.shape_cast %132 : vector<16xf32> to vector<1x16xf32>
    %cst_46 = arith.constant 6.250000e-02 : f32
    %134 = vector.broadcast %cst_46 : f32 to vector<1x16xf32>
    %135 = arith.mulf %133, %134 : vector<1x16xf32>
    %136 = arith.mulf %130, %130 : vector<1x16xf32>
    %137 = arith.subf %135, %136 : vector<1x16xf32>
    %cst_47 = arith.constant 0.000000e+00 : f32
    %138 = vector.broadcast %cst_47 : f32 to vector<1x16xf32>
    %139 = arith.maximumf %137, %138 : vector<1x16xf32>
    %cst_48 = arith.constant 9.99999974E-6 : f32
    %140 = vector.broadcast %cst_48 : f32 to vector<1x16xf32>
    %141 = arith.addf %139, %140 : vector<1x16xf32>
    %142 = math.rsqrt %141 : vector<1x16xf32>
    %143 = vector.broadcast %130 : vector<1x16xf32> to vector<16x16xf32>
    %144 = arith.subf %126, %143 : vector<16x16xf32>
    %145 = arith.mulf %142, %123 : vector<1x16xf32>
    %146 = vector.broadcast %145 : vector<1x16xf32> to vector<16x16xf32>
    %147 = arith.mulf %144, %146 : vector<16x16xf32>
    %148 = vector.broadcast %124 : vector<1x16xf32> to vector<16x16xf32>
    %149 = arith.addf %147, %148 : vector<16x16xf32>
    %cst_49 = arith.constant 0.000000e+00 : f32
    %150 = vector.broadcast %cst_49 : f32 to vector<16x16xf32>
    %151 = arith.maximumf %149, %150 : vector<16x16xf32>
    %152 = tpu.iota {dimensions = array<i32: 0>} : vector<16x16xi32>
    %c7_i32_50 = arith.constant 7 : i32
    %153 = vector.broadcast %c7_i32_50 : i32 to vector<16x16xi32>
    %154 = arith.andi %152, %153 : vector<16x16xi32>
    %c0_i32_51 = arith.constant 0 : i32
    %155 = vector.broadcast %c0_i32_51 : i32 to vector<16x16xi32>
    %156 = arith.cmpi eq, %154, %155 : vector<16x16xi32>
    %c1_i32_52 = arith.constant 1 : i32
    %157 = tpu.dynamic_rotate %151 by %c1_i32_52 dim 0 : vector<16x16xf32>, i32 -> vector<16x16xf32>
    %cst_53 = arith.constant 0.000000e+00 : f32
    %158 = vector.broadcast %cst_53 : f32 to vector<16x16xf32>
    %159 = arith.select %156, %158, %157 : vector<16x16xi1>, vector<16x16xf32>
    %c7_i32_54 = arith.constant 7 : i32
    %160 = vector.broadcast %c7_i32_54 : i32 to vector<16x16xi32>
    %161 = arith.cmpi eq, %154, %160 : vector<16x16xi32>
    %c15_i32_55 = arith.constant 15 : i32
    %162 = tpu.dynamic_rotate %151 by %c15_i32_55 dim 0 : vector<16x16xf32>, i32 -> vector<16x16xf32>
    %cst_56 = arith.constant 0.000000e+00 : f32
    %163 = vector.broadcast %cst_56 : f32 to vector<16x16xf32>
    %164 = arith.select %161, %163, %162 : vector<16x16xi1>, vector<16x16xf32>
    %165 = tpu.concatenate %159, %151, %164 in 1 : vector<16x16xf32>, vector<16x16xf32>, vector<16x16xf32> -> vector<16x48xf32>
    %166 = arith.truncf %165 : vector<16x48xf32> to vector<16x48xbf16>
    %c80 = arith.constant 80 : index
    %c0_57 = arith.constant 0 : index
    %167 = vector.load %arg1[%c80, %c0_57] : memref<2608x128xbf16, #tpu.memory_space<vmem>>, vector<48x16xbf16>
    %cst_58 = arith.constant dense<0.000000e+00> : vector<16x16xf32>
    %168 = tpu.matmul %166, %167, %cst_58 {dimension_numbers = #tpu.dot_dimension_numbers<[1], [0], [0], [1], [0, 0, 1, 1], [], []>} : vector<16x48xbf16>, vector<48x16xbf16>, vector<16x16xf32> -> vector<16x16xf32>
    %c24 = arith.constant 24 : index
    %c0_59 = arith.constant 0 : index
    %169 = vector.load %arg2[%c24, %c0_59] : memref<152x128xf32, #tpu.memory_space<vmem>>, vector<8x16xf32>
    %170 = vector.extract_strided_slice %169 {offsets = [0, 0], sizes = [1, 16], strides = [1, 1]} : vector<8x16xf32> to vector<1x16xf32>
    %171 = vector.extract_strided_slice %169 {offsets = [1, 0], sizes = [1, 16], strides = [1, 1]} : vector<8x16xf32> to vector<1x16xf32>
    %172 = vector.extract_strided_slice %169 {offsets = [2, 0], sizes = [1, 16], strides = [1, 1]} : vector<8x16xf32> to vector<1x16xf32>
    %173 = vector.broadcast %170 : vector<1x16xf32> to vector<16x16xf32>
    %174 = arith.addf %168, %173 : vector<16x16xf32>
    %cst_60 = arith.constant dense<0.000000e+00> : vector<16xf32>
    %175 = vector.multi_reduction <add>, %174, %cst_60 [0] : vector<16x16xf32> to vector<16xf32>
    %176 = vector.shape_cast %175 : vector<16xf32> to vector<1x16xf32>
    %cst_61 = arith.constant 6.250000e-02 : f32
    %177 = vector.broadcast %cst_61 : f32 to vector<1x16xf32>
    %178 = arith.mulf %176, %177 : vector<1x16xf32>
    %179 = arith.mulf %174, %174 : vector<16x16xf32>
    %cst_62 = arith.constant dense<0.000000e+00> : vector<16xf32>
    %180 = vector.multi_reduction <add>, %179, %cst_62 [0] : vector<16x16xf32> to vector<16xf32>
    %181 = vector.shape_cast %180 : vector<16xf32> to vector<1x16xf32>
    %cst_63 = arith.constant 6.250000e-02 : f32
    %182 = vector.broadcast %cst_63 : f32 to vector<1x16xf32>
    %183 = arith.mulf %181, %182 : vector<1x16xf32>
    %184 = arith.mulf %178, %178 : vector<1x16xf32>
    %185 = arith.subf %183, %184 : vector<1x16xf32>
    %cst_64 = arith.constant 0.000000e+00 : f32
    %186 = vector.broadcast %cst_64 : f32 to vector<1x16xf32>
    %187 = arith.maximumf %185, %186 : vector<1x16xf32>
    %cst_65 = arith.constant 9.99999974E-6 : f32
    %188 = vector.broadcast %cst_65 : f32 to vector<1x16xf32>
    %189 = arith.addf %187, %188 : vector<1x16xf32>
    %190 = math.rsqrt %189 : vector<1x16xf32>
    %191 = vector.broadcast %178 : vector<1x16xf32> to vector<16x16xf32>
    %192 = arith.subf %174, %191 : vector<16x16xf32>
    %193 = arith.mulf %190, %171 : vector<1x16xf32>
    %194 = vector.broadcast %193 : vector<1x16xf32> to vector<16x16xf32>
    %195 = arith.mulf %192, %194 : vector<16x16xf32>
    %196 = vector.broadcast %172 : vector<1x16xf32> to vector<16x16xf32>
    %197 = arith.addf %195, %196 : vector<16x16xf32>
    %cst_66 = arith.constant 0.000000e+00 : f32
    %198 = vector.broadcast %cst_66 : f32 to vector<16x16xf32>
    %199 = arith.maximumf %197, %198 : vector<16x16xf32>
    %200 = tpu.iota {dimensions = array<i32: 0>} : vector<8x16xi32>
    %201 = tpu.iota {dimensions = array<i32: 1>} : vector<8x16xi32>
    %c2_i32_67 = arith.constant 2 : i32
    %202 = vector.broadcast %c2_i32_67 : i32 to vector<8x16xi32>
    %203 = arith.muli %202, %200 : vector<8x16xi32>
    %204 = arith.cmpi eq, %201, %203 : vector<8x16xi32>
    %cst_68 = arith.constant 1.000000e+00 : f32
    %cst_69 = arith.constant 0.000000e+00 : f32
    %205 = vector.broadcast %cst_68 : f32 to vector<8x16xf32>
    %206 = vector.broadcast %cst_69 : f32 to vector<8x16xf32>
    %207 = arith.select %204, %205, %206 : vector<8x16xi1>, vector<8x16xf32>
    %208 = arith.truncf %207 : vector<8x16xf32> to vector<8x16xbf16>
    %c2_i32_70 = arith.constant 2 : i32
    %209 = vector.broadcast %c2_i32_70 : i32 to vector<8x16xi32>
    %210 = arith.muli %209, %200 : vector<8x16xi32>
    %c1_i32_71 = arith.constant 1 : i32
    %211 = vector.broadcast %c1_i32_71 : i32 to vector<8x16xi32>
    %212 = arith.addi %210, %211 : vector<8x16xi32>
    %213 = arith.cmpi eq, %201, %212 : vector<8x16xi32>
    %cst_72 = arith.constant 1.000000e+00 : f32
    %cst_73 = arith.constant 0.000000e+00 : f32
    %214 = vector.broadcast %cst_72 : f32 to vector<8x16xf32>
    %215 = vector.broadcast %cst_73 : f32 to vector<8x16xf32>
    %216 = arith.select %213, %214, %215 : vector<8x16xi1>, vector<8x16xf32>
    %217 = arith.truncf %216 : vector<8x16xf32> to vector<8x16xbf16>
    %218 = arith.truncf %199 : vector<16x16xf32> to vector<16x16xbf16>
    %cst_74 = arith.constant dense<0.000000e+00> : vector<8x16xf32>
    %219 = tpu.matmul %208, %218, %cst_74 {dimension_numbers = #tpu.dot_dimension_numbers<[1], [0], [0], [1], [0, 0, 1, 1], [], []>} : vector<8x16xbf16>, vector<16x16xbf16>, vector<8x16xf32> -> vector<8x16xf32>
    %cst_75 = arith.constant dense<0.000000e+00> : vector<8x16xf32>
    %220 = tpu.matmul %217, %218, %cst_75 {dimension_numbers = #tpu.dot_dimension_numbers<[1], [0], [0], [1], [0, 0, 1, 1], [], []>} : vector<8x16xbf16>, vector<16x16xbf16>, vector<8x16xf32> -> vector<8x16xf32>
    %221 = arith.maximumf %219, %220 : vector<8x16xf32>
    %222 = tpu.iota {dimensions = array<i32: 0>} : vector<8x16xi32>
    %c3_i32 = arith.constant 3 : i32
    %223 = vector.broadcast %c3_i32 : i32 to vector<8x16xi32>
    %224 = arith.andi %222, %223 : vector<8x16xi32>
    %c0_i32_76 = arith.constant 0 : i32
    %225 = vector.broadcast %c0_i32_76 : i32 to vector<8x16xi32>
    %226 = arith.cmpi eq, %224, %225 : vector<8x16xi32>
    %c1_i32_77 = arith.constant 1 : i32
    %227 = tpu.dynamic_rotate %221 by %c1_i32_77 dim 0 : vector<8x16xf32>, i32 -> vector<8x16xf32>
    %cst_78 = arith.constant 0.000000e+00 : f32
    %228 = vector.broadcast %cst_78 : f32 to vector<8x16xf32>
    %229 = arith.select %226, %228, %227 : vector<8x16xi1>, vector<8x16xf32>
    %c3_i32_79 = arith.constant 3 : i32
    %230 = vector.broadcast %c3_i32_79 : i32 to vector<8x16xi32>
    %231 = arith.cmpi eq, %224, %230 : vector<8x16xi32>
    %c7_i32_80 = arith.constant 7 : i32
    %232 = tpu.dynamic_rotate %221 by %c7_i32_80 dim 0 : vector<8x16xf32>, i32 -> vector<8x16xf32>
    %cst_81 = arith.constant 0.000000e+00 : f32
    %233 = vector.broadcast %cst_81 : f32 to vector<8x16xf32>
    %234 = arith.select %231, %233, %232 : vector<8x16xi1>, vector<8x16xf32>
    %235 = tpu.concatenate %229, %221, %234 in 1 : vector<8x16xf32>, vector<8x16xf32>, vector<8x16xf32> -> vector<8x48xf32>
    %236 = arith.truncf %235 : vector<8x48xf32> to vector<8x48xbf16>
    %c128 = arith.constant 128 : index
    %c0_82 = arith.constant 0 : index
    %237 = vector.load %arg1[%c128, %c0_82] : memref<2608x128xbf16, #tpu.memory_space<vmem>>, vector<48x32xbf16>
    %cst_83 = arith.constant dense<0.000000e+00> : vector<8x32xf32>
    %238 = tpu.matmul %236, %237, %cst_83 {dimension_numbers = #tpu.dot_dimension_numbers<[1], [0], [0], [1], [0, 0, 1, 1], [], []>} : vector<8x48xbf16>, vector<48x32xbf16>, vector<8x32xf32> -> vector<8x32xf32>
    %c32 = arith.constant 32 : index
    %c0_84 = arith.constant 0 : index
    %239 = vector.load %arg2[%c32, %c0_84] : memref<152x128xf32, #tpu.memory_space<vmem>>, vector<8x32xf32>
    %240 = vector.extract_strided_slice %239 {offsets = [0, 0], sizes = [1, 32], strides = [1, 1]} : vector<8x32xf32> to vector<1x32xf32>
    %241 = vector.extract_strided_slice %239 {offsets = [1, 0], sizes = [1, 32], strides = [1, 1]} : vector<8x32xf32> to vector<1x32xf32>
    %242 = vector.extract_strided_slice %239 {offsets = [2, 0], sizes = [1, 32], strides = [1, 1]} : vector<8x32xf32> to vector<1x32xf32>
    %243 = vector.broadcast %240 : vector<1x32xf32> to vector<8x32xf32>
    %244 = arith.addf %238, %243 : vector<8x32xf32>
    %cst_85 = arith.constant dense<0.000000e+00> : vector<32xf32>
    %245 = vector.multi_reduction <add>, %244, %cst_85 [0] : vector<8x32xf32> to vector<32xf32>
    %246 = vector.shape_cast %245 : vector<32xf32> to vector<1x32xf32>
    %cst_86 = arith.constant 1.250000e-01 : f32
    %247 = vector.broadcast %cst_86 : f32 to vector<1x32xf32>
    %248 = arith.mulf %246, %247 : vector<1x32xf32>
    %249 = arith.mulf %244, %244 : vector<8x32xf32>
    %cst_87 = arith.constant dense<0.000000e+00> : vector<32xf32>
    %250 = vector.multi_reduction <add>, %249, %cst_87 [0] : vector<8x32xf32> to vector<32xf32>
    %251 = vector.shape_cast %250 : vector<32xf32> to vector<1x32xf32>
    %cst_88 = arith.constant 1.250000e-01 : f32
    %252 = vector.broadcast %cst_88 : f32 to vector<1x32xf32>
    %253 = arith.mulf %251, %252 : vector<1x32xf32>
    %254 = arith.mulf %248, %248 : vector<1x32xf32>
    %255 = arith.subf %253, %254 : vector<1x32xf32>
    %cst_89 = arith.constant 0.000000e+00 : f32
    %256 = vector.broadcast %cst_89 : f32 to vector<1x32xf32>
    %257 = arith.maximumf %255, %256 : vector<1x32xf32>
    %cst_90 = arith.constant 9.99999974E-6 : f32
    %258 = vector.broadcast %cst_90 : f32 to vector<1x32xf32>
    %259 = arith.addf %257, %258 : vector<1x32xf32>
    %260 = math.rsqrt %259 : vector<1x32xf32>
    %261 = vector.broadcast %248 : vector<1x32xf32> to vector<8x32xf32>
    %262 = arith.subf %244, %261 : vector<8x32xf32>
    %263 = arith.mulf %260, %241 : vector<1x32xf32>
    %264 = vector.broadcast %263 : vector<1x32xf32> to vector<8x32xf32>
    %265 = arith.mulf %262, %264 : vector<8x32xf32>
    %266 = vector.broadcast %242 : vector<1x32xf32> to vector<8x32xf32>
    %267 = arith.addf %265, %266 : vector<8x32xf32>
    %cst_91 = arith.constant 0.000000e+00 : f32
    %268 = vector.broadcast %cst_91 : f32 to vector<8x32xf32>
    %269 = arith.maximumf %267, %268 : vector<8x32xf32>
    %270 = tpu.iota {dimensions = array<i32: 0>} : vector<8x32xi32>
    %c3_i32_92 = arith.constant 3 : i32
    %271 = vector.broadcast %c3_i32_92 : i32 to vector<8x32xi32>
    %272 = arith.andi %270, %271 : vector<8x32xi32>
    %c0_i32_93 = arith.constant 0 : i32
    %273 = vector.broadcast %c0_i32_93 : i32 to vector<8x32xi32>
    %274 = arith.cmpi eq, %272, %273 : vector<8x32xi32>
    %c1_i32_94 = arith.constant 1 : i32
    %275 = tpu.dynamic_rotate %269 by %c1_i32_94 dim 0 : vector<8x32xf32>, i32 -> vector<8x32xf32>
    %cst_95 = arith.constant 0.000000e+00 : f32
    %276 = vector.broadcast %cst_95 : f32 to vector<8x32xf32>
    %277 = arith.select %274, %276, %275 : vector<8x32xi1>, vector<8x32xf32>
    %c3_i32_96 = arith.constant 3 : i32
    %278 = vector.broadcast %c3_i32_96 : i32 to vector<8x32xi32>
    %279 = arith.cmpi eq, %272, %278 : vector<8x32xi32>
    %c7_i32_97 = arith.constant 7 : i32
    %280 = tpu.dynamic_rotate %269 by %c7_i32_97 dim 0 : vector<8x32xf32>, i32 -> vector<8x32xf32>
    %cst_98 = arith.constant 0.000000e+00 : f32
    %281 = vector.broadcast %cst_98 : f32 to vector<8x32xf32>
    %282 = arith.select %279, %281, %280 : vector<8x32xi1>, vector<8x32xf32>
    %283 = tpu.concatenate %277, %269, %282 in 1 : vector<8x32xf32>, vector<8x32xf32>, vector<8x32xf32> -> vector<8x96xf32>
    %284 = arith.truncf %283 : vector<8x96xf32> to vector<8x96xbf16>
    %c176 = arith.constant 176 : index
    %c0_99 = arith.constant 0 : index
    %285 = vector.load %arg1[%c176, %c0_99] : memref<2608x128xbf16, #tpu.memory_space<vmem>>, vector<96x32xbf16>
    %cst_100 = arith.constant dense<0.000000e+00> : vector<8x32xf32>
    %286 = tpu.matmul %284, %285, %cst_100 {dimension_numbers = #tpu.dot_dimension_numbers<[1], [0], [0], [1], [0, 0, 1, 1], [], []>} : vector<8x96xbf16>, vector<96x32xbf16>, vector<8x32xf32> -> vector<8x32xf32>
    %c40 = arith.constant 40 : index
    %c0_101 = arith.constant 0 : index
    %287 = vector.load %arg2[%c40, %c0_101] : memref<152x128xf32, #tpu.memory_space<vmem>>, vector<8x32xf32>
    %288 = vector.extract_strided_slice %287 {offsets = [0, 0], sizes = [1, 32], strides = [1, 1]} : vector<8x32xf32> to vector<1x32xf32>
    %289 = vector.extract_strided_slice %287 {offsets = [1, 0], sizes = [1, 32], strides = [1, 1]} : vector<8x32xf32> to vector<1x32xf32>
    %290 = vector.extract_strided_slice %287 {offsets = [2, 0], sizes = [1, 32], strides = [1, 1]} : vector<8x32xf32> to vector<1x32xf32>
    %291 = vector.broadcast %288 : vector<1x32xf32> to vector<8x32xf32>
    %292 = arith.addf %286, %291 : vector<8x32xf32>
    %cst_102 = arith.constant dense<0.000000e+00> : vector<32xf32>
    %293 = vector.multi_reduction <add>, %292, %cst_102 [0] : vector<8x32xf32> to vector<32xf32>
    %294 = vector.shape_cast %293 : vector<32xf32> to vector<1x32xf32>
    %cst_103 = arith.constant 1.250000e-01 : f32
    %295 = vector.broadcast %cst_103 : f32 to vector<1x32xf32>
    %296 = arith.mulf %294, %295 : vector<1x32xf32>
    %297 = arith.mulf %292, %292 : vector<8x32xf32>
    %cst_104 = arith.constant dense<0.000000e+00> : vector<32xf32>
    %298 = vector.multi_reduction <add>, %297, %cst_104 [0] : vector<8x32xf32> to vector<32xf32>
    %299 = vector.shape_cast %298 : vector<32xf32> to vector<1x32xf32>
    %cst_105 = arith.constant 1.250000e-01 : f32
    %300 = vector.broadcast %cst_105 : f32 to vector<1x32xf32>
    %301 = arith.mulf %299, %300 : vector<1x32xf32>
    %302 = arith.mulf %296, %296 : vector<1x32xf32>
    %303 = arith.subf %301, %302 : vector<1x32xf32>
    %cst_106 = arith.constant 0.000000e+00 : f32
    %304 = vector.broadcast %cst_106 : f32 to vector<1x32xf32>
    %305 = arith.maximumf %303, %304 : vector<1x32xf32>
    %cst_107 = arith.constant 9.99999974E-6 : f32
    %306 = vector.broadcast %cst_107 : f32 to vector<1x32xf32>
    %307 = arith.addf %305, %306 : vector<1x32xf32>
    %308 = math.rsqrt %307 : vector<1x32xf32>
    %309 = vector.broadcast %296 : vector<1x32xf32> to vector<8x32xf32>
    %310 = arith.subf %292, %309 : vector<8x32xf32>
    %311 = arith.mulf %308, %289 : vector<1x32xf32>
    %312 = vector.broadcast %311 : vector<1x32xf32> to vector<8x32xf32>
    %313 = arith.mulf %310, %312 : vector<8x32xf32>
    %314 = vector.broadcast %290 : vector<1x32xf32> to vector<8x32xf32>
    %315 = arith.addf %313, %314 : vector<8x32xf32>
    %cst_108 = arith.constant 0.000000e+00 : f32
    %316 = vector.broadcast %cst_108 : f32 to vector<8x32xf32>
    %317 = arith.maximumf %315, %316 : vector<8x32xf32>
    %318 = tpu.iota {dimensions = array<i32: 0>} : vector<4x8xi32>
    %319 = tpu.iota {dimensions = array<i32: 1>} : vector<4x8xi32>
    %c2_i32_109 = arith.constant 2 : i32
    %320 = vector.broadcast %c2_i32_109 : i32 to vector<4x8xi32>
    %321 = arith.muli %320, %318 : vector<4x8xi32>
    %322 = arith.cmpi eq, %319, %321 : vector<4x8xi32>
    %cst_110 = arith.constant 1.000000e+00 : f32
    %cst_111 = arith.constant 0.000000e+00 : f32
    %323 = vector.broadcast %cst_110 : f32 to vector<4x8xf32>
    %324 = vector.broadcast %cst_111 : f32 to vector<4x8xf32>
    %325 = arith.select %322, %323, %324 : vector<4x8xi1>, vector<4x8xf32>
    %326 = arith.truncf %325 : vector<4x8xf32> to vector<4x8xbf16>
    %c2_i32_112 = arith.constant 2 : i32
    %327 = vector.broadcast %c2_i32_112 : i32 to vector<4x8xi32>
    %328 = arith.muli %327, %318 : vector<4x8xi32>
    %c1_i32_113 = arith.constant 1 : i32
    %329 = vector.broadcast %c1_i32_113 : i32 to vector<4x8xi32>
    %330 = arith.addi %328, %329 : vector<4x8xi32>
    %331 = arith.cmpi eq, %319, %330 : vector<4x8xi32>
    %cst_114 = arith.constant 1.000000e+00 : f32
    %cst_115 = arith.constant 0.000000e+00 : f32
    %332 = vector.broadcast %cst_114 : f32 to vector<4x8xf32>
    %333 = vector.broadcast %cst_115 : f32 to vector<4x8xf32>
    %334 = arith.select %331, %332, %333 : vector<4x8xi1>, vector<4x8xf32>
    %335 = arith.truncf %334 : vector<4x8xf32> to vector<4x8xbf16>
    %336 = arith.truncf %317 : vector<8x32xf32> to vector<8x32xbf16>
    %cst_116 = arith.constant dense<0.000000e+00> : vector<4x32xf32>
    %337 = tpu.matmul %326, %336, %cst_116 {dimension_numbers = #tpu.dot_dimension_numbers<[1], [0], [0], [1], [0, 0, 1, 1], [], []>} : vector<4x8xbf16>, vector<8x32xbf16>, vector<4x32xf32> -> vector<4x32xf32>
    %cst_117 = arith.constant dense<0.000000e+00> : vector<4x32xf32>
    %338 = tpu.matmul %335, %336, %cst_117 {dimension_numbers = #tpu.dot_dimension_numbers<[1], [0], [0], [1], [0, 0, 1, 1], [], []>} : vector<4x8xbf16>, vector<8x32xbf16>, vector<4x32xf32> -> vector<4x32xf32>
    %339 = arith.maximumf %337, %338 : vector<4x32xf32>
    %340 = tpu.iota {dimensions = array<i32: 0>} : vector<4x4xi32>
    %341 = tpu.iota {dimensions = array<i32: 1>} : vector<4x4xi32>
    %c1_i32_118 = arith.constant 1 : i32
    %342 = vector.broadcast %c1_i32_118 : i32 to vector<4x4xi32>
    %343 = arith.andi %340, %342 : vector<4x4xi32>
    %c1_i32_119 = arith.constant 1 : i32
    %344 = vector.broadcast %c1_i32_119 : i32 to vector<4x4xi32>
    %345 = arith.subi %340, %344 : vector<4x4xi32>
    %346 = arith.cmpi eq, %341, %345 : vector<4x4xi32>
    %c0_i32_120 = arith.constant 0 : i32
    %347 = vector.broadcast %c0_i32_120 : i32 to vector<4x4xi32>
    %348 = arith.cmpi sgt, %343, %347 : vector<4x4xi32>
    %349 = arith.andi %346, %348 : vector<4x4xi1>
    %cst_121 = arith.constant 1.000000e+00 : f32
    %cst_122 = arith.constant 0.000000e+00 : f32
    %350 = vector.broadcast %cst_121 : f32 to vector<4x4xf32>
    %351 = vector.broadcast %cst_122 : f32 to vector<4x4xf32>
    %352 = arith.select %349, %350, %351 : vector<4x4xi1>, vector<4x4xf32>
    %353 = arith.truncf %352 : vector<4x4xf32> to vector<4x4xbf16>
    %c1_i32_123 = arith.constant 1 : i32
    %354 = vector.broadcast %c1_i32_123 : i32 to vector<4x4xi32>
    %355 = arith.addi %340, %354 : vector<4x4xi32>
    %356 = arith.cmpi eq, %341, %355 : vector<4x4xi32>
    %c1_i32_124 = arith.constant 1 : i32
    %357 = vector.broadcast %c1_i32_124 : i32 to vector<4x4xi32>
    %358 = arith.cmpi slt, %343, %357 : vector<4x4xi32>
    %359 = arith.andi %356, %358 : vector<4x4xi1>
    %cst_125 = arith.constant 1.000000e+00 : f32
    %cst_126 = arith.constant 0.000000e+00 : f32
    %360 = vector.broadcast %cst_125 : f32 to vector<4x4xf32>
    %361 = vector.broadcast %cst_126 : f32 to vector<4x4xf32>
    %362 = arith.select %359, %360, %361 : vector<4x4xi1>, vector<4x4xf32>
    %363 = arith.truncf %362 : vector<4x4xf32> to vector<4x4xbf16>
    %364 = arith.truncf %339 : vector<4x32xf32> to vector<4x32xbf16>
    %cst_127 = arith.constant dense<0.000000e+00> : vector<4x32xf32>
    %365 = tpu.matmul %353, %364, %cst_127 {dimension_numbers = #tpu.dot_dimension_numbers<[1], [0], [0], [1], [0, 0, 1, 1], [], []>} : vector<4x4xbf16>, vector<4x32xbf16>, vector<4x32xf32> -> vector<4x32xf32>
    %cst_128 = arith.constant dense<0.000000e+00> : vector<4x32xf32>
    %366 = tpu.matmul %363, %364, %cst_128 {dimension_numbers = #tpu.dot_dimension_numbers<[1], [0], [0], [1], [0, 0, 1, 1], [], []>} : vector<4x4xbf16>, vector<4x32xbf16>, vector<4x32xf32> -> vector<4x32xf32>
    %367 = tpu.concatenate %365, %339, %366 in 1 : vector<4x32xf32>, vector<4x32xf32>, vector<4x32xf32> -> vector<4x96xf32>
    %368 = arith.truncf %367 : vector<4x96xf32> to vector<4x96xbf16>
    %c272 = arith.constant 272 : index
    %c0_129 = arith.constant 0 : index
    %369 = vector.load %arg1[%c272, %c0_129] : memref<2608x128xbf16, #tpu.memory_space<vmem>>, vector<96x64xbf16>
    %cst_130 = arith.constant dense<0.000000e+00> : vector<4x64xf32>
    %370 = tpu.matmul %368, %369, %cst_130 {dimension_numbers = #tpu.dot_dimension_numbers<[1], [0], [0], [1], [0, 0, 1, 1], [], []>} : vector<4x96xbf16>, vector<96x64xbf16>, vector<4x64xf32> -> vector<4x64xf32>
    %c48_131 = arith.constant 48 : index
    %c0_132 = arith.constant 0 : index
    %371 = vector.load %arg2[%c48_131, %c0_132] : memref<152x128xf32, #tpu.memory_space<vmem>>, vector<8x64xf32>
    %372 = vector.extract_strided_slice %371 {offsets = [0, 0], sizes = [1, 64], strides = [1, 1]} : vector<8x64xf32> to vector<1x64xf32>
    %373 = vector.extract_strided_slice %371 {offsets = [1, 0], sizes = [1, 64], strides = [1, 1]} : vector<8x64xf32> to vector<1x64xf32>
    %374 = vector.extract_strided_slice %371 {offsets = [2, 0], sizes = [1, 64], strides = [1, 1]} : vector<8x64xf32> to vector<1x64xf32>
    %375 = vector.broadcast %372 : vector<1x64xf32> to vector<4x64xf32>
    %376 = arith.addf %370, %375 : vector<4x64xf32>
    %cst_133 = arith.constant dense<0.000000e+00> : vector<64xf32>
    %377 = vector.multi_reduction <add>, %376, %cst_133 [0] : vector<4x64xf32> to vector<64xf32>
    %378 = vector.shape_cast %377 : vector<64xf32> to vector<1x64xf32>
    %cst_134 = arith.constant 2.500000e-01 : f32
    %379 = vector.broadcast %cst_134 : f32 to vector<1x64xf32>
    %380 = arith.mulf %378, %379 : vector<1x64xf32>
    %381 = arith.mulf %376, %376 : vector<4x64xf32>
    %cst_135 = arith.constant dense<0.000000e+00> : vector<64xf32>
    %382 = vector.multi_reduction <add>, %381, %cst_135 [0] : vector<4x64xf32> to vector<64xf32>
    %383 = vector.shape_cast %382 : vector<64xf32> to vector<1x64xf32>
    %cst_136 = arith.constant 2.500000e-01 : f32
    %384 = vector.broadcast %cst_136 : f32 to vector<1x64xf32>
    %385 = arith.mulf %383, %384 : vector<1x64xf32>
    %386 = arith.mulf %380, %380 : vector<1x64xf32>
    %387 = arith.subf %385, %386 : vector<1x64xf32>
    %cst_137 = arith.constant 0.000000e+00 : f32
    %388 = vector.broadcast %cst_137 : f32 to vector<1x64xf32>
    %389 = arith.maximumf %387, %388 : vector<1x64xf32>
    %cst_138 = arith.constant 9.99999974E-6 : f32
    %390 = vector.broadcast %cst_138 : f32 to vector<1x64xf32>
    %391 = arith.addf %389, %390 : vector<1x64xf32>
    %392 = math.rsqrt %391 : vector<1x64xf32>
    %393 = vector.broadcast %380 : vector<1x64xf32> to vector<4x64xf32>
    %394 = arith.subf %376, %393 : vector<4x64xf32>
    %395 = arith.mulf %392, %373 : vector<1x64xf32>
    %396 = vector.broadcast %395 : vector<1x64xf32> to vector<4x64xf32>
    %397 = arith.mulf %394, %396 : vector<4x64xf32>
    %398 = vector.broadcast %374 : vector<1x64xf32> to vector<4x64xf32>
    %399 = arith.addf %397, %398 : vector<4x64xf32>
    %cst_139 = arith.constant 0.000000e+00 : f32
    %400 = vector.broadcast %cst_139 : f32 to vector<4x64xf32>
    %401 = arith.maximumf %399, %400 : vector<4x64xf32>
    %402 = arith.truncf %401 : vector<4x64xf32> to vector<4x64xbf16>
    %cst_140 = arith.constant dense<0.000000e+00> : vector<4x64xf32>
    %403 = tpu.matmul %353, %402, %cst_140 {dimension_numbers = #tpu.dot_dimension_numbers<[1], [0], [0], [1], [0, 0, 1, 1], [], []>} : vector<4x4xbf16>, vector<4x64xbf16>, vector<4x64xf32> -> vector<4x64xf32>
    %cst_141 = arith.constant dense<0.000000e+00> : vector<4x64xf32>
    %404 = tpu.matmul %363, %402, %cst_141 {dimension_numbers = #tpu.dot_dimension_numbers<[1], [0], [0], [1], [0, 0, 1, 1], [], []>} : vector<4x4xbf16>, vector<4x64xbf16>, vector<4x64xf32> -> vector<4x64xf32>
    %405 = tpu.concatenate %403, %401, %404 in 1 : vector<4x64xf32>, vector<4x64xf32>, vector<4x64xf32> -> vector<4x192xf32>
    %406 = arith.truncf %405 : vector<4x192xf32> to vector<4x192xbf16>
    %c368 = arith.constant 368 : index
    %c0_142 = arith.constant 0 : index
    %407 = vector.load %arg1[%c368, %c0_142] : memref<2608x128xbf16, #tpu.memory_space<vmem>>, vector<192x64xbf16>
    %cst_143 = arith.constant dense<0.000000e+00> : vector<4x64xf32>
    %408 = tpu.matmul %406, %407, %cst_143 {dimension_numbers = #tpu.dot_dimension_numbers<[1], [0], [0], [1], [0, 0, 1, 1], [], []>} : vector<4x192xbf16>, vector<192x64xbf16>, vector<4x64xf32> -> vector<4x64xf32>
    %c56 = arith.constant 56 : index
    %c0_144 = arith.constant 0 : index
    %409 = vector.load %arg2[%c56, %c0_144] : memref<152x128xf32, #tpu.memory_space<vmem>>, vector<8x64xf32>
    %410 = vector.extract_strided_slice %409 {offsets = [0, 0], sizes = [1, 64], strides = [1, 1]} : vector<8x64xf32> to vector<1x64xf32>
    %411 = vector.extract_strided_slice %409 {offsets = [1, 0], sizes = [1, 64], strides = [1, 1]} : vector<8x64xf32> to vector<1x64xf32>
    %412 = vector.extract_strided_slice %409 {offsets = [2, 0], sizes = [1, 64], strides = [1, 1]} : vector<8x64xf32> to vector<1x64xf32>
    %413 = vector.broadcast %410 : vector<1x64xf32> to vector<4x64xf32>
    %414 = arith.addf %408, %413 : vector<4x64xf32>
    %cst_145 = arith.constant dense<0.000000e+00> : vector<64xf32>
    %415 = vector.multi_reduction <add>, %414, %cst_145 [0] : vector<4x64xf32> to vector<64xf32>
    %416 = vector.shape_cast %415 : vector<64xf32> to vector<1x64xf32>
    %cst_146 = arith.constant 2.500000e-01 : f32
    %417 = vector.broadcast %cst_146 : f32 to vector<1x64xf32>
    %418 = arith.mulf %416, %417 : vector<1x64xf32>
    %419 = arith.mulf %414, %414 : vector<4x64xf32>
    %cst_147 = arith.constant dense<0.000000e+00> : vector<64xf32>
    %420 = vector.multi_reduction <add>, %419, %cst_147 [0] : vector<4x64xf32> to vector<64xf32>
    %421 = vector.shape_cast %420 : vector<64xf32> to vector<1x64xf32>
    %cst_148 = arith.constant 2.500000e-01 : f32
    %422 = vector.broadcast %cst_148 : f32 to vector<1x64xf32>
    %423 = arith.mulf %421, %422 : vector<1x64xf32>
    %424 = arith.mulf %418, %418 : vector<1x64xf32>
    %425 = arith.subf %423, %424 : vector<1x64xf32>
    %cst_149 = arith.constant 0.000000e+00 : f32
    %426 = vector.broadcast %cst_149 : f32 to vector<1x64xf32>
    %427 = arith.maximumf %425, %426 : vector<1x64xf32>
    %cst_150 = arith.constant 9.99999974E-6 : f32
    %428 = vector.broadcast %cst_150 : f32 to vector<1x64xf32>
    %429 = arith.addf %427, %428 : vector<1x64xf32>
    %430 = math.rsqrt %429 : vector<1x64xf32>
    %431 = vector.broadcast %418 : vector<1x64xf32> to vector<4x64xf32>
    %432 = arith.subf %414, %431 : vector<4x64xf32>
    %433 = arith.mulf %430, %411 : vector<1x64xf32>
    %434 = vector.broadcast %433 : vector<1x64xf32> to vector<4x64xf32>
    %435 = arith.mulf %432, %434 : vector<4x64xf32>
    %436 = vector.broadcast %412 : vector<1x64xf32> to vector<4x64xf32>
    %437 = arith.addf %435, %436 : vector<4x64xf32>
    %cst_151 = arith.constant 0.000000e+00 : f32
    %438 = vector.broadcast %cst_151 : f32 to vector<4x64xf32>
    %439 = arith.maximumf %437, %438 : vector<4x64xf32>
    %440 = tpu.iota {dimensions = array<i32: 0>} : vector<2x4xi32>
    %441 = tpu.iota {dimensions = array<i32: 1>} : vector<2x4xi32>
    %c2_i32_152 = arith.constant 2 : i32
    %442 = vector.broadcast %c2_i32_152 : i32 to vector<2x4xi32>
    %443 = arith.muli %442, %440 : vector<2x4xi32>
    %444 = arith.cmpi eq, %441, %443 : vector<2x4xi32>
    %cst_153 = arith.constant 1.000000e+00 : f32
    %cst_154 = arith.constant 0.000000e+00 : f32
    %445 = vector.broadcast %cst_153 : f32 to vector<2x4xf32>
    %446 = vector.broadcast %cst_154 : f32 to vector<2x4xf32>
    %447 = arith.select %444, %445, %446 : vector<2x4xi1>, vector<2x4xf32>
    %448 = arith.truncf %447 : vector<2x4xf32> to vector<2x4xbf16>
    %c2_i32_155 = arith.constant 2 : i32
    %449 = vector.broadcast %c2_i32_155 : i32 to vector<2x4xi32>
    %450 = arith.muli %449, %440 : vector<2x4xi32>
    %c1_i32_156 = arith.constant 1 : i32
    %451 = vector.broadcast %c1_i32_156 : i32 to vector<2x4xi32>
    %452 = arith.addi %450, %451 : vector<2x4xi32>
    %453 = arith.cmpi eq, %441, %452 : vector<2x4xi32>
    %cst_157 = arith.constant 1.000000e+00 : f32
    %cst_158 = arith.constant 0.000000e+00 : f32
    %454 = vector.broadcast %cst_157 : f32 to vector<2x4xf32>
    %455 = vector.broadcast %cst_158 : f32 to vector<2x4xf32>
    %456 = arith.select %453, %454, %455 : vector<2x4xi1>, vector<2x4xf32>
    %457 = arith.truncf %456 : vector<2x4xf32> to vector<2x4xbf16>
    %458 = arith.truncf %439 : vector<4x64xf32> to vector<4x64xbf16>
    %cst_159 = arith.constant dense<0.000000e+00> : vector<2x64xf32>
    %459 = tpu.matmul %448, %458, %cst_159 {dimension_numbers = #tpu.dot_dimension_numbers<[1], [0], [0], [1], [0, 0, 1, 1], [], []>} : vector<2x4xbf16>, vector<4x64xbf16>, vector<2x64xf32> -> vector<2x64xf32>
    %cst_160 = arith.constant dense<0.000000e+00> : vector<2x64xf32>
    %460 = tpu.matmul %457, %458, %cst_160 {dimension_numbers = #tpu.dot_dimension_numbers<[1], [0], [0], [1], [0, 0, 1, 1], [], []>} : vector<2x4xbf16>, vector<4x64xbf16>, vector<2x64xf32> -> vector<2x64xf32>
    %461 = arith.maximumf %459, %460 : vector<2x64xf32>
    %c624 = arith.constant 624 : index
    %c0_161 = arith.constant 0 : index
    %462 = vector.load %arg1[%c624, %c0_161] : memref<2608x128xbf16, #tpu.memory_space<vmem>>, vector<64x128xbf16>
    %463 = arith.truncf %461 : vector<2x64xf32> to vector<2x64xbf16>
    %cst_162 = arith.constant dense<0.000000e+00> : vector<2x128xf32>
    %464 = tpu.matmul %463, %462, %cst_162 {dimension_numbers = #tpu.dot_dimension_numbers<[1], [0], [0], [1], [0, 0, 1, 1], [], []>} : vector<2x64xbf16>, vector<64x128xbf16>, vector<2x128xf32> -> vector<2x128xf32>
    %c64 = arith.constant 64 : index
    %c0_163 = arith.constant 0 : index
    %465 = vector.load %arg2[%c64, %c0_163] : memref<152x128xf32, #tpu.memory_space<vmem>>, vector<8x128xf32>
    %466 = vector.extract_strided_slice %465 {offsets = [0, 0], sizes = [1, 128], strides = [1, 1]} : vector<8x128xf32> to vector<1x128xf32>
    %467 = vector.extract_strided_slice %465 {offsets = [1, 0], sizes = [1, 128], strides = [1, 1]} : vector<8x128xf32> to vector<1x128xf32>
    %468 = vector.extract_strided_slice %465 {offsets = [2, 0], sizes = [1, 128], strides = [1, 1]} : vector<8x128xf32> to vector<1x128xf32>
    %469 = vector.broadcast %466 : vector<1x128xf32> to vector<2x128xf32>
    %470 = arith.addf %464, %469 : vector<2x128xf32>
    %cst_164 = arith.constant dense<0.000000e+00> : vector<128xf32>
    %471 = vector.multi_reduction <add>, %470, %cst_164 [0] : vector<2x128xf32> to vector<128xf32>
    %472 = vector.shape_cast %471 : vector<128xf32> to vector<1x128xf32>
    %cst_165 = arith.constant 5.000000e-01 : f32
    %473 = vector.broadcast %cst_165 : f32 to vector<1x128xf32>
    %474 = arith.mulf %472, %473 : vector<1x128xf32>
    %475 = arith.mulf %470, %470 : vector<2x128xf32>
    %cst_166 = arith.constant dense<0.000000e+00> : vector<128xf32>
    %476 = vector.multi_reduction <add>, %475, %cst_166 [0] : vector<2x128xf32> to vector<128xf32>
    %477 = vector.shape_cast %476 : vector<128xf32> to vector<1x128xf32>
    %cst_167 = arith.constant 5.000000e-01 : f32
    %478 = vector.broadcast %cst_167 : f32 to vector<1x128xf32>
    %479 = arith.mulf %477, %478 : vector<1x128xf32>
    %480 = arith.mulf %474, %474 : vector<1x128xf32>
    %481 = arith.subf %479, %480 : vector<1x128xf32>
    %cst_168 = arith.constant 0.000000e+00 : f32
    %482 = vector.broadcast %cst_168 : f32 to vector<1x128xf32>
    %483 = arith.maximumf %481, %482 : vector<1x128xf32>
    %cst_169 = arith.constant 9.99999974E-6 : f32
    %484 = vector.broadcast %cst_169 : f32 to vector<1x128xf32>
    %485 = arith.addf %483, %484 : vector<1x128xf32>
    %486 = math.rsqrt %485 : vector<1x128xf32>
    %487 = vector.broadcast %474 : vector<1x128xf32> to vector<2x128xf32>
    %488 = arith.subf %470, %487 : vector<2x128xf32>
    %489 = arith.mulf %486, %467 : vector<1x128xf32>
    %490 = vector.broadcast %489 : vector<1x128xf32> to vector<2x128xf32>
    %491 = arith.mulf %488, %490 : vector<2x128xf32>
    %492 = vector.broadcast %468 : vector<1x128xf32> to vector<2x128xf32>
    %493 = arith.addf %491, %492 : vector<2x128xf32>
    %cst_170 = arith.constant 0.000000e+00 : f32
    %494 = vector.broadcast %cst_170 : f32 to vector<2x128xf32>
    %495 = arith.maximumf %493, %494 : vector<2x128xf32>
    %c880 = arith.constant 880 : index
    %c0_171 = arith.constant 0 : index
    %496 = vector.load %arg1[%c880, %c0_171] : memref<2608x128xbf16, #tpu.memory_space<vmem>>, vector<128x128xbf16>
    %497 = arith.truncf %495 : vector<2x128xf32> to vector<2x128xbf16>
    %cst_172 = arith.constant dense<0.000000e+00> : vector<2x128xf32>
    %498 = tpu.matmul %497, %496, %cst_172 {dimension_numbers = #tpu.dot_dimension_numbers<[1], [0], [0], [1], [0, 0, 1, 1], [], []>} : vector<2x128xbf16>, vector<128x128xbf16>, vector<2x128xf32> -> vector<2x128xf32>
    %c72 = arith.constant 72 : index
    %c0_173 = arith.constant 0 : index
    %499 = vector.load %arg2[%c72, %c0_173] : memref<152x128xf32, #tpu.memory_space<vmem>>, vector<8x128xf32>
    %500 = vector.extract_strided_slice %499 {offsets = [0, 0], sizes = [1, 128], strides = [1, 1]} : vector<8x128xf32> to vector<1x128xf32>
    %501 = vector.extract_strided_slice %499 {offsets = [1, 0], sizes = [1, 128], strides = [1, 1]} : vector<8x128xf32> to vector<1x128xf32>
    %502 = vector.extract_strided_slice %499 {offsets = [2, 0], sizes = [1, 128], strides = [1, 1]} : vector<8x128xf32> to vector<1x128xf32>
    %503 = vector.broadcast %500 : vector<1x128xf32> to vector<2x128xf32>
    %504 = arith.addf %498, %503 : vector<2x128xf32>
    %cst_174 = arith.constant dense<0.000000e+00> : vector<128xf32>
    %505 = vector.multi_reduction <add>, %504, %cst_174 [0] : vector<2x128xf32> to vector<128xf32>
    %506 = vector.shape_cast %505 : vector<128xf32> to vector<1x128xf32>
    %cst_175 = arith.constant 5.000000e-01 : f32
    %507 = vector.broadcast %cst_175 : f32 to vector<1x128xf32>
    %508 = arith.mulf %506, %507 : vector<1x128xf32>
    %509 = arith.mulf %504, %504 : vector<2x128xf32>
    %cst_176 = arith.constant dense<0.000000e+00> : vector<128xf32>
    %510 = vector.multi_reduction <add>, %509, %cst_176 [0] : vector<2x128xf32> to vector<128xf32>
    %511 = vector.shape_cast %510 : vector<128xf32> to vector<1x128xf32>
    %cst_177 = arith.constant 5.000000e-01 : f32
    %512 = vector.broadcast %cst_177 : f32 to vector<1x128xf32>
    %513 = arith.mulf %511, %512 : vector<1x128xf32>
    %514 = arith.mulf %508, %508 : vector<1x128xf32>
    %515 = arith.subf %513, %514 : vector<1x128xf32>
    %cst_178 = arith.constant 0.000000e+00 : f32
    %516 = vector.broadcast %cst_178 : f32 to vector<1x128xf32>
    %517 = arith.maximumf %515, %516 : vector<1x128xf32>
    %cst_179 = arith.constant 9.99999974E-6 : f32
    %518 = vector.broadcast %cst_179 : f32 to vector<1x128xf32>
    %519 = arith.addf %517, %518 : vector<1x128xf32>
    %520 = math.rsqrt %519 : vector<1x128xf32>
    %521 = vector.broadcast %508 : vector<1x128xf32> to vector<2x128xf32>
    %522 = arith.subf %504, %521 : vector<2x128xf32>
    %523 = arith.mulf %520, %501 : vector<1x128xf32>
    %524 = vector.broadcast %523 : vector<1x128xf32> to vector<2x128xf32>
    %525 = arith.mulf %522, %524 : vector<2x128xf32>
    %526 = vector.broadcast %502 : vector<1x128xf32> to vector<2x128xf32>
    %527 = arith.addf %525, %526 : vector<2x128xf32>
    %cst_180 = arith.constant 0.000000e+00 : f32
    %528 = vector.broadcast %cst_180 : f32 to vector<2x128xf32>
    %529 = arith.maximumf %527, %528 : vector<2x128xf32>
    %530 = tpu.iota {dimensions = array<i32: 0>} : vector<4x2xi32>
    %531 = tpu.iota {dimensions = array<i32: 1>} : vector<4x2xi32>
    %c1_i32_181 = arith.constant 1 : i32
    %532 = vector.broadcast %c1_i32_181 : i32 to vector<4x2xi32>
    %533 = arith.shrsi %530, %532 : vector<4x2xi32>
    %534 = arith.cmpi eq, %531, %533 : vector<4x2xi32>
    %cst_182 = arith.constant 1.000000e+00 : f32
    %cst_183 = arith.constant 0.000000e+00 : f32
    %535 = vector.broadcast %cst_182 : f32 to vector<4x2xf32>
    %536 = vector.broadcast %cst_183 : f32 to vector<4x2xf32>
    %537 = arith.select %534, %535, %536 : vector<4x2xi1>, vector<4x2xf32>
    %538 = arith.truncf %537 : vector<4x2xf32> to vector<4x2xbf16>
    %539 = arith.truncf %529 : vector<2x128xf32> to vector<2x128xbf16>
    %cst_184 = arith.constant dense<0.000000e+00> : vector<4x128xf32>
    %540 = tpu.matmul %538, %539, %cst_184 {dimension_numbers = #tpu.dot_dimension_numbers<[1], [0], [0], [1], [0, 0, 1, 1], [], []>} : vector<4x2xbf16>, vector<2x128xbf16>, vector<4x128xf32> -> vector<4x128xf32>
    %541 = arith.truncf %540 : vector<4x128xf32> to vector<4x128xbf16>
    %cst_185 = arith.constant dense<0.000000e+00> : vector<4x128xf32>
    %542 = tpu.matmul %353, %541, %cst_185 {dimension_numbers = #tpu.dot_dimension_numbers<[1], [0], [0], [1], [0, 0, 1, 1], [], []>} : vector<4x4xbf16>, vector<4x128xbf16>, vector<4x128xf32> -> vector<4x128xf32>
    %cst_186 = arith.constant dense<0.000000e+00> : vector<4x128xf32>
    %543 = tpu.matmul %363, %541, %cst_186 {dimension_numbers = #tpu.dot_dimension_numbers<[1], [0], [0], [1], [0, 0, 1, 1], [], []>} : vector<4x4xbf16>, vector<4x128xbf16>, vector<4x128xf32> -> vector<4x128xf32>
    %544 = tpu.concatenate %542, %540, %543 in 1 : vector<4x128xf32>, vector<4x128xf32>, vector<4x128xf32> -> vector<4x384xf32>
    %545 = arith.truncf %544 : vector<4x384xf32> to vector<4x384xbf16>
    %c1136 = arith.constant 1136 : index
    %c0_187 = arith.constant 0 : index
    %546 = vector.load %arg1[%c1136, %c0_187] : memref<2608x128xbf16, #tpu.memory_space<vmem>>, vector<384x64xbf16>
    %cst_188 = arith.constant dense<0.000000e+00> : vector<4x64xf32>
    %547 = tpu.matmul %545, %546, %cst_188 {dimension_numbers = #tpu.dot_dimension_numbers<[1], [0], [0], [1], [0, 0, 1, 1], [], []>} : vector<4x384xbf16>, vector<384x64xbf16>, vector<4x64xf32> -> vector<4x64xf32>
    %548 = arith.truncf %439 : vector<4x64xf32> to vector<4x64xbf16>
    %cst_189 = arith.constant dense<0.000000e+00> : vector<4x64xf32>
    %549 = tpu.matmul %353, %548, %cst_189 {dimension_numbers = #tpu.dot_dimension_numbers<[1], [0], [0], [1], [0, 0, 1, 1], [], []>} : vector<4x4xbf16>, vector<4x64xbf16>, vector<4x64xf32> -> vector<4x64xf32>
    %cst_190 = arith.constant dense<0.000000e+00> : vector<4x64xf32>
    %550 = tpu.matmul %363, %548, %cst_190 {dimension_numbers = #tpu.dot_dimension_numbers<[1], [0], [0], [1], [0, 0, 1, 1], [], []>} : vector<4x4xbf16>, vector<4x64xbf16>, vector<4x64xf32> -> vector<4x64xf32>
    %551 = tpu.concatenate %549, %439, %550 in 1 : vector<4x64xf32>, vector<4x64xf32>, vector<4x64xf32> -> vector<4x192xf32>
    %552 = arith.truncf %551 : vector<4x192xf32> to vector<4x192xbf16>
    %c1520 = arith.constant 1520 : index
    %c0_191 = arith.constant 0 : index
    %553 = vector.load %arg1[%c1520, %c0_191] : memref<2608x128xbf16, #tpu.memory_space<vmem>>, vector<192x64xbf16>
    %cst_192 = arith.constant dense<0.000000e+00> : vector<4x64xf32>
    %554 = tpu.matmul %552, %553, %cst_192 {dimension_numbers = #tpu.dot_dimension_numbers<[1], [0], [0], [1], [0, 0, 1, 1], [], []>} : vector<4x192xbf16>, vector<192x64xbf16>, vector<4x64xf32> -> vector<4x64xf32>
    %555 = arith.addf %547, %554 : vector<4x64xf32>
    %c80_193 = arith.constant 80 : index
    %c0_194 = arith.constant 0 : index
    %556 = vector.load %arg2[%c80_193, %c0_194] : memref<152x128xf32, #tpu.memory_space<vmem>>, vector<8x64xf32>
    %557 = vector.extract_strided_slice %556 {offsets = [0, 0], sizes = [1, 64], strides = [1, 1]} : vector<8x64xf32> to vector<1x64xf32>
    %558 = vector.extract_strided_slice %556 {offsets = [1, 0], sizes = [1, 64], strides = [1, 1]} : vector<8x64xf32> to vector<1x64xf32>
    %559 = vector.extract_strided_slice %556 {offsets = [2, 0], sizes = [1, 64], strides = [1, 1]} : vector<8x64xf32> to vector<1x64xf32>
    %560 = vector.broadcast %557 : vector<1x64xf32> to vector<4x64xf32>
    %561 = arith.addf %555, %560 : vector<4x64xf32>
    %cst_195 = arith.constant dense<0.000000e+00> : vector<64xf32>
    %562 = vector.multi_reduction <add>, %561, %cst_195 [0] : vector<4x64xf32> to vector<64xf32>
    %563 = vector.shape_cast %562 : vector<64xf32> to vector<1x64xf32>
    %cst_196 = arith.constant 2.500000e-01 : f32
    %564 = vector.broadcast %cst_196 : f32 to vector<1x64xf32>
    %565 = arith.mulf %563, %564 : vector<1x64xf32>
    %566 = arith.mulf %561, %561 : vector<4x64xf32>
    %cst_197 = arith.constant dense<0.000000e+00> : vector<64xf32>
    %567 = vector.multi_reduction <add>, %566, %cst_197 [0] : vector<4x64xf32> to vector<64xf32>
    %568 = vector.shape_cast %567 : vector<64xf32> to vector<1x64xf32>
    %cst_198 = arith.constant 2.500000e-01 : f32
    %569 = vector.broadcast %cst_198 : f32 to vector<1x64xf32>
    %570 = arith.mulf %568, %569 : vector<1x64xf32>
    %571 = arith.mulf %565, %565 : vector<1x64xf32>
    %572 = arith.subf %570, %571 : vector<1x64xf32>
    %cst_199 = arith.constant 0.000000e+00 : f32
    %573 = vector.broadcast %cst_199 : f32 to vector<1x64xf32>
    %574 = arith.maximumf %572, %573 : vector<1x64xf32>
    %cst_200 = arith.constant 9.99999974E-6 : f32
    %575 = vector.broadcast %cst_200 : f32 to vector<1x64xf32>
    %576 = arith.addf %574, %575 : vector<1x64xf32>
    %577 = math.rsqrt %576 : vector<1x64xf32>
    %578 = vector.broadcast %565 : vector<1x64xf32> to vector<4x64xf32>
    %579 = arith.subf %561, %578 : vector<4x64xf32>
    %580 = arith.mulf %577, %558 : vector<1x64xf32>
    %581 = vector.broadcast %580 : vector<1x64xf32> to vector<4x64xf32>
    %582 = arith.mulf %579, %581 : vector<4x64xf32>
    %583 = vector.broadcast %559 : vector<1x64xf32> to vector<4x64xf32>
    %584 = arith.addf %582, %583 : vector<4x64xf32>
    %cst_201 = arith.constant 0.000000e+00 : f32
    %585 = vector.broadcast %cst_201 : f32 to vector<4x64xf32>
    %586 = arith.maximumf %584, %585 : vector<4x64xf32>
    %587 = arith.truncf %586 : vector<4x64xf32> to vector<4x64xbf16>
    %cst_202 = arith.constant dense<0.000000e+00> : vector<4x64xf32>
    %588 = tpu.matmul %353, %587, %cst_202 {dimension_numbers = #tpu.dot_dimension_numbers<[1], [0], [0], [1], [0, 0, 1, 1], [], []>} : vector<4x4xbf16>, vector<4x64xbf16>, vector<4x64xf32> -> vector<4x64xf32>
    %cst_203 = arith.constant dense<0.000000e+00> : vector<4x64xf32>
    %589 = tpu.matmul %363, %587, %cst_203 {dimension_numbers = #tpu.dot_dimension_numbers<[1], [0], [0], [1], [0, 0, 1, 1], [], []>} : vector<4x4xbf16>, vector<4x64xbf16>, vector<4x64xf32> -> vector<4x64xf32>
    %590 = tpu.concatenate %588, %586, %589 in 1 : vector<4x64xf32>, vector<4x64xf32>, vector<4x64xf32> -> vector<4x192xf32>
    %591 = arith.truncf %590 : vector<4x192xf32> to vector<4x192xbf16>
    %c1712 = arith.constant 1712 : index
    %c0_204 = arith.constant 0 : index
    %592 = vector.load %arg1[%c1712, %c0_204] : memref<2608x128xbf16, #tpu.memory_space<vmem>>, vector<192x64xbf16>
    %cst_205 = arith.constant dense<0.000000e+00> : vector<4x64xf32>
    %593 = tpu.matmul %591, %592, %cst_205 {dimension_numbers = #tpu.dot_dimension_numbers<[1], [0], [0], [1], [0, 0, 1, 1], [], []>} : vector<4x192xbf16>, vector<192x64xbf16>, vector<4x64xf32> -> vector<4x64xf32>
    %c88 = arith.constant 88 : index
    %c0_206 = arith.constant 0 : index
    %594 = vector.load %arg2[%c88, %c0_206] : memref<152x128xf32, #tpu.memory_space<vmem>>, vector<8x64xf32>
    %595 = vector.extract_strided_slice %594 {offsets = [0, 0], sizes = [1, 64], strides = [1, 1]} : vector<8x64xf32> to vector<1x64xf32>
    %596 = vector.extract_strided_slice %594 {offsets = [1, 0], sizes = [1, 64], strides = [1, 1]} : vector<8x64xf32> to vector<1x64xf32>
    %597 = vector.extract_strided_slice %594 {offsets = [2, 0], sizes = [1, 64], strides = [1, 1]} : vector<8x64xf32> to vector<1x64xf32>
    %598 = vector.broadcast %595 : vector<1x64xf32> to vector<4x64xf32>
    %599 = arith.addf %593, %598 : vector<4x64xf32>
    %cst_207 = arith.constant dense<0.000000e+00> : vector<64xf32>
    %600 = vector.multi_reduction <add>, %599, %cst_207 [0] : vector<4x64xf32> to vector<64xf32>
    %601 = vector.shape_cast %600 : vector<64xf32> to vector<1x64xf32>
    %cst_208 = arith.constant 2.500000e-01 : f32
    %602 = vector.broadcast %cst_208 : f32 to vector<1x64xf32>
    %603 = arith.mulf %601, %602 : vector<1x64xf32>
    %604 = arith.mulf %599, %599 : vector<4x64xf32>
    %cst_209 = arith.constant dense<0.000000e+00> : vector<64xf32>
    %605 = vector.multi_reduction <add>, %604, %cst_209 [0] : vector<4x64xf32> to vector<64xf32>
    %606 = vector.shape_cast %605 : vector<64xf32> to vector<1x64xf32>
    %cst_210 = arith.constant 2.500000e-01 : f32
    %607 = vector.broadcast %cst_210 : f32 to vector<1x64xf32>
    %608 = arith.mulf %606, %607 : vector<1x64xf32>
    %609 = arith.mulf %603, %603 : vector<1x64xf32>
    %610 = arith.subf %608, %609 : vector<1x64xf32>
    %cst_211 = arith.constant 0.000000e+00 : f32
    %611 = vector.broadcast %cst_211 : f32 to vector<1x64xf32>
    %612 = arith.maximumf %610, %611 : vector<1x64xf32>
    %cst_212 = arith.constant 9.99999974E-6 : f32
    %613 = vector.broadcast %cst_212 : f32 to vector<1x64xf32>
    %614 = arith.addf %612, %613 : vector<1x64xf32>
    %615 = math.rsqrt %614 : vector<1x64xf32>
    %616 = vector.broadcast %603 : vector<1x64xf32> to vector<4x64xf32>
    %617 = arith.subf %599, %616 : vector<4x64xf32>
    %618 = arith.mulf %615, %596 : vector<1x64xf32>
    %619 = vector.broadcast %618 : vector<1x64xf32> to vector<4x64xf32>
    %620 = arith.mulf %617, %619 : vector<4x64xf32>
    %621 = vector.broadcast %597 : vector<1x64xf32> to vector<4x64xf32>
    %622 = arith.addf %620, %621 : vector<4x64xf32>
    %cst_213 = arith.constant 0.000000e+00 : f32
    %623 = vector.broadcast %cst_213 : f32 to vector<4x64xf32>
    %624 = arith.maximumf %622, %623 : vector<4x64xf32>
    %625 = tpu.iota {dimensions = array<i32: 0>} : vector<8x4xi32>
    %626 = tpu.iota {dimensions = array<i32: 1>} : vector<8x4xi32>
    %c1_i32_214 = arith.constant 1 : i32
    %627 = vector.broadcast %c1_i32_214 : i32 to vector<8x4xi32>
    %628 = arith.shrsi %625, %627 : vector<8x4xi32>
    %629 = arith.cmpi eq, %626, %628 : vector<8x4xi32>
    %cst_215 = arith.constant 1.000000e+00 : f32
    %cst_216 = arith.constant 0.000000e+00 : f32
    %630 = vector.broadcast %cst_215 : f32 to vector<8x4xf32>
    %631 = vector.broadcast %cst_216 : f32 to vector<8x4xf32>
    %632 = arith.select %629, %630, %631 : vector<8x4xi1>, vector<8x4xf32>
    %633 = arith.truncf %632 : vector<8x4xf32> to vector<8x4xbf16>
    %634 = arith.truncf %624 : vector<4x64xf32> to vector<4x64xbf16>
    %cst_217 = arith.constant dense<0.000000e+00> : vector<8x64xf32>
    %635 = tpu.matmul %633, %634, %cst_217 {dimension_numbers = #tpu.dot_dimension_numbers<[1], [0], [0], [1], [0, 0, 1, 1], [], []>} : vector<8x4xbf16>, vector<4x64xbf16>, vector<8x64xf32> -> vector<8x64xf32>
    %636 = tpu.iota {dimensions = array<i32: 0>} : vector<8x64xi32>
    %c3_i32_218 = arith.constant 3 : i32
    %637 = vector.broadcast %c3_i32_218 : i32 to vector<8x64xi32>
    %638 = arith.andi %636, %637 : vector<8x64xi32>
    %c0_i32_219 = arith.constant 0 : i32
    %639 = vector.broadcast %c0_i32_219 : i32 to vector<8x64xi32>
    %640 = arith.cmpi eq, %638, %639 : vector<8x64xi32>
    %c1_i32_220 = arith.constant 1 : i32
    %641 = tpu.dynamic_rotate %635 by %c1_i32_220 dim 0 : vector<8x64xf32>, i32 -> vector<8x64xf32>
    %cst_221 = arith.constant 0.000000e+00 : f32
    %642 = vector.broadcast %cst_221 : f32 to vector<8x64xf32>
    %643 = arith.select %640, %642, %641 : vector<8x64xi1>, vector<8x64xf32>
    %c3_i32_222 = arith.constant 3 : i32
    %644 = vector.broadcast %c3_i32_222 : i32 to vector<8x64xi32>
    %645 = arith.cmpi eq, %638, %644 : vector<8x64xi32>
    %c7_i32_223 = arith.constant 7 : i32
    %646 = tpu.dynamic_rotate %635 by %c7_i32_223 dim 0 : vector<8x64xf32>, i32 -> vector<8x64xf32>
    %cst_224 = arith.constant 0.000000e+00 : f32
    %647 = vector.broadcast %cst_224 : f32 to vector<8x64xf32>
    %648 = arith.select %645, %647, %646 : vector<8x64xi1>, vector<8x64xf32>
    %649 = tpu.concatenate %643, %635, %648 in 1 : vector<8x64xf32>, vector<8x64xf32>, vector<8x64xf32> -> vector<8x192xf32>
    %650 = arith.truncf %649 : vector<8x192xf32> to vector<8x192xbf16>
    %c1904 = arith.constant 1904 : index
    %c0_225 = arith.constant 0 : index
    %651 = vector.load %arg1[%c1904, %c0_225] : memref<2608x128xbf16, #tpu.memory_space<vmem>>, vector<192x32xbf16>
    %cst_226 = arith.constant dense<0.000000e+00> : vector<8x32xf32>
    %652 = tpu.matmul %650, %651, %cst_226 {dimension_numbers = #tpu.dot_dimension_numbers<[1], [0], [0], [1], [0, 0, 1, 1], [], []>} : vector<8x192xbf16>, vector<192x32xbf16>, vector<8x32xf32> -> vector<8x32xf32>
    %c0_i32_227 = arith.constant 0 : i32
    %653 = vector.broadcast %c0_i32_227 : i32 to vector<8x32xi32>
    %654 = arith.cmpi eq, %272, %653 : vector<8x32xi32>
    %c1_i32_228 = arith.constant 1 : i32
    %655 = tpu.dynamic_rotate %317 by %c1_i32_228 dim 0 : vector<8x32xf32>, i32 -> vector<8x32xf32>
    %cst_229 = arith.constant 0.000000e+00 : f32
    %656 = vector.broadcast %cst_229 : f32 to vector<8x32xf32>
    %657 = arith.select %654, %656, %655 : vector<8x32xi1>, vector<8x32xf32>
    %c3_i32_230 = arith.constant 3 : i32
    %658 = vector.broadcast %c3_i32_230 : i32 to vector<8x32xi32>
    %659 = arith.cmpi eq, %272, %658 : vector<8x32xi32>
    %c7_i32_231 = arith.constant 7 : i32
    %660 = tpu.dynamic_rotate %317 by %c7_i32_231 dim 0 : vector<8x32xf32>, i32 -> vector<8x32xf32>
    %cst_232 = arith.constant 0.000000e+00 : f32
    %661 = vector.broadcast %cst_232 : f32 to vector<8x32xf32>
    %662 = arith.select %659, %661, %660 : vector<8x32xi1>, vector<8x32xf32>
    %663 = tpu.concatenate %657, %317, %662 in 1 : vector<8x32xf32>, vector<8x32xf32>, vector<8x32xf32> -> vector<8x96xf32>
    %664 = arith.truncf %663 : vector<8x96xf32> to vector<8x96xbf16>
    %c2096 = arith.constant 2096 : index
    %c0_233 = arith.constant 0 : index
    %665 = vector.load %arg1[%c2096, %c0_233] : memref<2608x128xbf16, #tpu.memory_space<vmem>>, vector<96x32xbf16>
    %cst_234 = arith.constant dense<0.000000e+00> : vector<8x32xf32>
    %666 = tpu.matmul %664, %665, %cst_234 {dimension_numbers = #tpu.dot_dimension_numbers<[1], [0], [0], [1], [0, 0, 1, 1], [], []>} : vector<8x96xbf16>, vector<96x32xbf16>, vector<8x32xf32> -> vector<8x32xf32>
    %667 = arith.addf %652, %666 : vector<8x32xf32>
    %c96 = arith.constant 96 : index
    %c0_235 = arith.constant 0 : index
    %668 = vector.load %arg2[%c96, %c0_235] : memref<152x128xf32, #tpu.memory_space<vmem>>, vector<8x32xf32>
    %669 = vector.extract_strided_slice %668 {offsets = [0, 0], sizes = [1, 32], strides = [1, 1]} : vector<8x32xf32> to vector<1x32xf32>
    %670 = vector.extract_strided_slice %668 {offsets = [1, 0], sizes = [1, 32], strides = [1, 1]} : vector<8x32xf32> to vector<1x32xf32>
    %671 = vector.extract_strided_slice %668 {offsets = [2, 0], sizes = [1, 32], strides = [1, 1]} : vector<8x32xf32> to vector<1x32xf32>
    %672 = vector.broadcast %669 : vector<1x32xf32> to vector<8x32xf32>
    %673 = arith.addf %667, %672 : vector<8x32xf32>
    %cst_236 = arith.constant dense<0.000000e+00> : vector<32xf32>
    %674 = vector.multi_reduction <add>, %673, %cst_236 [0] : vector<8x32xf32> to vector<32xf32>
    %675 = vector.shape_cast %674 : vector<32xf32> to vector<1x32xf32>
    %cst_237 = arith.constant 1.250000e-01 : f32
    %676 = vector.broadcast %cst_237 : f32 to vector<1x32xf32>
    %677 = arith.mulf %675, %676 : vector<1x32xf32>
    %678 = arith.mulf %673, %673 : vector<8x32xf32>
    %cst_238 = arith.constant dense<0.000000e+00> : vector<32xf32>
    %679 = vector.multi_reduction <add>, %678, %cst_238 [0] : vector<8x32xf32> to vector<32xf32>
    %680 = vector.shape_cast %679 : vector<32xf32> to vector<1x32xf32>
    %cst_239 = arith.constant 1.250000e-01 : f32
    %681 = vector.broadcast %cst_239 : f32 to vector<1x32xf32>
    %682 = arith.mulf %680, %681 : vector<1x32xf32>
    %683 = arith.mulf %677, %677 : vector<1x32xf32>
    %684 = arith.subf %682, %683 : vector<1x32xf32>
    %cst_240 = arith.constant 0.000000e+00 : f32
    %685 = vector.broadcast %cst_240 : f32 to vector<1x32xf32>
    %686 = arith.maximumf %684, %685 : vector<1x32xf32>
    %cst_241 = arith.constant 9.99999974E-6 : f32
    %687 = vector.broadcast %cst_241 : f32 to vector<1x32xf32>
    %688 = arith.addf %686, %687 : vector<1x32xf32>
    %689 = math.rsqrt %688 : vector<1x32xf32>
    %690 = vector.broadcast %677 : vector<1x32xf32> to vector<8x32xf32>
    %691 = arith.subf %673, %690 : vector<8x32xf32>
    %692 = arith.mulf %689, %670 : vector<1x32xf32>
    %693 = vector.broadcast %692 : vector<1x32xf32> to vector<8x32xf32>
    %694 = arith.mulf %691, %693 : vector<8x32xf32>
    %695 = vector.broadcast %671 : vector<1x32xf32> to vector<8x32xf32>
    %696 = arith.addf %694, %695 : vector<8x32xf32>
    %cst_242 = arith.constant 0.000000e+00 : f32
    %697 = vector.broadcast %cst_242 : f32 to vector<8x32xf32>
    %698 = arith.maximumf %696, %697 : vector<8x32xf32>
    %c0_i32_243 = arith.constant 0 : i32
    %699 = vector.broadcast %c0_i32_243 : i32 to vector<8x32xi32>
    %700 = arith.cmpi eq, %272, %699 : vector<8x32xi32>
    %c1_i32_244 = arith.constant 1 : i32
    %701 = tpu.dynamic_rotate %698 by %c1_i32_244 dim 0 : vector<8x32xf32>, i32 -> vector<8x32xf32>
    %cst_245 = arith.constant 0.000000e+00 : f32
    %702 = vector.broadcast %cst_245 : f32 to vector<8x32xf32>
    %703 = arith.select %700, %702, %701 : vector<8x32xi1>, vector<8x32xf32>
    %c3_i32_246 = arith.constant 3 : i32
    %704 = vector.broadcast %c3_i32_246 : i32 to vector<8x32xi32>
    %705 = arith.cmpi eq, %272, %704 : vector<8x32xi32>
    %c7_i32_247 = arith.constant 7 : i32
    %706 = tpu.dynamic_rotate %698 by %c7_i32_247 dim 0 : vector<8x32xf32>, i32 -> vector<8x32xf32>
    %cst_248 = arith.constant 0.000000e+00 : f32
    %707 = vector.broadcast %cst_248 : f32 to vector<8x32xf32>
    %708 = arith.select %705, %707, %706 : vector<8x32xi1>, vector<8x32xf32>
    %709 = tpu.concatenate %703, %698, %708 in 1 : vector<8x32xf32>, vector<8x32xf32>, vector<8x32xf32> -> vector<8x96xf32>
    %710 = arith.truncf %709 : vector<8x96xf32> to vector<8x96xbf16>
    %c2192 = arith.constant 2192 : index
    %c0_249 = arith.constant 0 : index
    %711 = vector.load %arg1[%c2192, %c0_249] : memref<2608x128xbf16, #tpu.memory_space<vmem>>, vector<96x32xbf16>
    %cst_250 = arith.constant dense<0.000000e+00> : vector<8x32xf32>
    %712 = tpu.matmul %710, %711, %cst_250 {dimension_numbers = #tpu.dot_dimension_numbers<[1], [0], [0], [1], [0, 0, 1, 1], [], []>} : vector<8x96xbf16>, vector<96x32xbf16>, vector<8x32xf32> -> vector<8x32xf32>
    %c104 = arith.constant 104 : index
    %c0_251 = arith.constant 0 : index
    %713 = vector.load %arg2[%c104, %c0_251] : memref<152x128xf32, #tpu.memory_space<vmem>>, vector<8x32xf32>
    %714 = vector.extract_strided_slice %713 {offsets = [0, 0], sizes = [1, 32], strides = [1, 1]} : vector<8x32xf32> to vector<1x32xf32>
    %715 = vector.extract_strided_slice %713 {offsets = [1, 0], sizes = [1, 32], strides = [1, 1]} : vector<8x32xf32> to vector<1x32xf32>
    %716 = vector.extract_strided_slice %713 {offsets = [2, 0], sizes = [1, 32], strides = [1, 1]} : vector<8x32xf32> to vector<1x32xf32>
    %717 = vector.broadcast %714 : vector<1x32xf32> to vector<8x32xf32>
    %718 = arith.addf %712, %717 : vector<8x32xf32>
    %cst_252 = arith.constant dense<0.000000e+00> : vector<32xf32>
    %719 = vector.multi_reduction <add>, %718, %cst_252 [0] : vector<8x32xf32> to vector<32xf32>
    %720 = vector.shape_cast %719 : vector<32xf32> to vector<1x32xf32>
    %cst_253 = arith.constant 1.250000e-01 : f32
    %721 = vector.broadcast %cst_253 : f32 to vector<1x32xf32>
    %722 = arith.mulf %720, %721 : vector<1x32xf32>
    %723 = arith.mulf %718, %718 : vector<8x32xf32>
    %cst_254 = arith.constant dense<0.000000e+00> : vector<32xf32>
    %724 = vector.multi_reduction <add>, %723, %cst_254 [0] : vector<8x32xf32> to vector<32xf32>
    %725 = vector.shape_cast %724 : vector<32xf32> to vector<1x32xf32>
    %cst_255 = arith.constant 1.250000e-01 : f32
    %726 = vector.broadcast %cst_255 : f32 to vector<1x32xf32>
    %727 = arith.mulf %725, %726 : vector<1x32xf32>
    %728 = arith.mulf %722, %722 : vector<1x32xf32>
    %729 = arith.subf %727, %728 : vector<1x32xf32>
    %cst_256 = arith.constant 0.000000e+00 : f32
    %730 = vector.broadcast %cst_256 : f32 to vector<1x32xf32>
    %731 = arith.maximumf %729, %730 : vector<1x32xf32>
    %cst_257 = arith.constant 9.99999974E-6 : f32
    %732 = vector.broadcast %cst_257 : f32 to vector<1x32xf32>
    %733 = arith.addf %731, %732 : vector<1x32xf32>
    %734 = math.rsqrt %733 : vector<1x32xf32>
    %735 = vector.broadcast %722 : vector<1x32xf32> to vector<8x32xf32>
    %736 = arith.subf %718, %735 : vector<8x32xf32>
    %737 = arith.mulf %734, %715 : vector<1x32xf32>
    %738 = vector.broadcast %737 : vector<1x32xf32> to vector<8x32xf32>
    %739 = arith.mulf %736, %738 : vector<8x32xf32>
    %740 = vector.broadcast %716 : vector<1x32xf32> to vector<8x32xf32>
    %741 = arith.addf %739, %740 : vector<8x32xf32>
    %cst_258 = arith.constant 0.000000e+00 : f32
    %742 = vector.broadcast %cst_258 : f32 to vector<8x32xf32>
    %743 = arith.maximumf %741, %742 : vector<8x32xf32>
    %744 = tpu.iota {dimensions = array<i32: 0>} : vector<16x8xi32>
    %745 = tpu.iota {dimensions = array<i32: 1>} : vector<16x8xi32>
    %c1_i32_259 = arith.constant 1 : i32
    %746 = vector.broadcast %c1_i32_259 : i32 to vector<16x8xi32>
    %747 = arith.shrsi %744, %746 : vector<16x8xi32>
    %748 = arith.cmpi eq, %745, %747 : vector<16x8xi32>
    %cst_260 = arith.constant 1.000000e+00 : f32
    %cst_261 = arith.constant 0.000000e+00 : f32
    %749 = vector.broadcast %cst_260 : f32 to vector<16x8xf32>
    %750 = vector.broadcast %cst_261 : f32 to vector<16x8xf32>
    %751 = arith.select %748, %749, %750 : vector<16x8xi1>, vector<16x8xf32>
    %752 = arith.truncf %751 : vector<16x8xf32> to vector<16x8xbf16>
    %753 = arith.truncf %743 : vector<8x32xf32> to vector<8x32xbf16>
    %cst_262 = arith.constant dense<0.000000e+00> : vector<16x32xf32>
    %754 = tpu.matmul %752, %753, %cst_262 {dimension_numbers = #tpu.dot_dimension_numbers<[1], [0], [0], [1], [0, 0, 1, 1], [], []>} : vector<16x8xbf16>, vector<8x32xbf16>, vector<16x32xf32> -> vector<16x32xf32>
    %755 = tpu.iota {dimensions = array<i32: 0>} : vector<16x32xi32>
    %c7_i32_263 = arith.constant 7 : i32
    %756 = vector.broadcast %c7_i32_263 : i32 to vector<16x32xi32>
    %757 = arith.andi %755, %756 : vector<16x32xi32>
    %c0_i32_264 = arith.constant 0 : i32
    %758 = vector.broadcast %c0_i32_264 : i32 to vector<16x32xi32>
    %759 = arith.cmpi eq, %757, %758 : vector<16x32xi32>
    %c1_i32_265 = arith.constant 1 : i32
    %760 = tpu.dynamic_rotate %754 by %c1_i32_265 dim 0 : vector<16x32xf32>, i32 -> vector<16x32xf32>
    %cst_266 = arith.constant 0.000000e+00 : f32
    %761 = vector.broadcast %cst_266 : f32 to vector<16x32xf32>
    %762 = arith.select %759, %761, %760 : vector<16x32xi1>, vector<16x32xf32>
    %c7_i32_267 = arith.constant 7 : i32
    %763 = vector.broadcast %c7_i32_267 : i32 to vector<16x32xi32>
    %764 = arith.cmpi eq, %757, %763 : vector<16x32xi32>
    %c15_i32_268 = arith.constant 15 : i32
    %765 = tpu.dynamic_rotate %754 by %c15_i32_268 dim 0 : vector<16x32xf32>, i32 -> vector<16x32xf32>
    %cst_269 = arith.constant 0.000000e+00 : f32
    %766 = vector.broadcast %cst_269 : f32 to vector<16x32xf32>
    %767 = arith.select %764, %766, %765 : vector<16x32xi1>, vector<16x32xf32>
    %768 = tpu.concatenate %762, %754, %767 in 1 : vector<16x32xf32>, vector<16x32xf32>, vector<16x32xf32> -> vector<16x96xf32>
    %769 = arith.truncf %768 : vector<16x96xf32> to vector<16x96xbf16>
    %c2288 = arith.constant 2288 : index
    %c0_270 = arith.constant 0 : index
    %770 = vector.load %arg1[%c2288, %c0_270] : memref<2608x128xbf16, #tpu.memory_space<vmem>>, vector<96x16xbf16>
    %cst_271 = arith.constant dense<0.000000e+00> : vector<16x16xf32>
    %771 = tpu.matmul %769, %770, %cst_271 {dimension_numbers = #tpu.dot_dimension_numbers<[1], [0], [0], [1], [0, 0, 1, 1], [], []>} : vector<16x96xbf16>, vector<96x16xbf16>, vector<16x16xf32> -> vector<16x16xf32>
    %c0_i32_272 = arith.constant 0 : i32
    %772 = vector.broadcast %c0_i32_272 : i32 to vector<16x16xi32>
    %773 = arith.cmpi eq, %154, %772 : vector<16x16xi32>
    %c1_i32_273 = arith.constant 1 : i32
    %774 = tpu.dynamic_rotate %199 by %c1_i32_273 dim 0 : vector<16x16xf32>, i32 -> vector<16x16xf32>
    %cst_274 = arith.constant 0.000000e+00 : f32
    %775 = vector.broadcast %cst_274 : f32 to vector<16x16xf32>
    %776 = arith.select %773, %775, %774 : vector<16x16xi1>, vector<16x16xf32>
    %c7_i32_275 = arith.constant 7 : i32
    %777 = vector.broadcast %c7_i32_275 : i32 to vector<16x16xi32>
    %778 = arith.cmpi eq, %154, %777 : vector<16x16xi32>
    %c15_i32_276 = arith.constant 15 : i32
    %779 = tpu.dynamic_rotate %199 by %c15_i32_276 dim 0 : vector<16x16xf32>, i32 -> vector<16x16xf32>
    %cst_277 = arith.constant 0.000000e+00 : f32
    %780 = vector.broadcast %cst_277 : f32 to vector<16x16xf32>
    %781 = arith.select %778, %780, %779 : vector<16x16xi1>, vector<16x16xf32>
    %782 = tpu.concatenate %776, %199, %781 in 1 : vector<16x16xf32>, vector<16x16xf32>, vector<16x16xf32> -> vector<16x48xf32>
    %783 = arith.truncf %782 : vector<16x48xf32> to vector<16x48xbf16>
    %c2384 = arith.constant 2384 : index
    %c0_278 = arith.constant 0 : index
    %784 = vector.load %arg1[%c2384, %c0_278] : memref<2608x128xbf16, #tpu.memory_space<vmem>>, vector<48x16xbf16>
    %cst_279 = arith.constant dense<0.000000e+00> : vector<16x16xf32>
    %785 = tpu.matmul %783, %784, %cst_279 {dimension_numbers = #tpu.dot_dimension_numbers<[1], [0], [0], [1], [0, 0, 1, 1], [], []>} : vector<16x48xbf16>, vector<48x16xbf16>, vector<16x16xf32> -> vector<16x16xf32>
    %786 = arith.addf %771, %785 : vector<16x16xf32>
    %c112 = arith.constant 112 : index
    %c0_280 = arith.constant 0 : index
    %787 = vector.load %arg2[%c112, %c0_280] : memref<152x128xf32, #tpu.memory_space<vmem>>, vector<8x16xf32>
    %788 = vector.extract_strided_slice %787 {offsets = [0, 0], sizes = [1, 16], strides = [1, 1]} : vector<8x16xf32> to vector<1x16xf32>
    %789 = vector.extract_strided_slice %787 {offsets = [1, 0], sizes = [1, 16], strides = [1, 1]} : vector<8x16xf32> to vector<1x16xf32>
    %790 = vector.extract_strided_slice %787 {offsets = [2, 0], sizes = [1, 16], strides = [1, 1]} : vector<8x16xf32> to vector<1x16xf32>
    %791 = vector.broadcast %788 : vector<1x16xf32> to vector<16x16xf32>
    %792 = arith.addf %786, %791 : vector<16x16xf32>
    %cst_281 = arith.constant dense<0.000000e+00> : vector<16xf32>
    %793 = vector.multi_reduction <add>, %792, %cst_281 [0] : vector<16x16xf32> to vector<16xf32>
    %794 = vector.shape_cast %793 : vector<16xf32> to vector<1x16xf32>
    %cst_282 = arith.constant 6.250000e-02 : f32
    %795 = vector.broadcast %cst_282 : f32 to vector<1x16xf32>
    %796 = arith.mulf %794, %795 : vector<1x16xf32>
    %797 = arith.mulf %792, %792 : vector<16x16xf32>
    %cst_283 = arith.constant dense<0.000000e+00> : vector<16xf32>
    %798 = vector.multi_reduction <add>, %797, %cst_283 [0] : vector<16x16xf32> to vector<16xf32>
    %799 = vector.shape_cast %798 : vector<16xf32> to vector<1x16xf32>
    %cst_284 = arith.constant 6.250000e-02 : f32
    %800 = vector.broadcast %cst_284 : f32 to vector<1x16xf32>
    %801 = arith.mulf %799, %800 : vector<1x16xf32>
    %802 = arith.mulf %796, %796 : vector<1x16xf32>
    %803 = arith.subf %801, %802 : vector<1x16xf32>
    %cst_285 = arith.constant 0.000000e+00 : f32
    %804 = vector.broadcast %cst_285 : f32 to vector<1x16xf32>
    %805 = arith.maximumf %803, %804 : vector<1x16xf32>
    %cst_286 = arith.constant 9.99999974E-6 : f32
    %806 = vector.broadcast %cst_286 : f32 to vector<1x16xf32>
    %807 = arith.addf %805, %806 : vector<1x16xf32>
    %808 = math.rsqrt %807 : vector<1x16xf32>
    %809 = vector.broadcast %796 : vector<1x16xf32> to vector<16x16xf32>
    %810 = arith.subf %792, %809 : vector<16x16xf32>
    %811 = arith.mulf %808, %789 : vector<1x16xf32>
    %812 = vector.broadcast %811 : vector<1x16xf32> to vector<16x16xf32>
    %813 = arith.mulf %810, %812 : vector<16x16xf32>
    %814 = vector.broadcast %790 : vector<1x16xf32> to vector<16x16xf32>
    %815 = arith.addf %813, %814 : vector<16x16xf32>
    %cst_287 = arith.constant 0.000000e+00 : f32
    %816 = vector.broadcast %cst_287 : f32 to vector<16x16xf32>
    %817 = arith.maximumf %815, %816 : vector<16x16xf32>
    %c0_i32_288 = arith.constant 0 : i32
    %818 = vector.broadcast %c0_i32_288 : i32 to vector<16x16xi32>
    %819 = arith.cmpi eq, %154, %818 : vector<16x16xi32>
    %c1_i32_289 = arith.constant 1 : i32
    %820 = tpu.dynamic_rotate %817 by %c1_i32_289 dim 0 : vector<16x16xf32>, i32 -> vector<16x16xf32>
    %cst_290 = arith.constant 0.000000e+00 : f32
    %821 = vector.broadcast %cst_290 : f32 to vector<16x16xf32>
    %822 = arith.select %819, %821, %820 : vector<16x16xi1>, vector<16x16xf32>
    %c7_i32_291 = arith.constant 7 : i32
    %823 = vector.broadcast %c7_i32_291 : i32 to vector<16x16xi32>
    %824 = arith.cmpi eq, %154, %823 : vector<16x16xi32>
    %c15_i32_292 = arith.constant 15 : i32
    %825 = tpu.dynamic_rotate %817 by %c15_i32_292 dim 0 : vector<16x16xf32>, i32 -> vector<16x16xf32>
    %cst_293 = arith.constant 0.000000e+00 : f32
    %826 = vector.broadcast %cst_293 : f32 to vector<16x16xf32>
    %827 = arith.select %824, %826, %825 : vector<16x16xi1>, vector<16x16xf32>
    %828 = tpu.concatenate %822, %817, %827 in 1 : vector<16x16xf32>, vector<16x16xf32>, vector<16x16xf32> -> vector<16x48xf32>
    %829 = arith.truncf %828 : vector<16x48xf32> to vector<16x48xbf16>
    %c2432 = arith.constant 2432 : index
    %c0_294 = arith.constant 0 : index
    %830 = vector.load %arg1[%c2432, %c0_294] : memref<2608x128xbf16, #tpu.memory_space<vmem>>, vector<48x16xbf16>
    %cst_295 = arith.constant dense<0.000000e+00> : vector<16x16xf32>
    %831 = tpu.matmul %829, %830, %cst_295 {dimension_numbers = #tpu.dot_dimension_numbers<[1], [0], [0], [1], [0, 0, 1, 1], [], []>} : vector<16x48xbf16>, vector<48x16xbf16>, vector<16x16xf32> -> vector<16x16xf32>
    %c120 = arith.constant 120 : index
    %c0_296 = arith.constant 0 : index
    %832 = vector.load %arg2[%c120, %c0_296] : memref<152x128xf32, #tpu.memory_space<vmem>>, vector<8x16xf32>
    %833 = vector.extract_strided_slice %832 {offsets = [0, 0], sizes = [1, 16], strides = [1, 1]} : vector<8x16xf32> to vector<1x16xf32>
    %834 = vector.extract_strided_slice %832 {offsets = [1, 0], sizes = [1, 16], strides = [1, 1]} : vector<8x16xf32> to vector<1x16xf32>
    %835 = vector.extract_strided_slice %832 {offsets = [2, 0], sizes = [1, 16], strides = [1, 1]} : vector<8x16xf32> to vector<1x16xf32>
    %836 = vector.broadcast %833 : vector<1x16xf32> to vector<16x16xf32>
    %837 = arith.addf %831, %836 : vector<16x16xf32>
    %cst_297 = arith.constant dense<0.000000e+00> : vector<16xf32>
    %838 = vector.multi_reduction <add>, %837, %cst_297 [0] : vector<16x16xf32> to vector<16xf32>
    %839 = vector.shape_cast %838 : vector<16xf32> to vector<1x16xf32>
    %cst_298 = arith.constant 6.250000e-02 : f32
    %840 = vector.broadcast %cst_298 : f32 to vector<1x16xf32>
    %841 = arith.mulf %839, %840 : vector<1x16xf32>
    %842 = arith.mulf %837, %837 : vector<16x16xf32>
    %cst_299 = arith.constant dense<0.000000e+00> : vector<16xf32>
    %843 = vector.multi_reduction <add>, %842, %cst_299 [0] : vector<16x16xf32> to vector<16xf32>
    %844 = vector.shape_cast %843 : vector<16xf32> to vector<1x16xf32>
    %cst_300 = arith.constant 6.250000e-02 : f32
    %845 = vector.broadcast %cst_300 : f32 to vector<1x16xf32>
    %846 = arith.mulf %844, %845 : vector<1x16xf32>
    %847 = arith.mulf %841, %841 : vector<1x16xf32>
    %848 = arith.subf %846, %847 : vector<1x16xf32>
    %cst_301 = arith.constant 0.000000e+00 : f32
    %849 = vector.broadcast %cst_301 : f32 to vector<1x16xf32>
    %850 = arith.maximumf %848, %849 : vector<1x16xf32>
    %cst_302 = arith.constant 9.99999974E-6 : f32
    %851 = vector.broadcast %cst_302 : f32 to vector<1x16xf32>
    %852 = arith.addf %850, %851 : vector<1x16xf32>
    %853 = math.rsqrt %852 : vector<1x16xf32>
    %854 = vector.broadcast %841 : vector<1x16xf32> to vector<16x16xf32>
    %855 = arith.subf %837, %854 : vector<16x16xf32>
    %856 = arith.mulf %853, %834 : vector<1x16xf32>
    %857 = vector.broadcast %856 : vector<1x16xf32> to vector<16x16xf32>
    %858 = arith.mulf %855, %857 : vector<16x16xf32>
    %859 = vector.broadcast %835 : vector<1x16xf32> to vector<16x16xf32>
    %860 = arith.addf %858, %859 : vector<16x16xf32>
    %cst_303 = arith.constant 0.000000e+00 : f32
    %861 = vector.broadcast %cst_303 : f32 to vector<16x16xf32>
    %862 = arith.maximumf %860, %861 : vector<16x16xf32>
    %863 = tpu.iota {dimensions = array<i32: 0>} : vector<32x16xi32>
    %864 = tpu.iota {dimensions = array<i32: 1>} : vector<32x16xi32>
    %c1_i32_304 = arith.constant 1 : i32
    %865 = vector.broadcast %c1_i32_304 : i32 to vector<32x16xi32>
    %866 = arith.shrsi %863, %865 : vector<32x16xi32>
    %867 = arith.cmpi eq, %864, %866 : vector<32x16xi32>
    %cst_305 = arith.constant 1.000000e+00 : f32
    %cst_306 = arith.constant 0.000000e+00 : f32
    %868 = vector.broadcast %cst_305 : f32 to vector<32x16xf32>
    %869 = vector.broadcast %cst_306 : f32 to vector<32x16xf32>
    %870 = arith.select %867, %868, %869 : vector<32x16xi1>, vector<32x16xf32>
    %871 = arith.truncf %870 : vector<32x16xf32> to vector<32x16xbf16>
    %872 = arith.truncf %862 : vector<16x16xf32> to vector<16x16xbf16>
    %cst_307 = arith.constant dense<0.000000e+00> : vector<32x16xf32>
    %873 = tpu.matmul %871, %872, %cst_307 {dimension_numbers = #tpu.dot_dimension_numbers<[1], [0], [0], [1], [0, 0, 1, 1], [], []>} : vector<32x16xbf16>, vector<16x16xbf16>, vector<32x16xf32> -> vector<32x16xf32>
    %874 = tpu.iota {dimensions = array<i32: 0>} : vector<32x16xi32>
    %c15_i32_308 = arith.constant 15 : i32
    %875 = vector.broadcast %c15_i32_308 : i32 to vector<32x16xi32>
    %876 = arith.andi %874, %875 : vector<32x16xi32>
    %c0_i32_309 = arith.constant 0 : i32
    %877 = vector.broadcast %c0_i32_309 : i32 to vector<32x16xi32>
    %878 = arith.cmpi eq, %876, %877 : vector<32x16xi32>
    %c1_i32_310 = arith.constant 1 : i32
    %879 = tpu.dynamic_rotate %873 by %c1_i32_310 dim 0 : vector<32x16xf32>, i32 -> vector<32x16xf32>
    %cst_311 = arith.constant 0.000000e+00 : f32
    %880 = vector.broadcast %cst_311 : f32 to vector<32x16xf32>
    %881 = arith.select %878, %880, %879 : vector<32x16xi1>, vector<32x16xf32>
    %c15_i32_312 = arith.constant 15 : i32
    %882 = vector.broadcast %c15_i32_312 : i32 to vector<32x16xi32>
    %883 = arith.cmpi eq, %876, %882 : vector<32x16xi32>
    %c31_i32_313 = arith.constant 31 : i32
    %884 = tpu.dynamic_rotate %873 by %c31_i32_313 dim 0 : vector<32x16xf32>, i32 -> vector<32x16xf32>
    %cst_314 = arith.constant 0.000000e+00 : f32
    %885 = vector.broadcast %cst_314 : f32 to vector<32x16xf32>
    %886 = arith.select %883, %885, %884 : vector<32x16xi1>, vector<32x16xf32>
    %887 = tpu.concatenate %881, %873, %886 in 1 : vector<32x16xf32>, vector<32x16xf32>, vector<32x16xf32> -> vector<32x48xf32>
    %888 = arith.truncf %887 : vector<32x48xf32> to vector<32x48xbf16>
    %c2480 = arith.constant 2480 : index
    %c0_315 = arith.constant 0 : index
    %889 = vector.load %arg1[%c2480, %c0_315] : memref<2608x128xbf16, #tpu.memory_space<vmem>>, vector<48x8xbf16>
    %cst_316 = arith.constant dense<0.000000e+00> : vector<32x8xf32>
    %890 = tpu.matmul %888, %889, %cst_316 {dimension_numbers = #tpu.dot_dimension_numbers<[1], [0], [0], [1], [0, 0, 1, 1], [], []>} : vector<32x48xbf16>, vector<48x8xbf16>, vector<32x8xf32> -> vector<32x8xf32>
    %c0_i32_317 = arith.constant 0 : i32
    %891 = vector.broadcast %c0_i32_317 : i32 to vector<32x8xi32>
    %892 = arith.cmpi eq, %36, %891 : vector<32x8xi32>
    %c1_i32_318 = arith.constant 1 : i32
    %893 = tpu.dynamic_rotate %81 by %c1_i32_318 dim 0 : vector<32x8xf32>, i32 -> vector<32x8xf32>
    %cst_319 = arith.constant 0.000000e+00 : f32
    %894 = vector.broadcast %cst_319 : f32 to vector<32x8xf32>
    %895 = arith.select %892, %894, %893 : vector<32x8xi1>, vector<32x8xf32>
    %c15_i32_320 = arith.constant 15 : i32
    %896 = vector.broadcast %c15_i32_320 : i32 to vector<32x8xi32>
    %897 = arith.cmpi eq, %36, %896 : vector<32x8xi32>
    %c31_i32_321 = arith.constant 31 : i32
    %898 = tpu.dynamic_rotate %81 by %c31_i32_321 dim 0 : vector<32x8xf32>, i32 -> vector<32x8xf32>
    %cst_322 = arith.constant 0.000000e+00 : f32
    %899 = vector.broadcast %cst_322 : f32 to vector<32x8xf32>
    %900 = arith.select %897, %899, %898 : vector<32x8xi1>, vector<32x8xf32>
    %901 = tpu.concatenate %895, %81, %900 in 1 : vector<32x8xf32>, vector<32x8xf32>, vector<32x8xf32> -> vector<32x24xf32>
    %902 = arith.truncf %901 : vector<32x24xf32> to vector<32x24xbf16>
    %c2528 = arith.constant 2528 : index
    %c0_323 = arith.constant 0 : index
    %903 = vector.load %arg1[%c2528, %c0_323] : memref<2608x128xbf16, #tpu.memory_space<vmem>>, vector<24x8xbf16>
    %cst_324 = arith.constant dense<0.000000e+00> : vector<32x8xf32>
    %904 = tpu.matmul %902, %903, %cst_324 {dimension_numbers = #tpu.dot_dimension_numbers<[1], [0], [0], [1], [0, 0, 1, 1], [], []>} : vector<32x24xbf16>, vector<24x8xbf16>, vector<32x8xf32> -> vector<32x8xf32>
    %905 = arith.addf %890, %904 : vector<32x8xf32>
    %c128_325 = arith.constant 128 : index
    %c0_326 = arith.constant 0 : index
    %906 = vector.load %arg2[%c128_325, %c0_326] : memref<152x128xf32, #tpu.memory_space<vmem>>, vector<8x8xf32>
    %907 = vector.extract_strided_slice %906 {offsets = [0, 0], sizes = [1, 8], strides = [1, 1]} : vector<8x8xf32> to vector<1x8xf32>
    %908 = vector.extract_strided_slice %906 {offsets = [1, 0], sizes = [1, 8], strides = [1, 1]} : vector<8x8xf32> to vector<1x8xf32>
    %909 = vector.extract_strided_slice %906 {offsets = [2, 0], sizes = [1, 8], strides = [1, 1]} : vector<8x8xf32> to vector<1x8xf32>
    %910 = vector.broadcast %907 : vector<1x8xf32> to vector<32x8xf32>
    %911 = arith.addf %905, %910 : vector<32x8xf32>
    %cst_327 = arith.constant dense<0.000000e+00> : vector<8xf32>
    %912 = vector.multi_reduction <add>, %911, %cst_327 [0] : vector<32x8xf32> to vector<8xf32>
    %913 = vector.shape_cast %912 : vector<8xf32> to vector<1x8xf32>
    %cst_328 = arith.constant 3.125000e-02 : f32
    %914 = vector.broadcast %cst_328 : f32 to vector<1x8xf32>
    %915 = arith.mulf %913, %914 : vector<1x8xf32>
    %916 = arith.mulf %911, %911 : vector<32x8xf32>
    %cst_329 = arith.constant dense<0.000000e+00> : vector<8xf32>
    %917 = vector.multi_reduction <add>, %916, %cst_329 [0] : vector<32x8xf32> to vector<8xf32>
    %918 = vector.shape_cast %917 : vector<8xf32> to vector<1x8xf32>
    %cst_330 = arith.constant 3.125000e-02 : f32
    %919 = vector.broadcast %cst_330 : f32 to vector<1x8xf32>
    %920 = arith.mulf %918, %919 : vector<1x8xf32>
    %921 = arith.mulf %915, %915 : vector<1x8xf32>
    %922 = arith.subf %920, %921 : vector<1x8xf32>
    %cst_331 = arith.constant 0.000000e+00 : f32
    %923 = vector.broadcast %cst_331 : f32 to vector<1x8xf32>
    %924 = arith.maximumf %922, %923 : vector<1x8xf32>
    %cst_332 = arith.constant 9.99999974E-6 : f32
    %925 = vector.broadcast %cst_332 : f32 to vector<1x8xf32>
    %926 = arith.addf %924, %925 : vector<1x8xf32>
    %927 = math.rsqrt %926 : vector<1x8xf32>
    %928 = vector.broadcast %915 : vector<1x8xf32> to vector<32x8xf32>
    %929 = arith.subf %911, %928 : vector<32x8xf32>
    %930 = arith.mulf %927, %908 : vector<1x8xf32>
    %931 = vector.broadcast %930 : vector<1x8xf32> to vector<32x8xf32>
    %932 = arith.mulf %929, %931 : vector<32x8xf32>
    %933 = vector.broadcast %909 : vector<1x8xf32> to vector<32x8xf32>
    %934 = arith.addf %932, %933 : vector<32x8xf32>
    %cst_333 = arith.constant 0.000000e+00 : f32
    %935 = vector.broadcast %cst_333 : f32 to vector<32x8xf32>
    %936 = arith.maximumf %934, %935 : vector<32x8xf32>
    %c0_i32_334 = arith.constant 0 : i32
    %937 = vector.broadcast %c0_i32_334 : i32 to vector<32x8xi32>
    %938 = arith.cmpi eq, %36, %937 : vector<32x8xi32>
    %c1_i32_335 = arith.constant 1 : i32
    %939 = tpu.dynamic_rotate %936 by %c1_i32_335 dim 0 : vector<32x8xf32>, i32 -> vector<32x8xf32>
    %cst_336 = arith.constant 0.000000e+00 : f32
    %940 = vector.broadcast %cst_336 : f32 to vector<32x8xf32>
    %941 = arith.select %938, %940, %939 : vector<32x8xi1>, vector<32x8xf32>
    %c15_i32_337 = arith.constant 15 : i32
    %942 = vector.broadcast %c15_i32_337 : i32 to vector<32x8xi32>
    %943 = arith.cmpi eq, %36, %942 : vector<32x8xi32>
    %c31_i32_338 = arith.constant 31 : i32
    %944 = tpu.dynamic_rotate %936 by %c31_i32_338 dim 0 : vector<32x8xf32>, i32 -> vector<32x8xf32>
    %cst_339 = arith.constant 0.000000e+00 : f32
    %945 = vector.broadcast %cst_339 : f32 to vector<32x8xf32>
    %946 = arith.select %943, %945, %944 : vector<32x8xi1>, vector<32x8xf32>
    %947 = tpu.concatenate %941, %936, %946 in 1 : vector<32x8xf32>, vector<32x8xf32>, vector<32x8xf32> -> vector<32x24xf32>
    %948 = arith.truncf %947 : vector<32x24xf32> to vector<32x24xbf16>
    %c2560 = arith.constant 2560 : index
    %c0_340 = arith.constant 0 : index
    %949 = vector.load %arg1[%c2560, %c0_340] : memref<2608x128xbf16, #tpu.memory_space<vmem>>, vector<24x8xbf16>
    %cst_341 = arith.constant dense<0.000000e+00> : vector<32x8xf32>
    %950 = tpu.matmul %948, %949, %cst_341 {dimension_numbers = #tpu.dot_dimension_numbers<[1], [0], [0], [1], [0, 0, 1, 1], [], []>} : vector<32x24xbf16>, vector<24x8xbf16>, vector<32x8xf32> -> vector<32x8xf32>
    %c136 = arith.constant 136 : index
    %c0_342 = arith.constant 0 : index
    %951 = vector.load %arg2[%c136, %c0_342] : memref<152x128xf32, #tpu.memory_space<vmem>>, vector<8x8xf32>
    %952 = vector.extract_strided_slice %951 {offsets = [0, 0], sizes = [1, 8], strides = [1, 1]} : vector<8x8xf32> to vector<1x8xf32>
    %953 = vector.extract_strided_slice %951 {offsets = [1, 0], sizes = [1, 8], strides = [1, 1]} : vector<8x8xf32> to vector<1x8xf32>
    %954 = vector.extract_strided_slice %951 {offsets = [2, 0], sizes = [1, 8], strides = [1, 1]} : vector<8x8xf32> to vector<1x8xf32>
    %955 = vector.broadcast %952 : vector<1x8xf32> to vector<32x8xf32>
    %956 = arith.addf %950, %955 : vector<32x8xf32>
    %cst_343 = arith.constant dense<0.000000e+00> : vector<8xf32>
    %957 = vector.multi_reduction <add>, %956, %cst_343 [0] : vector<32x8xf32> to vector<8xf32>
    %958 = vector.shape_cast %957 : vector<8xf32> to vector<1x8xf32>
    %cst_344 = arith.constant 3.125000e-02 : f32
    %959 = vector.broadcast %cst_344 : f32 to vector<1x8xf32>
    %960 = arith.mulf %958, %959 : vector<1x8xf32>
    %961 = arith.mulf %956, %956 : vector<32x8xf32>
    %cst_345 = arith.constant dense<0.000000e+00> : vector<8xf32>
    %962 = vector.multi_reduction <add>, %961, %cst_345 [0] : vector<32x8xf32> to vector<8xf32>
    %963 = vector.shape_cast %962 : vector<8xf32> to vector<1x8xf32>
    %cst_346 = arith.constant 3.125000e-02 : f32
    %964 = vector.broadcast %cst_346 : f32 to vector<1x8xf32>
    %965 = arith.mulf %963, %964 : vector<1x8xf32>
    %966 = arith.mulf %960, %960 : vector<1x8xf32>
    %967 = arith.subf %965, %966 : vector<1x8xf32>
    %cst_347 = arith.constant 0.000000e+00 : f32
    %968 = vector.broadcast %cst_347 : f32 to vector<1x8xf32>
    %969 = arith.maximumf %967, %968 : vector<1x8xf32>
    %cst_348 = arith.constant 9.99999974E-6 : f32
    %970 = vector.broadcast %cst_348 : f32 to vector<1x8xf32>
    %971 = arith.addf %969, %970 : vector<1x8xf32>
    %972 = math.rsqrt %971 : vector<1x8xf32>
    %973 = vector.broadcast %960 : vector<1x8xf32> to vector<32x8xf32>
    %974 = arith.subf %956, %973 : vector<32x8xf32>
    %975 = arith.mulf %972, %953 : vector<1x8xf32>
    %976 = vector.broadcast %975 : vector<1x8xf32> to vector<32x8xf32>
    %977 = arith.mulf %974, %976 : vector<32x8xf32>
    %978 = vector.broadcast %954 : vector<1x8xf32> to vector<32x8xf32>
    %979 = arith.addf %977, %978 : vector<32x8xf32>
    %cst_349 = arith.constant 0.000000e+00 : f32
    %980 = vector.broadcast %cst_349 : f32 to vector<32x8xf32>
    %981 = arith.maximumf %979, %980 : vector<32x8xf32>
    %c2592 = arith.constant 2592 : index
    %c0_350 = arith.constant 0 : index
    %982 = vector.load %arg1[%c2592, %c0_350] : memref<2608x128xbf16, #tpu.memory_space<vmem>>, vector<8x1xbf16>
    %c144 = arith.constant 144 : index
    %c0_351 = arith.constant 0 : index
    %983 = vector.load %arg2[%c144, %c0_351] : memref<152x128xf32, #tpu.memory_space<vmem>>, vector<1x1xf32>
    %984 = arith.truncf %981 : vector<32x8xf32> to vector<32x8xbf16>
    %cst_352 = arith.constant dense<0.000000e+00> : vector<32x1xf32>
    %985 = tpu.matmul %984, %982, %cst_352 {dimension_numbers = #tpu.dot_dimension_numbers<[1], [0], [0], [1], [0, 0, 1, 1], [], []>} : vector<32x8xbf16>, vector<8x1xbf16>, vector<32x1xf32> -> vector<32x1xf32>
    %986 = vector.broadcast %983 : vector<1x1xf32> to vector<32x1xf32>
    %987 = arith.addf %985, %986 : vector<32x1xf32>
    %c0_353 = arith.constant 0 : index
    %c0_354 = arith.constant 0 : index
    %988 = vector.load %arg3[%c0_353, %c0_354] : memref<32x1xf32, #tpu.memory_space<vmem>>, vector<32x1xf32>
    tpu.vector_store %arg3[%c0_353, %c0_354], %987 {strides = array<i32>} : memref<32x1xf32, #tpu.memory_space<vmem>>, vector<32x1xf32>,
    return
  }
}

</mosaic_0001>

<bundles_post_ra>
// kernel: unet1d_forward.1
= control target key start
LH: loop header
LB: loop body
LE: loop exit
PB: predicated region body
PF: predicated region fallthrough
CT: control target
= control target key end

     0   :  { %8 = vsyncpa [#allocation3], 0  ;;  %s5279_s0 = inlined_call_operand.vmem [shape: bf16[32,3], index: 0, kind: input, shape index: {}]   ;;  %s5280_s1 = inlined_call_operand.hbm [shape: bf16[2608,128], index: 1, kind: input, shape index: {}]   ;;  %s5281_s2 = inlined_call_operand.hbm [shape: f32[152,128], index: 2, kind: input, shape index: {}]   ;;  %s5282_s3 = inlined_call_operand.vmem [shape: f32[32,1], index: 3, kind: output, shape index: {}]  }
   0x1   :  { %s16_s14 = sshll.u32 %s5280_s1, 4  ;;  %s17_s14 = int_to_ptr.hbm [resolvable:$true] %s16_s14 }
   0x2   :  { %9 = vsyncpa [#allocation5], 0  ;;  %s4512_s15 = smov [#allocation2]   ;;  %s29_s19 = sshll.u32 %s5281_s2, 4  ;;  %s30_s19 = int_to_ptr.hbm [resolvable:$true] %s29_s19 }
   0x3   :  { %s18_s16 = sshll.u32 %s4512_s15, 4  ;;  %s4513_s20 = smov 64   ;;  %s19_s16 = int_to_ptr.vmem [resolvable:$true] %s18_s16 }
   0x4   :  { %s4514_s21 = smov 4   ;;  %s4515_s22 = smov [#allocation4]  }
   0x5   :  { %24 = dma.hbm_to_vmem [thread:$0]  %s17_s14, 20864, %s19_s16, [#allocation3], %s4513_s20, %s4513_s20, %s4514_s21  }
   0x6   :  { %s31_s23 = sshll.u32 %s4515_s22, 4  ;;  %s4516_s24 = smov 128   ;;  %s32_s23 = int_to_ptr.vmem [resolvable:$true] %s31_s23 }
   0x7   :  { %s4517_s1 = smov 8  }
   0x8   :  { %37 = dma.hbm_to_vmem [thread:$0]  %s30_s19, 2432, %s32_s23, [#allocation5], %s4516_s24, %s4516_s24, %s4517_s1  }
   0x9   :  { %4508 = dma.done.wait [#allocation3], 20864  }
   0xa   :  { %4509 = vsyncadd [#allocation3], 4294946432 }
   0xb   :  { %4510 = dma.done.wait [#allocation5], 2432  }
   0xc   :  { %4511 = vsyncadd [#allocation5], 4294964864  ;;  %vm5283_vm0 = vcmask 1040384   ;;  %vm5285_vm1 = vcmask 1041408   ;;  %v4518_v0 = vmov 65535   ;;  %v4143_v5 = vld [vmem:[%s5279_s0] sm:$0xff]  ;;  %v163_v58 = vlaneseq }
   0xd   :  { %v73_v1 = vsel %vm5283_vm0, 4294967295, %v4518_v0  ;;  %v51_v3 = vld [vmem:[#allocation2] sm:$0x3]  ;;  %vm64_vm2 = vcmask 23552   ;;  %v4144_v6 = vld [vmem:[%s5279_s0 + $0x8] sm:$0xff]  ;;  %v52_v9 = vld [vmem:[#allocation4] sm:$0xff] }
   0xe   :  { %v74_v2 = vsel %vm5285_vm1, %v73_v1, 0  ;;  %v53_v10 = vperm.slane %v52_v9, 0  ;;  %vm5286_vm3 = vcmask 64512   ;;  %v4578_v61 = vshrl.u32 %v163_v58, 7  ;;  %s4519_s0 = smov 16   ;;  %s4521_s28 = smov 32  }
   0xf   :  { %v76_v4 = vand.u32 %v74_v2, %v51_v3  ;;  %v154_v0 = vperm.slane %v52_v9, 2  ;;  %vm5287_vm11 = vcmask 1043456   ;;  %vm5291_vm14 = vcmask 130048  }
  0x10   :  { %vm5289_vm7 = vcmp.lt.s32.totalorder %v4578_v61, 7  ;;  %vm5288_vm8 = vcmp.lt.s32.totalorder %v4578_v61, 1  ;;  %vm5284_vm15 = vcmask 195584  }
  0x11   :  { %85 = vmatpush.bf16.msra.mxu0 %v76_v4 }
  0x14   :  { %3560 = vmatmul.msk.bf16.vlgmr.msra.gmra.mxu0 %vm64_vm2, %v4143_v5  ;;  %v4583_v5 = vadd.s32 24, %v4578_v61 }
  0x24   :  { %3561 = vmatmul.msk.bf16.gmra.mxu0 %vm64_vm2, %v4144_v6 }
  0x91   :  { %v87_v7 = vpop.f32.mrf.mxu0 }
  0x92   :  { %v4561_v13 = vadd.f32 %v87_v7, %v53_v10 }
  0x94   :  { %v112_v16 = vmul.f32 %v4561_v13, %v4561_v13  ;;  %v98_v19 = vsel %vm5286_vm3, %v4561_v13, 0.0 }
  0x96   :  { %v116_v24 = vsel %vm5286_vm3, %v112_v16, 0.0 }
  0x99   :  { %v89_v8 = vpop.f32.mrf.mxu0 }
  0x9a   :  { %v4559_v11 = vadd.f32 %v89_v8, %v53_v10 }
  0x9c   :  { %v113_v15 = vmul.f32 %v4559_v11, %v4559_v11  ;;  %v99_v17 = vsel %vm5286_vm3, %v4559_v11, 0.0 }
  0x9d   :  { %v100_v22 = vadd.f32 %v99_v17, %v98_v19 }
  0x9e   :  { %v117_v20 = vsel %vm5286_vm3, %v113_v15, 0.0 }
  0x9f   :  { %v118_v27 = vadd.f32 %v117_v20, %v116_v24 }
  0xa1   :  { %v92_v12 = vpop.f32.mrf.mxu0 }
  0xa2   :  { %v93_v14 = vadd.f32 %v92_v12, %v53_v10  ;;  %v4586_v12 = vadd.s32 8, %v4578_v61 }
  0xa4   :  { %v114_v18 = vmul.f32 %v93_v14, %v93_v14  ;;  %v101_v21 = vsel %vm5286_vm3, %v93_v14, 0.0  ;;  %v169_v20 = vand.u32 15, %v4586_v12 }
  0xa5   :  { %v102_v28 = vadd.f32 %v101_v21, %v100_v22 }
  0xa6   :  { %v119_v25 = vsel %vm5286_vm3, %v114_v18, 0.0  ;;  %vm4600_vm10 = vcmp.eq.s32.totalorder %v169_v20, 15 }
  0xa7   :  { %v120_v31 = vadd.f32 %v119_v25, %v118_v27 }
  0xa9   :  { %v94_v23 = vpop.f32.mrf.mxu0 }
  0xaa   :  { %v95_v26 = vadd.f32 %v94_v23, %v53_v10 }
  0xac   :  { %v103_v29 = vsel %vm5286_vm3, %v95_v26, 0.0  ;;  %v115_v30 = vmul.f32 %v95_v26, %v95_v26 }
  0xad   :  { %v104_v32 = vadd.f32 %v103_v29, %v102_v28 }
  0xae   :  { %v121_v33 = vsel %vm5286_vm3, %v115_v30, 0.0 }
  0xaf   :  { %v105_v34 = vrot.slane %v104_v32, 4  ;;  %v122_v35 = vadd.f32 %v121_v33, %v120_v31  ;;  %v5299_v31 = vmov 0  ;;  %v4277_v33 = vld [vmem:[#allocation2 + $0x500] sm:$0xff] }
  0xb1   :  { %v106_v36 = vadd.f32 %v105_v34, %v104_v32  ;;  %v123_v37 = vrot.slane %v122_v35, 4 }
  0xb3   :  { %v107_v38 = vrot.slane %v106_v36, 2  ;;  %v124_v39 = vadd.f32 %v123_v37, %v122_v35 }
  0xb5   :  { %v108_v40 = vadd.f32 %v107_v38, %v106_v36  ;;  %v125_v41 = vrot.slane %v124_v39, 2 }
  0xb7   :  { %v109_v42 = vrot.slane %v108_v40, 1  ;;  %v126_v43 = vadd.f32 %v125_v41, %v124_v39 }
  0xb9   :  { %v110_v44 = vadd.f32 %v109_v42, %v108_v40  ;;  %v127_v45 = vrot.slane %v126_v43, 1 }
  0xbb   :  { %v111_v46 = vmul.f32 0.03125, %v110_v44  ;;  %v128_v47 = vadd.f32 %v127_v45, %v126_v43  ;;  %v251_v45 = vld [vmem:[#allocation2 + $0x10] sm:$0xf] }
  0xbd   :  { %v129_v48 = vmul.f32 0.03125, %v128_v47  ;;  %v130_v49 = vmul.f32 %v111_v46, %v111_v46  ;;  %v147_v63 = vsub.f32 %v95_v26, %v111_v46  ;;  %v146_v1 = vsub.f32 %v93_v14, %v111_v46 }
  0xbe   :  { %v144_v3 = vsub.f32 %v4561_v13, %v111_v46  ;;  %v145_v4 = vsub.f32 %v4559_v11, %v111_v46  ;;  %v171_v14 = vand.u32 15, %v4583_v5  ;;  %v259_v46 = vunpack.c.l.b16 %v251_v45 }
  0xbf   :  { %v131_v50 = vsub.f32 %v129_v48, %v130_v49  ;;  %v4145_v49 = vld [vmem:[#allocation2 + $0x8] sm:$0xff] }
  0xc0   :  { %vm4593_vm9 = vcmp.eq.s32.totalorder %v171_v14, 15  ;;  %v261_v47 = vpack.c.b16 %v259_v46, %v259_v46 }
  0xc1   :  { %v132_v51 = vmax.f32 %v131_v50, 0.0  ;;  %v5300_v31 = vsel %vm4593_vm9, 4294967295, %v5299_v31  ;;  %v4626_v50 = vadd.s32 16, %v4578_v61 }
  0xc2   :  { %v272_v48 = vsel %vm5287_vm11, %v261_v47, 0 }
  0xc3   :  { %v133_v52 = vadd.f32 1e-05, %v132_v51  ;;  %280 = vmatpush.bf16.msra.mxu1 %v272_v48 }
  0xc5   :  { %4424 = vrsqrt.f32 %v133_v52  ;;  %vm140_vm5 = vweird.f32 %v133_v52 }
  0xc7   :  { %281 = vmatpush.bf16.msra.mxu1 %v4145_v49 }
  0xcb   :  { %v4425_v53 = vpop.eup %4424 }
  0xcc   :  { %v135_v54 = vmul.f32 %v4425_v53, %v133_v52  ;;  %vm141_vm4 = vweird.f32 %v4425_v53 }
  0xcd   :  { %vm142_vm6 = vmor %vm140_vm5, %vm141_vm4 }
  0xce   :  { %v136_v55 = vmul.f32 %v4425_v53, %v135_v54  ;;  %v168_v54 = vand.u32 15, %v4578_v61 }
  0xd0   :  { %v137_v56 = vmul.f32 0.5, %v136_v55  ;;  %v5303_v55 = vmov 0  ;;  %vm4634_vm13 = vcmp.eq.s32.totalorder %v168_v54, 0 }
  0xd2   :  { %v138_v57 = vsub.f32 1.5, %v137_v56 }
  0xd4   :  { %v139_v59 = vmul.f32 %v4425_v53, %v138_v57 }
  0xd6   :  { %v143_v60 = vsel %vm142_vm6, %v4425_v53, %v139_v59  ;;  %v170_v53 = vand.u32 15, %v4626_v50 }
  0xd7   :  { %v148_v62 = vmul.f32 %v143_v60, %v52_v9 }
  0xd8   :  { %vm4630_vm12 = vcmp.eq.s32.totalorder %v170_v53, 0 }
  0xd9   :  { %v149_v2 = vperm.slane %v148_v62, 1  ;;  %v5304_v55 = vsel %vm4630_vm12, 4294967295, %v5303_v55 }
  0xdb   :  { %v152_v6 = vmul.f32 %v149_v2, %v146_v1  ;;  %v153_v7 = vmul.f32 %v149_v2, %v147_v63  ;;  %v150_v8 = vmul.f32 %v149_v2, %v144_v3  ;;  %v151_v10 = vmul.f32 %v149_v2, %v145_v4 }
  0xdd   :  { %v157_v15 = vadd.f32 %v154_v0, %v152_v6  ;;  %v158_v16 = vadd.f32 %v154_v0, %v153_v7  ;;  %v155_v17 = vadd.f32 %v154_v0, %v150_v8  ;;  %v156_v9 = vadd.f32 %v154_v0, %v151_v10 }
  0xdf   :  { %v161_v18 = vmax.f32 %v157_v15, 0.0  ;;  %v162_v13 = vmax.f32 %v158_v16, 0.0  ;;  %v159_v19 = vmax.f32 %v155_v17, 0.0  ;;  %v160_v11 = vmax.f32 %v156_v9, 0.0 }
  0xe1   :  { %v179_v21 = vrot.slane %v162_v13, 7  ;;  %v196_v22 = vrot.slane %v162_v13, 1  ;;  %v4298_v23 = vpack.i.bf16 %v162_v13, %v161_v18  ;;  %v178_v24 = vrot.slane %v161_v18, 7 }
  0xe2   :  { %v195_v25 = vrot.slane %v161_v18, 1  ;;  %v177_v26 = vrot.slane %v160_v11, 7  ;;  %v194_v27 = vrot.slane %v160_v11, 1  ;;  %v4288_v28 = vpack.i.bf16 %v160_v11, %v159_v19 }
  0xe3   :  { %4299 = vrot.lane.b32.xlu1 %v4298_v23, %s4517_s1  ;;  %v176_v29 = vrot.slane %v159_v19, 7  ;;  %v193_v30 = vrot.slane %v159_v19, 1  ;;  %v181_v32 = vsel %vm5288_vm8, %v178_v24, %v179_v21 }
  0xe4   :  { %4289 = vrot.lane.b32.xlu0 %v4288_v28, %s4517_s1  ;;  %v199_v34 = vsel %vm5289_vm7, %v194_v27, %v195_v25  ;;  %v182_v35 = vsel %vm5288_vm8, %v177_v26, %v178_v24  ;;  %v198_v37 = vsel %vm5289_vm7, %v195_v25, %v196_v22 }
  0xe5   :  { %v201_v36 = vsel %vm5289_vm7, %v196_v22, %v193_v30  ;;  %v183_v39 = vsel %vm5288_vm8, %v176_v29, %v177_v26  ;;  %v184_v40 = vsel %vm5288_vm8, %v179_v21, %v176_v29  ;;  %v200_v41 = vsel %vm5289_vm7, %v193_v30, %v194_v27  ;;  %v252_v21 = vld [vmem:[#allocation4 + $0x8] sm:$0xff] }
  0xe6   :  { %v205_v38 = vsel %vm4593_vm9, 0.0, %v201_v36  ;;  %v203_v42 = vsel %vm4600_vm10, 0.0, %v199_v34  ;;  %v187_v0 = vsel %vm4630_vm12, 0.0, %v182_v35  ;;  %v185_v1 = vsel %vm4634_vm13, 0.0, %v184_v40 }
  0xe7   :  { %v4303_v43 = vpack.i.bf16 %v205_v38, %v198_v37  ;;  %v4293_v44 = vpack.i.bf16 %v203_v42, %v200_v41  ;;  %v253_v22 = vperm.slane %v252_v21, 0 }
  0xeb   :  { %4304 = vrot.lane.b32.xlu1 %v4303_v43, %s4519_s0 }
  0xec   :  { %4294 = vrot.lane.b32.xlu0 %v4293_v44, %s4519_s0 }
 0x155   :  { %v4300_v51 = vpop.permute.xlu1 %4299 }
 0x156   :  { %v4290_v52 = vpop.permute.xlu0 %4289  ;;  %v4302_v56 = vunpack.i.h.bf16 %v4300_v51  ;;  %v4301_v57 = vunpack.i.l.bf16 %v4300_v51 }
 0x157   :  { %v4292_v60 = vunpack.i.h.bf16 %v4290_v52  ;;  %v4291_v62 = vunpack.i.l.bf16 %v4290_v52 }
 0x158   :  { %v240_v6 = vsel %vm5286_vm3, %v187_v0, %v4301_v57  ;;  %v241_v7 = vsel %vm5286_vm3, %v181_v32, %v4302_v56 }
 0x159   :  { %v238_v15 = vsel %vm5286_vm3, %v185_v1, %v4291_v62  ;;  %v239_v16 = vsel %vm5286_vm3, %v183_v39, %v4292_v60 }
 0x15d   :  { %v4305_v63 = vpop.permute.xlu1 %4304 }
 0x15e   :  { %v4307_v2 = vunpack.i.h.bf16 %v4305_v63  ;;  %v4306_v3 = vunpack.i.l.bf16 %v4305_v63  ;;  %v4295_v4 = vpop.permute.xlu0 %4294 }
 0x15f   :  { %v4297_v8 = vunpack.i.h.bf16 %v4295_v4  ;;  %v4296_v10 = vunpack.i.l.bf16 %v4295_v4 }
 0x160   :  { %v245_v17 = vsel %vm5291_vm14, %v240_v6, %v4306_v3  ;;  %v246_v9 = vsel %vm5291_vm14, %v241_v7, %v4307_v2 }
 0x161   :  { %v243_v14 = vsel %vm5291_vm14, %v238_v15, %v4296_v10  ;;  %v244_v18 = vsel %vm5291_vm14, %v239_v16, %v4297_v8  ;;  %v248_v13 = vpack.c.bf16 %v246_v9, %v245_v17 }
 0x162   :  { %v247_v19 = vpack.c.bf16 %v244_v18, %v243_v14 }
 0x164   :  { %3566 = vmatmul.msk.bf16.vlgmr.msra.gmra.mxu1 %vm5284_vm15, %v247_v19  ;;  %v349_v19 = vperm.slane %v252_v21, 2 }
 0x174   :  { %3567 = vmatmul.msk.bf16.gmra.mxu1 %vm5284_vm15, %v248_v13 }
 0x1e1   :  { %v283_v11 = vpop.f32.mrf.mxu1 }
 0x1e2   :  { %v4654_v25 = vadd.f32 %v283_v11, %v253_v22 }
 0x1e4   :  { %v307_v28 = vmul.f32 %v4654_v25, %v4654_v25  ;;  %v293_v32 = vsel %vm5286_vm3, %v4654_v25, 0.0 }
 0x1e6   :  { %v311_v38 = vsel %vm5286_vm3, %v307_v28, 0.0 }
 0x1e9   :  { %v285_v20 = vpop.f32.mrf.mxu1 }
 0x1ea   :  { %v4652_v23 = vadd.f32 %v285_v20, %v253_v22  ;;  %v4671_v20 = vand.u32 127, %v163_v58 }
 0x1ec   :  { %v308_v27 = vmul.f32 %v4652_v23, %v4652_v23  ;;  %v294_v29 = vsel %vm5286_vm3, %v4652_v23, 0.0 }
 0x1ed   :  { %v295_v36 = vadd.f32 %v294_v29, %v293_v32 }
 0x1ee   :  { %v312_v34 = vsel %vm5286_vm3, %v308_v27, 0.0 }
 0x1ef   :  { %v313_v41 = vadd.f32 %v312_v34, %v311_v38 }
 0x1f1   :  { %v288_v24 = vpop.f32.mrf.mxu1 }
 0x1f2   :  { %v289_v26 = vadd.f32 %v288_v24, %v253_v22 }
 0x1f4   :  { %v309_v30 = vmul.f32 %v289_v26, %v289_v26  ;;  %v296_v35 = vsel %vm5286_vm3, %v289_v26, 0.0 }
 0x1f5   :  { %v297_v42 = vadd.f32 %v296_v35, %v295_v36 }
 0x1f6   :  { %v314_v39 = vsel %vm5286_vm3, %v309_v30, 0.0  ;;  %v361_v30 = vmul.u32 2, %v4586_v12 }
 0x1f7   :  { %v315_v45 = vadd.f32 %v314_v39, %v313_v41 }
 0x1f9   :  { %v290_v37 = vpop.f32.mrf.mxu1 }
 0x1fa   :  { %v291_v40 = vadd.f32 %v290_v37, %v253_v22  ;;  %v360_v22 = vmul.u32 2, %v4578_v61 }
 0x1fc   :  { %v298_v43 = vsel %vm5286_vm3, %v291_v40, 0.0  ;;  %v310_v44 = vmul.f32 %v291_v40, %v291_v40  ;;  %vm362_vm6 = vcmp.eq.s32.totalorder %v4671_v20, %v360_v22 }
 0x1fd   :  { %v299_v46 = vadd.f32 %v298_v43, %v297_v42 }
 0x1fe   :  { %v316_v47 = vsel %vm5286_vm3, %v310_v44, 0.0 }
 0x1ff   :  { %v300_v48 = vrot.slane %v299_v46, 4  ;;  %v317_v49 = vadd.f32 %v316_v47, %v315_v45 }
 0x201   :  { %v301_v51 = vadd.f32 %v300_v48, %v299_v46  ;;  %v318_v52 = vrot.slane %v317_v49, 4 }
 0x203   :  { %v302_v53 = vrot.slane %v301_v51, 2  ;;  %v319_v54 = vadd.f32 %v318_v52, %v317_v49 }
 0x205   :  { %v303_v56 = vadd.f32 %v302_v53, %v301_v51  ;;  %v320_v57 = vrot.slane %v319_v54, 2 }
 0x207   :  { %v304_v60 = vrot.slane %v303_v56, 1  ;;  %v321_v62 = vadd.f32 %v320_v57, %v319_v54 }
 0x209   :  { %v305_v63 = vadd.f32 %v304_v60, %v303_v56  ;;  %v322_v0 = vrot.slane %v321_v62, 1 }
 0x20b   :  { %v306_v1 = vmul.f32 0.03125, %v305_v63  ;;  %v323_v2 = vadd.f32 %v322_v0, %v321_v62 }
 0x20d   :  { %v324_v3 = vmul.f32 0.03125, %v323_v2  ;;  %v325_v4 = vmul.f32 %v306_v1, %v306_v1  ;;  %v342_v11 = vsub.f32 %v291_v40, %v306_v1  ;;  %v341_v27 = vsub.f32 %v289_v26, %v306_v1 }
 0x20e   :  { %v339_v28 = vsub.f32 %v4654_v25, %v306_v1  ;;  %v340_v29 = vsub.f32 %v4652_v23, %v306_v1  ;;  %v4520_v40 = vmov 0.0  }
 0x20f   :  { %v326_v6 = vsub.f32 %v324_v3, %v325_v4  ;;  %v4688_v41 = vsel %vm362_vm6, 1.0, %v4520_v40 }
 0x211   :  { %v327_v7 = vmax.f32 %v326_v6, 0.0 }
 0x213   :  { %v328_v8 = vadd.f32 1e-05, %v327_v7 }
 0x215   :  { %4426 = vrsqrt.f32 %v328_v8  ;;  %vm335_vm4 = vweird.f32 %v328_v8 }
 0x21b   :  { %v4427_v10 = vpop.eup %4426 }
 0x21c   :  { %v330_v15 = vmul.f32 %v4427_v10, %v328_v8  ;;  %vm336_vm2 = vweird.f32 %v4427_v10 }
 0x21d   :  { %vm337_vm5 = vmor %vm335_vm4, %vm336_vm2  ;;  %vm363_vm2 = vcmp.eq.s32.totalorder %v4671_v20, %v361_v30  ;;  %vm5294_vm4 = vcmask 261120  }
 0x21e   :  { %v331_v16 = vmul.f32 %v4427_v10, %v330_v15  ;;  %v365_v43 = vsel %vm363_vm2, 1.0, %v4520_v40  ;;  %v367_v15 = vadd.s32 1, %v360_v22 }
 0x21f   :  { %v366_v2 = vpack.c.bf16 %v365_v43, %v4688_v41 }
 0x220   :  { %v332_v17 = vmul.f32 0.5, %v331_v16  ;;  %v368_v16 = vadd.s32 1, %v361_v30 }
 0x222   :  { %v333_v9 = vsub.f32 1.5, %v332_v17  ;;  %vm370_vm6 = vcmp.eq.s32.totalorder %v4671_v20, %v368_v16 }
 0x224   :  { %v334_v14 = vmul.f32 %v4427_v10, %v333_v9  ;;  %v372_v9 = vsel %vm370_vm6, 1.0, %v4520_v40 }
 0x226   :  { %v338_v18 = vsel %vm337_vm5, %v4427_v10, %v334_v14  ;;  %vm369_vm5 = vcmp.eq.s32.totalorder %v4671_v20, %v367_v15 }
 0x227   :  { %v343_v13 = vmul.f32 %v338_v18, %v252_v21  ;;  %v4744_v17 = vsel %vm369_vm5, 1.0, %v4520_v40 }
 0x228   :  { %v373_v14 = vpack.c.bf16 %v372_v9, %v4744_v17 }
 0x229   :  { %v344_v24 = vperm.slane %v343_v13, 1 }
 0x22b   :  { %v348_v32 = vmul.f32 %v344_v24, %v342_v11  ;;  %v347_v34 = vmul.f32 %v344_v24, %v341_v27  ;;  %v345_v35 = vmul.f32 %v344_v24, %v339_v28  ;;  %v346_v36 = vmul.f32 %v344_v24, %v340_v29 }
 0x22c   :  { %v413_v24 = vand.u32 7, %v4578_v61  ;;  %v414_v27 = vand.u32 7, %v4586_v12 }
 0x22d   :  { %v352_v21 = vadd.f32 %v349_v19, %v347_v34  ;;  %v353_v37 = vadd.f32 %v349_v19, %v348_v32  ;;  %v350_v58 = vadd.f32 %v349_v19, %v345_v35  ;;  %v351_v38 = vadd.f32 %v349_v19, %v346_v36  ;;  %v3183_v36 = vld [vmem:[#allocation2 + $0x4f8] sm:$0xf] }
 0x22e   :  { %vm4751_vm2 = vcmp.eq.s32.totalorder %v413_v24, 7  ;;  %vm4755_vm5 = vcmp.eq.s32.totalorder %v414_v27, 7  ;;  %vm4774_vm6 = vcmp.eq.s32.totalorder %v413_v24, 0  ;;  %vm4778_vm0 = vcmp.eq.s32.totalorder %v414_v27, 0 }
 0x22f   :  { %v4679_v39 = vmax.f32 %v352_v21, 0.0  ;;  %v4681_v26 = vmax.f32 %v353_v37, 0.0  ;;  %v4683_v25 = vmax.f32 %v350_v58, 0.0  ;;  %v4685_v23 = vmax.f32 %v351_v38, 0.0 }
 0x231   :  { %v375_v42 = vpack.c.bf16 %v4681_v26, %v4679_v39  ;;  %v4363_v44 = vpack.i.bf16 %v4685_v23, %v4683_v25  ;;  %v3115_v45 = vrot.slane %v4683_v25, 7  ;;  %v3116_v46 = vrot.slane %v4685_v23, 7 }
 0x232   :  { %v3118_v47 = vrot.slane %v4681_v26, 7  ;;  %v3127_v48 = vrot.slane %v4683_v25, 1  ;;  %v3128_v49 = vrot.slane %v4685_v23, 1  ;;  %v3129_v51 = vrot.slane %v4679_v39, 1 }
 0x233   :  { %386 = vmatpush.bf16.msra.mxu3 %v375_v42  ;;  %v4383_v52 = vpack.i.bf16 %v4681_v26, %v4679_v39  ;;  %v3117_v53 = vrot.slane %v4679_v39, 7  ;;  %v3130_v54 = vrot.slane %v4681_v26, 1  ;;  %v4707_v56 = vsel %vm5288_vm8, %v3115_v45, %v3116_v46 }
 0x234   :  { %v4711_v57 = vsel %vm5288_vm8, %v3118_v47, %v3115_v45  ;;  %v3133_v60 = vsel %vm5289_vm7, %v3127_v48, %v3128_v49  ;;  %v374_v62 = vpack.c.bf16 %v4685_v23, %v4683_v25  ;;  %v3132_v63 = vsel %vm5289_vm7, %v3128_v49, %v3129_v51 }
 0x235   :  { %v4721_v0 = vsel %vm5288_vm8, %v3117_v53, %v3118_v47  ;;  %v4725_v1 = vsel %vm5288_vm8, %v3116_v46, %v3117_v53  ;;  %v3136_v3 = vsel %vm4600_vm10, 0.0, %v3132_v63  ;;  %v3131_v4 = vsel %vm5289_vm7, %v3129_v51, %v3130_v54  ;;  %v454_v47 = vld [vmem:[#allocation2 + $0x20] sm:$0xf]  ;;  %v4146_v53 = vld [vmem:[#allocation2 + $0x18] sm:$0xff] }
 0x236   :  { %v3134_v6 = vsel %vm5289_vm7, %v3130_v54, %v3127_v48  ;;  %v4734_v7 = vpack.i.bf16 %v3136_v3, %v3133_v60  ;;  %v462_v48 = vunpack.c.l.b16 %v454_v47  ;;  %v3123_v60 = vsel %vm4634_vm13, 0.0, %v4711_v57 }
 0x237   :  { %387 = vmatpush.bf16.msra.mxu3 %v374_v62  ;;  %v3138_v8 = vsel %vm4593_vm9, 0.0, %v3134_v6 }
 0x238   :  { %v4738_v10 = vpack.i.bf16 %v3138_v8, %v3131_v4  ;;  %v464_v49 = vpack.c.b16 %v462_v48, %v462_v48 }
 0x23a   :  { %3568 = vmatmul.msk.bf16.vlgmr.msra.gmra.mxu3 %vm5294_vm4, %v366_v2  ;;  %v470_v51 = vsel %vm5287_vm11, %v464_v49, 0 }
 0x23b   :  { %403 = vmatpush.bf16.msrb.mxu3 %v375_v42  ;;  %478 = vmatpush.bf16.msra.mxu2 %v470_v51 }
 0x23f   :  { %404 = vmatpush.bf16.msrb.mxu3 %v374_v62  ;;  %479 = vmatpush.bf16.msra.mxu2 %v4146_v53 }
 0x24a   :  { %3569 = vmatmul.msk.bf16.vlgmr.msrb.gmra.mxu3 %vm5294_vm4, %v373_v14 }
 0x2bd   :  { %v389_v18 = vpop.f32.mrf.mxu3 }
 0x2c5   :  { %v391_v13 = vpop.f32.mrf.mxu3 }
 0x2cd   :  { %v406_v19 = vpop.f32.mrf.mxu3 }
 0x2ce   :  { %v411_v11 = vmax.f32 %v389_v18, %v406_v19  ;;  %v455_v19 = vld [vmem:[#allocation4 + $0x10] sm:$0xff] }
 0x2d0   :  { %v417_v29 = vrot.slane %v411_v11, 7  ;;  %v425_v30 = vrot.slane %v411_v11, 1 }
 0x2d5   :  { %v408_v22 = vpop.f32.mrf.mxu3 }
 0x2d6   :  { %v412_v28 = vmax.f32 %v391_v13, %v408_v22  ;;  %v456_v22 = vperm.slane %v455_v19, 0 }
 0x2d8   :  { %v418_v32 = vrot.slane %v412_v28, 7  ;;  %v426_v34 = vrot.slane %v412_v28, 1  ;;  %v4308_v35 = vpack.i.bf16 %v412_v28, %v411_v11 }
 0x2da   :  { %4309 = vrot.lane.b32.xlu2 %v4308_v35, %s4517_s1  ;;  %v427_v37 = vsel %vm5289_vm7, %v425_v30, %v426_v34  ;;  %v428_v58 = vsel %vm5289_vm7, %v426_v34, %v425_v30  ;;  %v419_v38 = vsel %vm5288_vm8, %v417_v29, %v418_v32  ;;  %v420_v42 = vsel %vm5288_vm8, %v418_v32, %v417_v29 }
 0x2db   :  { %v429_v43 = vsel %vm4751_vm2, 0.0, %v427_v37  ;;  %v430_v45 = vsel %vm4755_vm5, 0.0, %v428_v58  ;;  %v421_v4 = vsel %vm4774_vm6, 0.0, %v420_v42  ;;  %v422_v6 = vsel %vm4778_vm0, 0.0, %v419_v38 }
 0x2dc   :  { %v4313_v46 = vpack.i.bf16 %v430_v45, %v429_v43 }
 0x2e2   :  { %4314 = vrot.lane.b32.xlu2 %v4313_v46, %s4519_s0 }
 0x334   :  { %v4310_v54 = vpop.permute.xlu2 %4309 }
 0x335   :  { %v4312_v63 = vunpack.i.h.bf16 %v4310_v54  ;;  %v4311_v2 = vunpack.i.l.bf16 %v4310_v54 }
 0x337   :  { %v447_v16 = vsel %vm5286_vm3, %v421_v4, %v4311_v2  ;;  %v448_v9 = vsel %vm5286_vm3, %v422_v6, %v4312_v63 }
 0x33c   :  { %v4315_v3 = vpop.permute.xlu2 %4314 }
 0x33d   :  { %v4317_v8 = vunpack.i.h.bf16 %v4315_v3  ;;  %v4316_v15 = vunpack.i.l.bf16 %v4315_v3 }
 0x33f   :  { %v449_v14 = vsel %vm5291_vm14, %v447_v16, %v4316_v15  ;;  %v450_v18 = vsel %vm5291_vm14, %v448_v9, %v4317_v8  ;;  %v4149_v9 = vld [vmem:[#allocation2 + $0x38] sm:$0xff] }
 0x340   :  { %v451_v13 = vpack.c.bf16 %v450_v18, %v449_v14  ;;  %601 = vmatpush.bf16.msra.mxu3 %v4149_v9 }
 0x342   :  { %3574 = vmatmul.msk.bf16.vlgmr.msra.gmra.mxu2 %vm5284_vm15, %v451_v13 }
 0x3c5   :  { %v481_v11 = vpop.f32.mrf.mxu2 }
 0x3c6   :  { %v482_v24 = vadd.f32 %v481_v11, %v456_v22 }
 0x3c8   :  { %v496_v28 = vmul.f32 %v482_v24, %v482_v24  ;;  %v486_v30 = vsel %vm5291_vm14, %v482_v24, 0.0 }
 0x3ca   :  { %v498_v37 = vsel %vm5291_vm14, %v496_v28, 0.0 }
 0x3cd   :  { %v483_v27 = vpop.f32.mrf.mxu2 }
 0x3ce   :  { %v484_v29 = vadd.f32 %v483_v27, %v456_v22 }
 0x3d0   :  { %v487_v32 = vsel %vm5291_vm14, %v484_v29, 0.0  ;;  %v497_v34 = vmul.f32 %v484_v29, %v484_v29 }
 0x3d1   :  { %v488_v35 = vadd.f32 %v487_v32, %v486_v30  ;;  %v528_v32 = vperm.slane %v455_v19, 2 }
 0x3d2   :  { %v499_v58 = vsel %vm5291_vm14, %v497_v34, 0.0 }
 0x3d3   :  { %v489_v38 = vrot.slane %v488_v35, 4  ;;  %v500_v42 = vadd.f32 %v499_v58, %v498_v37 }
 0x3d5   :  { %v490_v43 = vadd.f32 %v489_v38, %v488_v35  ;;  %v501_v45 = vrot.slane %v500_v42, 4 }
 0x3d7   :  { %v491_v46 = vrot.slane %v490_v43, 2  ;;  %v502_v47 = vadd.f32 %v501_v45, %v500_v42 }
 0x3d9   :  { %v492_v48 = vadd.f32 %v491_v46, %v490_v43  ;;  %v503_v49 = vrot.slane %v502_v47, 2 }
 0x3db   :  { %v493_v51 = vrot.slane %v492_v48, 1  ;;  %v504_v53 = vadd.f32 %v503_v49, %v502_v47 }
 0x3dd   :  { %v494_v54 = vadd.f32 %v493_v51, %v492_v48  ;;  %v505_v63 = vrot.slane %v504_v53, 1 }
 0x3df   :  { %v495_v2 = vmul.f32 0.0625, %v494_v54  ;;  %v506_v3 = vadd.f32 %v505_v63, %v504_v53 }
 0x3e1   :  { %v507_v4 = vmul.f32 0.0625, %v506_v3  ;;  %v508_v6 = vmul.f32 %v495_v2, %v495_v2  ;;  %v523_v34 = vsub.f32 %v484_v29, %v495_v2  ;;  %v522_v37 = vsub.f32 %v482_v24, %v495_v2 }
 0x3e3   :  { %v509_v8 = vsub.f32 %v507_v4, %v508_v6  ;;  %v4148_v4 = vld [vmem:[#allocation2 + $0x30] sm:$0xff]  ;;  %v4147_v6 = vld [vmem:[#allocation2 + $0x28] sm:$0xff] }
 0x3e4   :  { %602 = vmatpush.bf16.msra.mxu3 %v4148_v4 }
 0x3e5   :  { %v510_v15 = vmax.f32 %v509_v8, 0.0 }
 0x3e7   :  { %v511_v16 = vadd.f32 1e-05, %v510_v15 }
 0x3e8   :  { %603 = vmatpush.bf16.msra.mxu3 %v4147_v6 }
 0x3e9   :  { %4428 = vrsqrt.f32 %v511_v16  ;;  %vm518_vm1 = vweird.f32 %v511_v16 }
 0x3ef   :  { %v4429_v14 = vpop.eup %4428 }
 0x3f0   :  { %v513_v18 = vmul.f32 %v4429_v14, %v511_v16  ;;  %vm519_vm15 = vweird.f32 %v4429_v14 }
 0x3f1   :  { %vm520_vm3 = vmor %vm518_vm1, %vm519_vm15  ;;  %vm5290_vm1 = vcmask 392192  }
 0x3f2   :  { %v514_v13 = vmul.f32 %v4429_v14, %v513_v18 }
 0x3f4   :  { %v515_v11 = vmul.f32 0.5, %v514_v13 }
 0x3f6   :  { %v516_v22 = vsub.f32 1.5, %v515_v11 }
 0x3f8   :  { %v517_v27 = vmul.f32 %v4429_v14, %v516_v22 }
 0x3fa   :  { %v521_v28 = vsel %vm520_vm3, %v4429_v14, %v517_v27 }
 0x3fb   :  { %v524_v30 = vmul.f32 %v521_v28, %v455_v19 }
 0x3fd   :  { %v525_v35 = vperm.slane %v524_v30, 1 }
 0x3ff   :  { %v527_v58 = vmul.f32 %v525_v35, %v523_v34  ;;  %v526_v38 = vmul.f32 %v525_v35, %v522_v37  ;;  %v572_v34 = vld [vmem:[#allocation4 + $0x18] sm:$0xff] }
 0x400   :  { %v573_v37 = vperm.slane %v572_v34, 0 }
 0x401   :  { %v529_v42 = vadd.f32 %v528_v32, %v526_v38  ;;  %v530_v43 = vadd.f32 %v528_v32, %v527_v58 }
 0x403   :  { %v531_v45 = vmax.f32 %v529_v42, 0.0  ;;  %v532_v46 = vmax.f32 %v530_v43, 0.0 }
 0x405   :  { %v534_v47 = vrot.slane %v532_v46, 7  ;;  %v4318_v48 = vpack.i.bf16 %v532_v46, %v531_v45  ;;  %v533_v49 = vrot.slane %v531_v45, 7  ;;  %v539_v51 = vrot.slane %v531_v45, 1 }
 0x406   :  { %v540_v53 = vrot.slane %v532_v46, 1 }
 0x407   :  { %4319 = vrot.lane.b32.xlu0 %v4318_v48, %s4519_s0  ;;  %v535_v54 = vsel %vm5288_vm8, %v533_v49, %v534_v47  ;;  %v536_v19 = vsel %vm5288_vm8, %v534_v47, %v533_v49 }
 0x408   :  { %v541_v24 = vsel %vm5289_vm7, %v539_v51, %v540_v53  ;;  %v542_v29 = vsel %vm5289_vm7, %v540_v53, %v539_v51  ;;  %v537_v14 = vsel %vm4774_vm6, 0.0, %v536_v19  ;;  %v538_v18 = vsel %vm4778_vm0, 0.0, %v535_v54 }
 0x409   :  { %v543_v63 = vsel %vm4751_vm2, 0.0, %v541_v24  ;;  %v544_v2 = vsel %vm4755_vm5, 0.0, %v542_v29 }
 0x40a   :  { %v4323_v3 = vpack.i.bf16 %v544_v2, %v543_v63 }
 0x40c   :  { %4324 = vrot.lane.b32.xlu1 %v4323_v3, %s4521_s28 }
 0x479   :  { %v4320_v8 = vpop.permute.xlu0 %4319 }
 0x47a   :  { %v4322_v15 = vunpack.i.h.bf16 %v4320_v8  ;;  %v4321_v16 = vunpack.i.l.bf16 %v4320_v8 }
 0x47c   :  { %v561_v22 = vsel %vm5291_vm14, %v537_v14, %v4321_v16  ;;  %v562_v27 = vsel %vm5291_vm14, %v538_v18, %v4322_v15 }
 0x47e   :  { %v4325_v9 = vpop.permute.xlu1 %4324 }
 0x47f   :  { %v4327_v13 = vunpack.i.h.bf16 %v4325_v9  ;;  %v4326_v11 = vunpack.i.l.bf16 %v4325_v9 }
 0x481   :  { %v563_v28 = vsel %vm5294_vm4, %v561_v22, %v4326_v11  ;;  %v564_v30 = vsel %vm5294_vm4, %v562_v27, %v4327_v13 }
 0x482   :  { %v565_v32 = vpack.c.bf16 %v564_v30, %v563_v28 }
 0x484   :  { %3587 = vmatmul.msk.bf16.vlgmr.msra.gmra.mxu3 %vm5290_vm1, %v565_v32 }
 0x507   :  { %v605_v35 = vpop.f32.mrf.mxu3 }
 0x508   :  { %v606_v58 = vadd.f32 %v605_v35, %v573_v37 }
 0x50a   :  { %v620_v42 = vmul.f32 %v606_v58, %v606_v58  ;;  %v610_v45 = vsel %vm5291_vm14, %v606_v58, 0.0 }
 0x50c   :  { %v622_v49 = vsel %vm5291_vm14, %v620_v42, 0.0 }
 0x50f   :  { %v607_v38 = vpop.f32.mrf.mxu3 }
 0x510   :  { %v608_v43 = vadd.f32 %v607_v38, %v573_v37 }
 0x512   :  { %v611_v46 = vsel %vm5291_vm14, %v608_v43, 0.0  ;;  %v621_v47 = vmul.f32 %v608_v43, %v608_v43 }
 0x513   :  { %v612_v48 = vadd.f32 %v611_v46, %v610_v45  ;;  %v652_v45 = vperm.slane %v572_v34, 2 }
 0x514   :  { %v623_v51 = vsel %vm5291_vm14, %v621_v47, 0.0 }
 0x515   :  { %v613_v53 = vrot.slane %v612_v48, 4  ;;  %v624_v54 = vadd.f32 %v623_v51, %v622_v49 }
 0x517   :  { %v614_v19 = vadd.f32 %v613_v53, %v612_v48  ;;  %v625_v24 = vrot.slane %v624_v54, 4 }
 0x519   :  { %v615_v29 = vrot.slane %v614_v19, 2  ;;  %v626_v63 = vadd.f32 %v625_v24, %v624_v54 }
 0x51b   :  { %v616_v2 = vadd.f32 %v615_v29, %v614_v19  ;;  %v627_v3 = vrot.slane %v626_v63, 2 }
 0x51d   :  { %v617_v4 = vrot.slane %v616_v2, 1  ;;  %v628_v6 = vadd.f32 %v627_v3, %v626_v63 }
 0x51f   :  { %v618_v8 = vadd.f32 %v617_v4, %v616_v2  ;;  %v629_v15 = vrot.slane %v628_v6, 1 }
 0x521   :  { %v619_v16 = vmul.f32 0.0625, %v618_v8  ;;  %v630_v9 = vadd.f32 %v629_v15, %v628_v6 }
 0x523   :  { %v631_v14 = vmul.f32 0.0625, %v630_v9  ;;  %v632_v18 = vmul.f32 %v619_v16, %v619_v16  ;;  %v646_v46 = vsub.f32 %v606_v58, %v619_v16  ;;  %v647_v47 = vsub.f32 %v608_v43, %v619_v16 }
 0x524   :  { %v4834_v58 = vpack.c.bf16 %v4688_v41, %v4688_v41  ;;  %v4838_v43 = vpack.c.bf16 %v4744_v17, %v4744_v17 }
 0x525   :  { %v633_v13 = vsub.f32 %v631_v14, %v632_v18  ;;  %v693_v14 = vand.u32 3, %v4578_v61 }
 0x527   :  { %v634_v11 = vmax.f32 %v633_v13, 0.0 }
 0x529   :  { %v635_v22 = vadd.f32 1e-05, %v634_v11 }
 0x52b   :  { %4430 = vrsqrt.f32 %v635_v22  ;;  %vm642_vm15 = vweird.f32 %v635_v22 }
 0x531   :  { %v4431_v27 = vpop.eup %4430 }
 0x532   :  { %v637_v28 = vmul.f32 %v4431_v27, %v635_v22  ;;  %vm643_vm3 = vweird.f32 %v4431_v27  ;;  %v4268_v22 = vld [vmem:[#allocation2 + $0x4b0] sm:$0xff] }
 0x533   :  { %vm644_vm11 = vmor %vm642_vm15, %vm643_vm3  ;;  %vm4873_vm3 = vcmp.eq.s32.totalorder %v693_v14, 0 }
 0x534   :  { %v638_v30 = vmul.f32 %v4431_v27, %v637_v28 }
 0x536   :  { %v639_v32 = vmul.f32 0.5, %v638_v30 }
 0x538   :  { %v640_v35 = vsub.f32 1.5, %v639_v32 }
 0x53a   :  { %v641_v37 = vmul.f32 %v4431_v27, %v640_v35  ;;  %v4152_v35 = vld [vmem:[#allocation2 + $0x50] sm:$0xff] }
 0x53b   :  { %745 = vmatpush.bf16.msrb.mxu2 %v4152_v35 }
 0x53c   :  { %v645_v38 = vsel %vm644_vm11, %v4431_v27, %v641_v37  ;;  %vm4865_vm11 = vcmp.eq.s32.totalorder %v693_v14, 3  ;;  %v4151_v37 = vld [vmem:[#allocation2 + $0x48] sm:$0xff] }
 0x53d   :  { %v648_v42 = vmul.f32 %v645_v38, %v572_v34  ;;  %v4150_v38 = vld [vmem:[#allocation2 + $0x40] sm:$0xff] }
 0x53f   :  { %v649_v48 = vperm.slane %v648_v42, 1  ;;  %746 = vmatpush.bf16.msrb.mxu2 %v4151_v37 }
 0x541   :  { %v650_v49 = vmul.f32 %v649_v48, %v646_v46  ;;  %v651_v51 = vmul.f32 %v649_v48, %v647_v47 }
 0x543   :  { %v654_v53 = vadd.f32 %v652_v45, %v651_v51  ;;  %v653_v54 = vadd.f32 %v652_v45, %v650_v49  ;;  %747 = vmatpush.bf16.msrb.mxu2 %v4150_v38 }
 0x545   :  { %v4822_v19 = vmax.f32 %v653_v54, 0.0  ;;  %v4824_v24 = vmax.f32 %v654_v53, 0.0  ;;  %v717_v54 = vld [vmem:[#allocation4 + $0x20] sm:$0xff] }
 0x547   :  { %v659_v29 = vpack.c.bf16 %v4824_v24, %v4822_v19  ;;  %v4333_v63 = vpack.i.bf16 %v4824_v24, %v4822_v19  ;;  %v2710_v2 = vrot.slane %v4822_v19, 7  ;;  %v2711_v34 = vrot.slane %v4824_v24, 7 }
 0x548   :  { %v2716_v3 = vrot.slane %v4822_v19, 1  ;;  %v2717_v4 = vrot.slane %v4824_v24, 1 }
 0x549   :  { %670 = vmatpush.bf16.msrb.mxu0 %v659_v29  ;;  %686 = vmatpush.bf16.msrb.mxu1 %v659_v29  ;;  %v4844_v6 = vsel %vm5288_vm8, %v2710_v2, %v2711_v34  ;;  %v4848_v8 = vsel %vm5288_vm8, %v2711_v34, %v2710_v2  ;;  %v718_v29 = vperm.slane %v717_v54, 0 }
 0x54a   :  { %v2718_v41 = vsel %vm5289_vm7, %v2716_v3, %v2717_v4  ;;  %v2719_v17 = vsel %vm5289_vm7, %v2717_v4, %v2716_v3  ;;  %v2715_v45 = vsel %vm4778_vm0, 0.0, %v4844_v6 }
 0x54b   :  { %v2720_v15 = vsel %vm4751_vm2, 0.0, %v2718_v41  ;;  %v2721_v16 = vsel %vm4755_vm5, 0.0, %v2719_v17 }
 0x54c   :  { %3588 = vmatmul.msk.bf16.vlgmr.msrb.gmra.mxu0 %vm5291_vm14, %v4834_v58  ;;  %3589 = vmatmul.msk.bf16.vlgmr.msrb.gmra.mxu1 %vm5291_vm14, %v4838_v43  ;;  %v4862_v9 = vpack.i.bf16 %v2721_v16, %v2720_v15 }
 0x5c9   :  { %v672_v18 = vpop.f32.mrf.mxu0  ;;  %v688_v13 = vpop.f32.mrf.mxu1 }
 0x5ca   :  { %v692_v11 = vmax.f32 %v672_v18, %v688_v13 }
 0x5cc   :  { %701 = vrot.lane.b32.xlu2 %v692_v11, %s4519_s0  ;;  %v698_v27 = vrot.slane %v692_v11, 1  ;;  %v695_v42 = vrot.slane %v692_v11, 7 }
 0x5ce   :  { %v699_v28 = vsel %vm4865_vm11, 0.0, %v698_v27  ;;  %v696_v47 = vsel %vm4873_vm3, 0.0, %v695_v42 }
 0x5cf   :  { %705 = vrot.lane.b32.xlu0 %v699_v28, %s4521_s28 }
 0x5d1   :  { %v674_v30 = vpop.f32.mrf.mxu0  ;;  %v690_v32 = vpop.f32.mrf.mxu1 }
 0x626   :  { %v702_v46 = vpop.permute.xlu2 %701 }
 0x627   :  { %v708_v48 = vsel %vm5291_vm14, %v696_v47, %v702_v46 }
 0x641   :  { %v706_v49 = vpop.permute.xlu0 %705 }
 0x642   :  { %v709_v51 = vsel %vm5294_vm4, %v708_v48, %v706_v49 }
 0x643   :  { %v710_v53 = vpack.c.bf16 %v709_v51, %v709_v51 }
 0x645   :  { %3602 = vmatmul.msk.bf16.vlgmr.msrb.gmra.mxu2 %vm5290_vm1, %v710_v53 }
 0x6c8   :  { %v749_v2 = vpop.f32.mrf.mxu2 }
 0x6c9   :  { %v750_v34 = vadd.f32 %v749_v2, %v718_v29 }
 0x6cb   :  { %v753_v3 = vsel %vm5294_vm4, %v750_v34, 0.0  ;;  %v761_v4 = vmul.f32 %v750_v34, %v750_v34 }
 0x6cc   :  { %v754_v41 = vrot.slane %v753_v3, 4 }
 0x6cd   :  { %v762_v17 = vsel %vm5294_vm4, %v761_v4, 0.0 }
 0x6ce   :  { %v755_v15 = vadd.f32 %v754_v41, %v753_v3  ;;  %v763_v16 = vrot.slane %v762_v17, 4 }
 0x6d0   :  { %v756_v14 = vrot.slane %v755_v15, 2  ;;  %v764_v18 = vadd.f32 %v763_v16, %v762_v17  ;;  %v751_v13 = vpop.f32.mrf.mxu2 }
 0x6d2   :  { %v757_v11 = vadd.f32 %v756_v14, %v755_v15  ;;  %v765_v27 = vrot.slane %v764_v18, 2  ;;  %v788_v14 = vperm.slane %v717_v54, 2 }
 0x6d4   :  { %v758_v28 = vrot.slane %v757_v11, 1  ;;  %v766_v30 = vadd.f32 %v765_v27, %v764_v18 }
 0x6d6   :  { %v759_v32 = vadd.f32 %v758_v28, %v757_v11  ;;  %v767_v35 = vrot.slane %v766_v30, 1 }
 0x6d8   :  { %v760_v37 = vmul.f32 0.125, %v759_v32  ;;  %v768_v38 = vadd.f32 %v767_v35, %v766_v30  ;;  %v4158_v30 = vld [vmem:[#allocation2 + $0x80] sm:$0xff]  ;;  %v4157_v32 = vld [vmem:[#allocation2 + $0x78] sm:$0xff]  ;;  %v4156_v35 = vld [vmem:[#allocation2 + $0x70] sm:$0xff] }
 0x6d9   :  { %863 = vmatpush.bf16.msrb.mxu3 %v4158_v30 }
 0x6da   :  { %v769_v42 = vmul.f32 0.125, %v768_v38  ;;  %v770_v46 = vmul.f32 %v760_v37, %v760_v37  ;;  %v784_v15 = vsub.f32 %v750_v34, %v760_v37  ;;  %v4155_v34 = vld [vmem:[#allocation2 + $0x68] sm:$0xff]  ;;  %v4153_v37 = vld [vmem:[#allocation2 + $0x58] sm:$0xff] }
 0x6dc   :  { %v771_v47 = vsub.f32 %v769_v42, %v770_v46 }
 0x6dd   :  { %864 = vmatpush.bf16.msrb.mxu3 %v4157_v32 }
 0x6de   :  { %v772_v48 = vmax.f32 %v771_v47, 0.0 }
 0x6e0   :  { %v773_v49 = vadd.f32 1e-05, %v772_v48 }
 0x6e1   :  { %865 = vmatpush.bf16.msrb.mxu3 %v4156_v35 }
 0x6e2   :  { %4432 = vrsqrt.f32 %v773_v49  ;;  %vm780_vm8 = vweird.f32 %v773_v49 }
 0x6e5   :  { %866 = vmatpush.bf16.msrb.mxu3 %v4155_v34 }
 0x6e8   :  { %v4433_v51 = vpop.eup %4432 }
 0x6e9   :  { %v775_v53 = vmul.f32 %v4433_v51, %v773_v49  ;;  %vm781_vm15 = vweird.f32 %v4433_v51 }
 0x6ea   :  { %vm782_vm7 = vmor %vm780_vm8, %vm781_vm15  ;;  %vm5292_vm8 = vcmask 785408  }
 0x6eb   :  { %v776_v29 = vmul.f32 %v4433_v51, %v775_v53  ;;  %v819_v53 = vld [vmem:[#allocation4 + $0x28] sm:$0xff] }
 0x6ed   :  { %v777_v2 = vmul.f32 0.5, %v776_v29  ;;  %v820_v29 = vperm.slane %v819_v53, 0 }
 0x6ef   :  { %v778_v3 = vsub.f32 1.5, %v777_v2 }
 0x6f1   :  { %v779_v4 = vmul.f32 %v4433_v51, %v778_v3 }
 0x6f3   :  { %v783_v41 = vsel %vm782_vm7, %v4433_v51, %v779_v4  ;;  %vm5293_vm7 = vcmask 523264  }
 0x6f4   :  { %v785_v17 = vmul.f32 %v783_v41, %v717_v54  ;;  %v4154_v54 = vld [vmem:[#allocation2 + $0x60] sm:$0xff] }
 0x6f5   :  { %867 = vmatpush.bf16.msrb.mxu3 %v4154_v54 }
 0x6f6   :  { %v786_v16 = vperm.slane %v785_v17, 1 }
 0x6f8   :  { %v787_v18 = vmul.f32 %v786_v16, %v784_v15 }
 0x6f9   :  { %868 = vmatpush.bf16.msrb.mxu3 %v4153_v37 }
 0x6fa   :  { %v789_v13 = vadd.f32 %v788_v14, %v787_v18 }
 0x6fc   :  { %v790_v11 = vmax.f32 %v789_v13, 0.0 }
 0x6fe   :  { %796 = vrot.lane.b32.xlu1 %v790_v11, %s4521_s28  ;;  %v793_v27 = vrot.slane %v790_v11, 1  ;;  %v791_v38 = vrot.slane %v790_v11, 7 }
 0x700   :  { %v794_v28 = vsel %vm4865_vm11, 0.0, %v793_v27  ;;  %v792_v46 = vsel %vm4873_vm3, 0.0, %v791_v38 }
 0x701   :  { %800 = vrot.lane.b32.xlu2 %v794_v28, %s4513_s20 }
 0x75b   :  { %v801_v47 = vpop.permute.xlu2 %800 }
 0x770   :  { %v797_v42 = vpop.permute.xlu1 %796 }
 0x771   :  { %v803_v48 = vsel %vm5294_vm4, %v792_v46, %v797_v42 }
 0x772   :  { %v805_v49 = vsel %vm5293_vm7, %v803_v48, %v801_v47  ;;  %vm5320_vm7 = vcmask 64512  }
 0x773   :  { %v806_v51 = vpack.c.bf16 %v805_v49, %v805_v49 }
 0x775   :  { %3627 = vmatmul.msk.bf16.vlgmr.msrb.gmra.mxu3 %vm5292_vm8, %v806_v51  ;;  %vm5319_vm8 = vcmask 1043456  }
 0x7f8   :  { %v870_v2 = vpop.f32.mrf.mxu3 }
 0x7f9   :  { %v871_v3 = vadd.f32 %v870_v2, %v820_v29 }
 0x7fb   :  { %v874_v4 = vsel %vm5294_vm4, %v871_v3, 0.0  ;;  %v882_v41 = vmul.f32 %v871_v3, %v871_v3 }
 0x7fc   :  { %v875_v17 = vrot.slane %v874_v4, 4 }
 0x7fd   :  { %v883_v15 = vsel %vm5294_vm4, %v882_v41, 0.0 }
 0x7fe   :  { %v876_v16 = vadd.f32 %v875_v17, %v874_v4  ;;  %v884_v14 = vrot.slane %v883_v15, 4 }
 0x800   :  { %v877_v18 = vrot.slane %v876_v16, 2  ;;  %v885_v13 = vadd.f32 %v884_v14, %v883_v15  ;;  %v872_v11 = vpop.f32.mrf.mxu3 }
 0x802   :  { %v878_v27 = vadd.f32 %v877_v18, %v876_v16  ;;  %v886_v28 = vrot.slane %v885_v13, 2  ;;  %v909_v18 = vperm.slane %v819_v53, 2 }
 0x804   :  { %v879_v30 = vrot.slane %v878_v27, 1  ;;  %v887_v32 = vadd.f32 %v886_v28, %v885_v13 }
 0x806   :  { %v880_v35 = vadd.f32 %v879_v30, %v878_v27  ;;  %v888_v34 = vrot.slane %v887_v32, 1 }
 0x808   :  { %v881_v54 = vmul.f32 0.125, %v880_v35  ;;  %v889_v37 = vadd.f32 %v888_v34, %v887_v32  ;;  %v954_v32 = vadd.s32 1, %v4578_v61 }
 0x80a   :  { %v890_v38 = vmul.f32 0.125, %v889_v37  ;;  %v891_v42 = vmul.f32 %v881_v54, %v881_v54  ;;  %v905_v16 = vsub.f32 %v871_v3, %v881_v54  ;;  %v947_v3 = vand.u32 1, %v4578_v61 }
 0x80b   :  { %vm955_vm4 = vcmp.eq.s32.totalorder %v4671_v20, %v954_v32  ;;  %v1020_v32 = vld [vmem:[#allocation4 + $0x30] sm:$0xff] }
 0x80c   :  { %v892_v46 = vsub.f32 %v890_v38, %v891_v42 }
 0x80e   :  { %v893_v47 = vmax.f32 %v892_v46, 0.0 }
 0x810   :  { %v894_v48 = vadd.f32 1e-05, %v893_v47 }
 0x812   :  { %4434 = vrsqrt.f32 %v894_v48  ;;  %vm901_vm1 = vweird.f32 %v894_v48 }
 0x818   :  { %v4435_v49 = vpop.eup %4434 }
 0x819   :  { %v896_v51 = vmul.f32 %v4435_v49, %v894_v48  ;;  %vm902_vm15 = vweird.f32 %v4435_v49 }
 0x81a   :  { %vm903_vm14 = vmor %vm901_vm1, %vm902_vm15  ;;  %vm950_vm15 = vcmp.gt.s32.totalorder %v947_v3, 0 }
 0x81b   :  { %v897_v29 = vmul.f32 %v4435_v49, %v896_v51 }
 0x81d   :  { %v898_v2 = vmul.f32 0.5, %v897_v29  ;;  %v4164_v29 = vld [vmem:[#allocation2 + $0xb0] sm:$0xff] }
 0x81f   :  { %v899_v4 = vsub.f32 1.5, %v898_v2  ;;  %v4163_v2 = vld [vmem:[#allocation2 + $0xa8] sm:$0xff] }
 0x821   :  { %v900_v41 = vmul.f32 %v4435_v49, %v899_v4  ;;  %v4162_v4 = vld [vmem:[#allocation2 + $0xa0] sm:$0xff] }
 0x823   :  { %v904_v17 = vsel %vm903_vm14, %v4435_v49, %v900_v41  ;;  %vm5321_vm14 = vmmov %vm5320_vm7  ;;  %v4161_v41 = vld [vmem:[#allocation2 + $0x98] sm:$0xff] }
 0x824   :  { %v906_v15 = vmul.f32 %v904_v17, %v819_v53  ;;  %v3630_v53 = vadd.s32 4294967295, %v4578_v61  ;;  %v4160_v17 = vld [vmem:[#allocation2 + $0x90] sm:$0xff] }
 0x826   :  { %v907_v14 = vperm.slane %v906_v15, 1  ;;  %vm949_vm1 = vcmp.eq.s32.totalorder %v4671_v20, %v3630_v53 }
 0x827   :  { %vm951_vm12 = vmand %vm949_vm1, %vm950_vm15  ;;  %vm1074_vm1 = vcmask 519168  }
 0x828   :  { %v908_v13 = vmul.f32 %v907_v14, %v905_v16  ;;  %v952_v37 = vsel %vm951_vm12, 1.0, %v4520_v40  ;;  %vm5324_vm12 = vcmask 523264  }
 0x829   :  { %v4913_v47 = vpack.c.bf16 %v952_v37, %v952_v37 }
 0x82a   :  { %v910_v11 = vadd.f32 %v909_v18, %v908_v13  ;;  %v4159_v13 = vld [vmem:[#allocation2 + $0x88] sm:$0xff] }
 0x82c   :  { %v4895_v27 = vmax.f32 %v910_v11, 0.0 }
 0x82e   :  { %v912_v28 = vpack.c.bf16 %v4895_v27, %v4895_v27 }
 0x830   :  { %v916_v30 = vsel %vm5319_vm8, %v912_v28, 0  ;;  %vm956_vm8 = vcmp.lt.s32.totalorder %v947_v3, 1 }
 0x831   :  { %925 = vmatpush.bf16.msra.mxu0 %v916_v30  ;;  %940 = vmatpush.bf16.msra.mxu1 %v916_v30  ;;  %vm957_vm9 = vmand %vm955_vm4, %vm956_vm8  ;;  %vm5325_vm4 = vcmask 785408  }
 0x832   :  { %v958_v38 = vsel %vm957_vm9, 1.0, %v4520_v40  ;;  %vm5323_vm9 = vcmask 261120  }
 0x833   :  { %v4915_v48 = vpack.c.bf16 %v958_v38, %v958_v38 }
 0x834   :  { %3628 = vmatmul.msk.bf16.vlgmr.msra.gmra.mxu0 %vm5320_vm7, %v4834_v58  ;;  %3629 = vmatmul.msk.bf16.vlgmr.msra.gmra.mxu1 %vm5321_vm14, %v4838_v43  ;;  %vm5322_vm7 = vcmask 1041408   ;;  %vm961_vm14 = vcmask 31744  }
 0x835   :  { %1063 = vmatpush.bf16.msrb.mxu0 %v4164_v29 }
 0x839   :  { %1064 = vmatpush.bf16.msrb.mxu0 %v4163_v2 }
 0x83d   :  { %1065 = vmatpush.bf16.msrb.mxu0 %v4162_v4 }
 0x841   :  { %1066 = vmatpush.bf16.msrb.mxu0 %v4161_v41 }
 0x845   :  { %1067 = vmatpush.bf16.msrb.mxu0 %v4160_v17 }
 0x849   :  { %1068 = vmatpush.bf16.msrb.mxu0 %v4159_v13 }
 0x8b1   :  { %v927_v35 = vpop.f32.mrf.mxu0  ;;  %v942_v34 = vpop.f32.mrf.mxu1 }
 0x8b2   :  { %v946_v54 = vmax.f32 %v927_v35, %v942_v34  ;;  %v1021_v35 = vperm.slane %v1020_v32, 0 }
 0x8b4   :  { %v960_v42 = vpack.c.bf16 %v946_v54, %v946_v54  ;;  %998 = vrot.lane.b32.xlu0 %v946_v54, %s4521_s28 }
 0x8b6   :  { %v966_v46 = vsel %vm5322_vm7, %v960_v42, 0 }
 0x8b7   :  { %975 = vmatpush.bf16.msra.mxu2 %v966_v46  ;;  %991 = vmatpush.bf16.msra.mxu3 %v966_v46 }
 0x8b9   :  { %v929_v49 = vpop.f32.mrf.mxu0  ;;  %v944_v51 = vpop.f32.mrf.mxu1 }
 0x8ba   :  { %3631 = vmatmul.msk.bf16.vlgmr.msra.gmra.mxu2 %vm961_vm14, %v4913_v47  ;;  %3632 = vmatmul.msk.bf16.vlgmr.msra.gmra.mxu3 %vm961_vm14, %v4915_v48 }
 0x926   :  { %v999_v11 = vpop.permute.xlu0 %998 }
 0x93d   :  { %v977_v15 = vpop.f32.mrf.mxu2  ;;  %v993_v16 = vpop.f32.mrf.mxu3 }
 0x93e   :  { %1002 = vrot.lane.b32.xlu1 %v993_v16, %s4513_s20  ;;  %v1005_v28 = vsel %vm5323_vm9, %v977_v15, %v999_v11  ;;  %vm5326_vm9 = vcmask 1041408  }
 0x945   :  { %v995_v14 = vpop.f32.mrf.mxu3  ;;  %v979_v18 = vpop.f32.mrf.mxu2 }
 0x9b0   :  { %v1003_v30 = vpop.permute.xlu1 %1002 }
 0x9b1   :  { %v1006_v3 = vsel %vm5324_vm12, %v1005_v28, %v1003_v30 }
 0x9b2   :  { %v1007_v53 = vpack.c.bf16 %v1006_v3, %v1006_v3 }
 0x9b4   :  { %3657 = vmatmul.msk.bf16.vlgmr.msrb.gmra.mxu0 %vm5325_vm4, %v1007_v53  ;;  %vm5327_vm4 = vmmov %vm5324_vm12 }
 0xa31   :  { %v1070_v34 = vpop.f32.mrf.mxu0 }
 0xa32   :  { %v1071_v54 = vadd.f32 %v1070_v34, %v1021_v35 }
 0xa34   :  { %v1075_v37 = vsel %vm1074_vm1, %v1071_v54, 0.0  ;;  %v1083_v38 = vmul.f32 %v1071_v54, %v1071_v54 }
 0xa35   :  { %v1076_v42 = vrot.slane %v1075_v37, 4 }
 0xa36   :  { %v1084_v46 = vsel %vm1074_vm1, %v1083_v38, 0.0 }
 0xa37   :  { %v1077_v49 = vadd.f32 %v1076_v42, %v1075_v37  ;;  %v1085_v51 = vrot.slane %v1084_v46, 4 }
 0xa39   :  { %v1078_v29 = vrot.slane %v1077_v49, 2  ;;  %v1086_v2 = vadd.f32 %v1085_v51, %v1084_v46  ;;  %v1072_v4 = vpop.f32.mrf.mxu0 }
 0xa3b   :  { %v1079_v41 = vadd.f32 %v1078_v29, %v1077_v49  ;;  %v1087_v17 = vrot.slane %v1086_v2, 2 }
 0xa3d   :  { %v1080_v15 = vrot.slane %v1079_v41, 1  ;;  %v1088_v16 = vadd.f32 %v1087_v17, %v1086_v2 }
 0xa3f   :  { %v1081_v14 = vadd.f32 %v1080_v15, %v1079_v41  ;;  %v1089_v18 = vrot.slane %v1088_v16, 1  ;;  %v1110_v41 = vperm.slane %v1020_v32, 2 }
 0xa41   :  { %v1082_v13 = vmul.f32 0.25, %v1081_v14  ;;  %v1090_v11 = vadd.f32 %v1089_v18, %v1088_v16 }
 0xa43   :  { %v1091_v28 = vmul.f32 0.25, %v1090_v11  ;;  %v1092_v30 = vmul.f32 %v1082_v13, %v1082_v13  ;;  %v1106_v2 = vsub.f32 %v1071_v54, %v1082_v13  ;;  %v4171_v54 = vld [vmem:[#allocation2 + $0xe8] sm:$0xff]  ;;  %v4176_v13 = vld [vmem:[#allocation2 + $0x110] sm:$0xff]  ;;  %v4170_v11 = vld [vmem:[#allocation2 + $0xe0] sm:$0xff] }
 0xa45   :  { %v1093_v3 = vsub.f32 %v1091_v28, %v1092_v30  ;;  %v4169_v28 = vld [vmem:[#allocation2 + $0xd8] sm:$0xff]  ;;  %v4168_v30 = vld [vmem:[#allocation2 + $0xd0] sm:$0xff] }
 0xa47   :  { %v1094_v53 = vmax.f32 %v1093_v3, 0.0  ;;  %v4167_v3 = vld [vmem:[#allocation2 + $0xc8] sm:$0xff] }
 0xa49   :  { %v1095_v35 = vadd.f32 1e-05, %v1094_v53  ;;  %v4166_v53 = vld [vmem:[#allocation2 + $0xc0] sm:$0xff] }
 0xa4b   :  { %4436 = vrsqrt.f32 %v1095_v35  ;;  %vm1102_vm8 = vweird.f32 %v1095_v35 }
 0xa51   :  { %v4437_v34 = vpop.eup %4436 }
 0xa52   :  { %v1097_v37 = vmul.f32 %v4437_v34, %v1095_v35  ;;  %vm1103_vm15 = vweird.f32 %v4437_v34  ;;  %v4175_v35 = vld [vmem:[#allocation2 + $0x108] sm:$0xff] }
 0xa53   :  { %vm1104_vm7 = vmor %vm1102_vm8, %vm1103_vm15 }
 0xa54   :  { %v1098_v38 = vmul.f32 %v4437_v34, %v1097_v37  ;;  %v4174_v37 = vld [vmem:[#allocation2 + $0x100] sm:$0xff] }
 0xa56   :  { %v1099_v42 = vmul.f32 0.5, %v1098_v38  ;;  %v4173_v38 = vld [vmem:[#allocation2 + $0xf8] sm:$0xff] }
 0xa58   :  { %v1100_v46 = vsub.f32 1.5, %v1099_v42 }
 0xa5a   :  { %v1101_v49 = vmul.f32 %v4437_v34, %v1100_v46 }
 0xa5c   :  { %v1105_v51 = vsel %vm1104_vm7, %v4437_v34, %v1101_v49  ;;  %v4165_v34 = vld [vmem:[#allocation2 + $0xb8] sm:$0xff] }
 0xa5d   :  { %v1107_v29 = vmul.f32 %v1105_v51, %v1020_v32  ;;  %v4172_v32 = vld [vmem:[#allocation2 + $0xf0] sm:$0xff] }
 0xa5e   :  { %1251 = vmatpush.bf16.msrb.mxu3 %v4172_v32 }
 0xa5f   :  { %v1108_v4 = vperm.slane %v1107_v29, 1 }
 0xa61   :  { %v1109_v17 = vmul.f32 %v1108_v4, %v1106_v2 }
 0xa62   :  { %1252 = vmatpush.bf16.msrb.mxu3 %v4171_v54 }
 0xa63   :  { %v1111_v15 = vadd.f32 %v1110_v41, %v1109_v17  ;;  %v1174_v17 = vld [vmem:[#allocation4 + $0x38] sm:$0xff] }
 0xa65   :  { %v1112_v16 = vmax.f32 %v1111_v15, 0.0  ;;  %v1175_v15 = vperm.slane %v1174_v17, 0 }
 0xa66   :  { %1253 = vmatpush.bf16.msrb.mxu3 %v4170_v11 }
 0xa67   :  { %1144 = vrot.lane.b32.xlu2 %v1112_v16, %s4513_s20  ;;  %v1113_v14 = vpack.c.bf16 %v1112_v16, %v1112_v16 }
 0xa69   :  { %v1115_v18 = vsel %vm5326_vm9, %v1113_v14, 0 }
 0xa6a   :  { %1124 = vmatpush.bf16.msrb.mxu1 %v1115_v18  ;;  %1137 = vmatpush.bf16.msrb.mxu2 %v1115_v18 }
 0xa6b   :  { %1254 = vmatpush.bf16.msrb.mxu3 %v4169_v28 }
 0xa6d   :  { %3658 = vmatmul.msk.bf16.vlgmr.msrb.gmra.mxu1 %vm961_vm14, %v4913_v47  ;;  %3659 = vmatmul.msk.bf16.vlgmr.msrb.gmra.mxu2 %vm961_vm14, %v4915_v48 }
 0xa6e   :  { %1268 = vmatpush.bf16.msra.mxu1 %v4176_v13 }
 0xa6f   :  { %2305 = vrot.lane.b32.xlu2 %v4895_v27, %s4521_s28  ;;  %1255 = vmatpush.bf16.msrb.mxu3 %v4168_v30 }
 0xa72   :  { %1269 = vmatpush.bf16.msra.mxu1 %v4175_v35 }
 0xa73   :  { %1256 = vmatpush.bf16.msrb.mxu3 %v4167_v3 }
 0xa76   :  { %1270 = vmatpush.bf16.msra.mxu1 %v4174_v37 }
 0xa77   :  { %1257 = vmatpush.bf16.msrb.mxu3 %v4166_v53 }
 0xa7a   :  { %1271 = vmatpush.bf16.msra.mxu1 %v4173_v38 }
 0xa7b   :  { %1258 = vmatpush.bf16.msrb.mxu3 %v4165_v34 }
 0xac1   :  { %v1145_v42 = vpop.permute.xlu2 %1144 }
 0xaea   :  { %v1126_v46 = vpop.f32.mrf.mxu1 }
 0xaeb   :  { %v1147_v49 = vsel %vm5324_vm12, %v1126_v46, %v1145_v42  ;;  %vm5328_vm12 = vmmov %vm5327_vm4 }
 0xaec   :  { %v1148_v51 = vpack.c.bf16 %v1147_v49, %v1147_v49 }
 0xaee   :  { %1259 = vmatmul.bf16.vlgmr.msrb.gmra.mxu3 %v1148_v51 }
 0xaf0   :  { %v1139_v29 = vpop.f32.mrf.mxu2 }
 0xaf1   :  { %v1149_v2 = vpack.c.bf16 %v1139_v29, %v1139_v29 }
 0xaf2   :  { %v1128_v4 = vpop.f32.mrf.mxu1 }
 0xaf3   :  { %3708 = vmatmul.msk.bf16.vlgmr.msra.gmra.mxu1 %vm5327_vm4, %v1149_v2  ;;  %vm5329_vm4 = vmmov %vm5326_vm9 }
 0xaf8   :  { %v1141_v41 = vpop.f32.mrf.mxu2 }
 0xb70   :  { %v1273_v16 = vpop.f32.mrf.mxu1 }
 0xb71   :  { %v1260_v14 = vpop.f32.mrf.mxu3 }
 0xb72   :  { %v1261_v18 = vadd.f32 %v1260_v14, %v1175_v15 }
 0xb74   :  { %v1274_v32 = vadd.f32 %v1273_v16, %v1261_v18 }
 0xb76   :  { %v1277_v54 = vsel %vm1074_vm1, %v1274_v32, 0.0  ;;  %v1285_v13 = vmul.f32 %v1274_v32, %v1274_v32 }
 0xb77   :  { %v1278_v11 = vrot.slane %v1277_v54, 4 }
 0xb78   :  { %v1286_v28 = vsel %vm1074_vm1, %v1285_v13, 0.0  ;;  %v1275_v30 = vpop.f32.mrf.mxu1 }
 0xb79   :  { %v1279_v3 = vadd.f32 %v1278_v11, %v1277_v54  ;;  %v1287_v53 = vrot.slane %v1286_v28, 4  ;;  %v1262_v35 = vpop.f32.mrf.mxu3 }
 0xb7b   :  { %v1280_v34 = vrot.slane %v1279_v3, 2  ;;  %v1288_v37 = vadd.f32 %v1287_v53, %v1286_v28 }
 0xb7d   :  { %v1281_v38 = vadd.f32 %v1280_v34, %v1279_v3  ;;  %v1289_v42 = vrot.slane %v1288_v37, 2 }
 0xb7f   :  { %v1282_v46 = vrot.slane %v1281_v38, 1  ;;  %v1290_v49 = vadd.f32 %v1289_v42, %v1288_v37 }
 0xb81   :  { %v1283_v51 = vadd.f32 %v1282_v46, %v1281_v38  ;;  %v1291_v29 = vrot.slane %v1290_v49, 1  ;;  %v1312_v38 = vperm.slane %v1174_v17, 2 }
 0xb83   :  { %v1284_v2 = vmul.f32 0.25, %v1283_v51  ;;  %v1292_v4 = vadd.f32 %v1291_v29, %v1290_v49 }
 0xb85   :  { %v1293_v41 = vmul.f32 0.25, %v1292_v4  ;;  %v1294_v15 = vmul.f32 %v1284_v2, %v1284_v2  ;;  %v1308_v34 = vsub.f32 %v1274_v32, %v1284_v2  ;;  %v4179_v32 = vld [vmem:[#allocation2 + $0x148] sm:$0xff]  ;;  %v4178_v2 = vld [vmem:[#allocation2 + $0x140] sm:$0xff]  ;;  %v4177_v4 = vld [vmem:[#allocation2 + $0x138] sm:$0xff] }
 0xb87   :  { %v1295_v16 = vsub.f32 %v1293_v41, %v1294_v15 }
 0xb89   :  { %v1296_v14 = vmax.f32 %v1295_v16, 0.0 }
 0xb8b   :  { %v1297_v18 = vadd.f32 1e-05, %v1296_v14 }
 0xb8d   :  { %4438 = vrsqrt.f32 %v1297_v18  ;;  %vm1304_vm8 = vweird.f32 %v1297_v18 }
 0xb93   :  { %v4439_v13 = vpop.eup %4438 }
 0xb94   :  { %v1299_v54 = vmul.f32 %v4439_v13, %v1297_v18  ;;  %vm1305_vm15 = vweird.f32 %v4439_v13 }
 0xb95   :  { %vm1306_vm7 = vmor %vm1304_vm8, %vm1305_vm15 }
 0xb96   :  { %v1300_v11 = vmul.f32 %v4439_v13, %v1299_v54  ;;  %v1359_v54 = vld [vmem:[#allocation4 + $0x40] sm:$0xff]  ;;  %vm5330_vm15 = vmmov %vm5329_vm4 }
 0xb98   :  { %v1301_v30 = vmul.f32 0.5, %v1300_v11  ;;  %v1360_v11 = vperm.slane %v1359_v54, 0 }
 0xb9a   :  { %v1302_v35 = vsub.f32 1.5, %v1301_v30 }
 0xb9c   :  { %v1303_v28 = vmul.f32 %v4439_v13, %v1302_v35  ;;  %v4186_v35 = vld [vmem:[#allocation2 + $0x1e0] sm:$0xff] }
 0xb9e   :  { %v1307_v3 = vsel %vm1306_vm7, %v4439_v13, %v1303_v28 }
 0xb9f   :  { %v1309_v53 = vmul.f32 %v1307_v3, %v1174_v17  ;;  %v4180_v17 = vld [vmem:[#allocation2 + $0x150] sm:$0xff] }
 0xba0   :  { %1392 = vmatpush.bf16.msrb.mxu1 %v4180_v17 }
 0xba1   :  { %v1310_v37 = vperm.slane %v1309_v53, 1 }
 0xba3   :  { %v1311_v42 = vmul.f32 %v1310_v37, %v1308_v34  ;;  %v4185_v37 = vld [vmem:[#allocation2 + $0x1d8] sm:$0xff] }
 0xba4   :  { %1393 = vmatpush.bf16.msrb.mxu1 %v4179_v32  ;;  %v4184_v32 = vld [vmem:[#allocation2 + $0x1d0] sm:$0xff] }
 0xba5   :  { %v1313_v46 = vadd.f32 %v1312_v38, %v1311_v42 }
 0xba7   :  { %v1314_v49 = vmax.f32 %v1313_v46, 0.0 }
 0xba8   :  { %1394 = vmatpush.bf16.msrb.mxu1 %v4178_v2 }
 0xba9   :  { %1689 = vrot.lane.b32.xlu0 %v1314_v49, %s4513_s20  ;;  %v1315_v51 = vpack.c.bf16 %v1314_v49, %v1314_v49 }
 0xbab   :  { %v4941_v29 = vsel %vm5326_vm9, %v1315_v51, 0 }
 0xbac   :  { %1328 = vmatpush.bf16.msra.mxu2 %v4941_v29  ;;  %1343 = vmatpush.bf16.msra.mxu0 %v4941_v29 }
 0xbad   :  { %1395 = vmatpush.bf16.msrb.mxu1 %v4177_v4 }
 0xbaf   :  { %3709 = vmatmul.msk.bf16.vlgmr.msra.gmra.mxu2 %vm961_vm14, %v4834_v58  ;;  %3710 = vmatmul.msk.bf16.vlgmr.msra.gmra.mxu0 %vm961_vm14, %v4838_v43  ;;  %v4188_v58 = vld [vmem:[#allocation2 + $0x1f0] sm:$0xff]  ;;  %v4187_v43 = vld [vmem:[#allocation2 + $0x1e8] sm:$0xff] }
 0xbb0   :  { %1506 = vmatpush.bf16.msrb.mxu2 %v4188_v58 }
 0xbb4   :  { %1507 = vmatpush.bf16.msrb.mxu2 %v4187_v43  ;;  %v4182_v43 = vld [vmem:[#allocation2 + $0x1c0] sm:$0xff] }
 0xbb8   :  { %1508 = vmatpush.bf16.msrb.mxu2 %v4186_v35  ;;  %v4181_v35 = vld [vmem:[#allocation2 + $0x1b8] sm:$0xff] }
 0xbbc   :  { %1509 = vmatpush.bf16.msrb.mxu2 %v4185_v37 }
 0xbc0   :  { %1510 = vmatpush.bf16.msrb.mxu2 %v4184_v32 }
 0xc2c   :  { %v1345_v41 = vpop.f32.mrf.mxu0 }
 0xc32   :  { %v1330_v15 = vpop.f32.mrf.mxu2 }
 0xc33   :  { %v1349_v16 = vmax.f32 %v1330_v15, %v1345_v41 }
 0xc34   :  { %v1347_v14 = vpop.f32.mrf.mxu0 }
 0xc35   :  { %v1358_v18 = vpack.c.bf16 %v1349_v16, %v1349_v16  ;;  %v4183_v16 = vld [vmem:[#allocation2 + $0x1c8] sm:$0xff] }
 0xc36   :  { %1511 = vmatpush.bf16.msrb.mxu2 %v4183_v16 }
 0xc37   :  { %3727 = vmatmul.msk.bf16.vlgmr.msrb.gmra.mxu1 %vm5328_vm12, %v1358_v18  ;;  %vm5331_vm12 = vmmov %vm5329_vm4 }
 0xc3a   :  { %v1332_v13 = vpop.f32.mrf.mxu2  ;;  %1512 = vmatpush.bf16.msrb.mxu2 %v4182_v43 }
 0xc3e   :  { %1513 = vmatpush.bf16.msrb.mxu2 %v4181_v35 }
 0xcb4   :  { %v1397_v30 = vpop.f32.mrf.mxu1 }
 0xcb5   :  { %v1398_v28 = vadd.f32 %v1397_v30, %v1360_v11 }
 0xcb7   :  { %v1401_v3 = vsel %vm5329_vm4, %v1398_v28, 0.0  ;;  %v1409_v53 = vmul.f32 %v1398_v28, %v1398_v28 }
 0xcb8   :  { %v1402_v34 = vrot.slane %v1401_v3, 4 }
 0xcb9   :  { %v1410_v38 = vsel %vm5330_vm15, %v1409_v53, 0.0 }
 0xcba   :  { %v1403_v42 = vadd.f32 %v1402_v34, %v1401_v3  ;;  %v1411_v46 = vrot.slane %v1410_v38, 4 }
 0xcbc   :  { %v1404_v49 = vrot.slane %v1403_v42, 2  ;;  %v1412_v51 = vadd.f32 %v1411_v46, %v1410_v38  ;;  %v1399_v17 = vpop.f32.mrf.mxu1 }
 0xcbe   :  { %v1405_v2 = vadd.f32 %v1404_v49, %v1403_v42  ;;  %v1413_v4 = vrot.slane %v1412_v51, 2 }
 0xcc0   :  { %v1406_v41 = vrot.slane %v1405_v2, 1  ;;  %v1414_v15 = vadd.f32 %v1413_v4, %v1412_v51 }
 0xcc2   :  { %v1407_v14 = vadd.f32 %v1406_v41, %v1405_v2  ;;  %v1415_v18 = vrot.slane %v1414_v15, 1  ;;  %v1436_v41 = vperm.slane %v1359_v54, 2 }
 0xcc4   :  { %v1408_v13 = vmul.f32 0.5, %v1407_v14  ;;  %v1416_v58 = vadd.f32 %v1415_v18, %v1414_v15 }
 0xcc6   :  { %v1417_v11 = vmul.f32 0.5, %v1416_v58  ;;  %v1418_v30 = vmul.f32 %v1408_v13, %v1408_v13  ;;  %v1432_v2 = vsub.f32 %v1398_v28, %v1408_v13  ;;  %v1456_v58 = vld [vmem:[#allocation4 + $0x48] sm:$0xff] }
 0xcc7   :  { %v1457_v43 = vperm.slane %v1456_v58, 0 }
 0xcc8   :  { %v1419_v3 = vsub.f32 %v1417_v11, %v1418_v30 }
 0xcca   :  { %v1420_v53 = vmax.f32 %v1419_v3, 0.0 }
 0xccc   :  { %v1421_v34 = vadd.f32 1e-05, %v1420_v53 }
 0xcce   :  { %4440 = vrsqrt.f32 %v1421_v34  ;;  %vm1428_vm7 = vweird.f32 %v1421_v34 }
 0xcd4   :  { %v4441_v37 = vpop.eup %4440 }
 0xcd5   :  { %v1423_v38 = vmul.f32 %v4441_v37, %v1421_v34  ;;  %vm1429_vm8 = vweird.f32 %v4441_v37 }
 0xcd6   :  { %vm1430_vm9 = vmor %vm1428_vm7, %vm1429_vm8 }
 0xcd7   :  { %v1424_v42 = vmul.f32 %v4441_v37, %v1423_v38 }
 0xcd9   :  { %v1425_v46 = vmul.f32 0.5, %v1424_v42 }
 0xcdb   :  { %v1426_v49 = vsub.f32 1.5, %v1425_v46 }
 0xcdd   :  { %v1427_v51 = vmul.f32 %v4441_v37, %v1426_v49 }
 0xcdf   :  { %v1431_v17 = vsel %vm1430_vm9, %v4441_v37, %v1427_v51 }
 0xce0   :  { %v1433_v32 = vmul.f32 %v1431_v17, %v1359_v54 }
 0xce2   :  { %v1434_v4 = vperm.slane %v1433_v32, 1 }
 0xce4   :  { %v1435_v15 = vmul.f32 %v1434_v4, %v1432_v2 }
 0xce6   :  { %v1437_v16 = vadd.f32 %v1436_v41, %v1435_v15 }
 0xce8   :  { %v1438_v14 = vmax.f32 %v1437_v16, 0.0 }
 0xcea   :  { %v1455_v18 = vpack.c.bf16 %v1438_v14, %v1438_v14 }
 0xcec   :  { %1514 = vmatmul.bf16.vlgmr.msrb.gmra.mxu2 %v1455_v18 }
 0xd6f   :  { %v1515_v11 = vpop.f32.mrf.mxu2 }
 0xd70   :  { %v1516_v30 = vadd.f32 %v1515_v11, %v1457_v43 }
 0xd72   :  { %v1519_v35 = vsel %vm5331_vm12, %v1516_v30, 0.0  ;;  %v1527_v3 = vmul.f32 %v1516_v30, %v1516_v30  ;;  %vm5332_vm12 = vcmask 1040384  }
 0xd73   :  { %v1520_v53 = vrot.slane %v1519_v35, 4 }
 0xd74   :  { %v1528_v34 = vsel %vm5329_vm4, %v1527_v3, 0.0  ;;  %vm1562_vm4 = vcmask 15360  }
 0xd75   :  { %v1521_v37 = vadd.f32 %v1520_v53, %v1519_v35  ;;  %v1529_v38 = vrot.slane %v1528_v34, 4 }
 0xd77   :  { %v1522_v28 = vrot.slane %v1521_v37, 2  ;;  %v1530_v13 = vadd.f32 %v1529_v38, %v1528_v34  ;;  %v1517_v54 = vpop.f32.mrf.mxu2 }
 0xd78   :  { %v1554_v54 = vperm.slane %v1456_v58, 2 }
 0xd79   :  { %v1523_v42 = vadd.f32 %v1522_v28, %v1521_v37  ;;  %v1531_v46 = vrot.slane %v1530_v13, 2 }
 0xd7b   :  { %v1524_v49 = vrot.slane %v1523_v42, 1  ;;  %v1532_v51 = vadd.f32 %v1531_v46, %v1530_v13 }
 0xd7d   :  { %v1525_v17 = vadd.f32 %v1524_v49, %v1523_v42  ;;  %v1533_v32 = vrot.slane %v1532_v51, 1  ;;  %v1557_v42 = vshra.s32 %v4578_v61, 1 }
 0xd7f   :  { %v1526_v2 = vmul.f32 0.5, %v1525_v17  ;;  %v1534_v4 = vadd.f32 %v1533_v32, %v1532_v51  ;;  %vm1558_vm9 = vcmp.eq.s32.totalorder %v4671_v20, %v1557_v42  ;;  %v4216_v42 = vld [vmem:[#allocation2 + $0x310] sm:$0xff] }
 0xd80   :  { %v4957_v17 = vsel %vm1558_vm9, 1.0, %v4520_v40 }
 0xd81   :  { %v1535_v41 = vmul.f32 0.5, %v1534_v4  ;;  %v1536_v15 = vmul.f32 %v1526_v2, %v1526_v2  ;;  %v1550_v28 = vsub.f32 %v1516_v30, %v1526_v2  ;;  %v4220_v2 = vld [vmem:[#allocation2 + $0x330] sm:$0xff] }
 0xd83   :  { %v1537_v16 = vsub.f32 %v1535_v41, %v1536_v15  ;;  %v4962_v41 = vpack.c.bf16 %v4957_v17, %v4957_v17 }
 0xd85   :  { %v1538_v14 = vmax.f32 %v1537_v16, 0.0  ;;  %v4204_v16 = vld [vmem:[#allocation2 + $0x2b0] sm:$0xff] }
 0xd87   :  { %v1539_v18 = vadd.f32 1e-05, %v1538_v14  ;;  %v4219_v14 = vld [vmem:[#allocation2 + $0x328] sm:$0xff] }
 0xd89   :  { %4442 = vrsqrt.f32 %v1539_v18  ;;  %vm1546_vm8 = vweird.f32 %v1539_v18 }
 0xd8f   :  { %v4443_v43 = vpop.eup %4442 }
 0xd90   :  { %v1541_v11 = vmul.f32 %v4443_v43, %v1539_v18  ;;  %vm1547_vm15 = vweird.f32 %v4443_v43  ;;  %v4196_v18 = vld [vmem:[#allocation2 + $0x270] sm:$0xff] }
 0xd91   :  { %vm1548_vm7 = vmor %vm1546_vm8, %vm1547_vm15  ;;  %vm5333_vm15 = vcmask 1041408   ;;  %vm5334_vm8 = vcmask 523264  }
 0xd92   :  { %v1542_v35 = vmul.f32 %v4443_v43, %v1541_v11  ;;  %v4203_v11 = vld [vmem:[#allocation2 + $0x2a8] sm:$0xff] }
 0xd94   :  { %v1543_v3 = vmul.f32 0.5, %v1542_v35  ;;  %v4224_v35 = vld [vmem:[#allocation2 + $0x350] sm:$0xff] }
 0xd95   :  { %1811 = vmatpush.bf16.msra.mxu2 %v4224_v35  ;;  %v4191_v35 = vld [vmem:[#allocation2 + $0x248] sm:$0xff] }
 0xd96   :  { %v1544_v53 = vsub.f32 1.5, %v1543_v3  ;;  %v4218_v3 = vld [vmem:[#allocation2 + $0x320] sm:$0xff] }
 0xd98   :  { %v1545_v34 = vmul.f32 %v4443_v43, %v1544_v53  ;;  %v4195_v53 = vld [vmem:[#allocation2 + $0x268] sm:$0xff] }
 0xd9a   :  { %v1549_v37 = vsel %vm1548_vm7, %v4443_v43, %v1545_v34  ;;  %v4223_v34 = vld [vmem:[#allocation2 + $0x348] sm:$0xff]  ;;  %vm5335_vm7 = vmmov %vm5334_vm8 }
 0xd9b   :  { %v1551_v38 = vmul.f32 %v1549_v37, %v1456_v58  ;;  %v4217_v37 = vld [vmem:[#allocation2 + $0x318] sm:$0xff]  ;;  %1812 = vmatpush.bf16.msra.mxu2 %v4223_v34 }
 0xd9c   :  { %v4221_v34 = vld [vmem:[#allocation2 + $0x338] sm:$0xff] }
 0xd9d   :  { %v1552_v13 = vperm.slane %v1551_v38, 1  ;;  %v4194_v38 = vld [vmem:[#allocation2 + $0x260] sm:$0xff] }
 0xd9f   :  { %v1553_v46 = vmul.f32 %v1552_v13, %v1550_v28  ;;  %v4222_v28 = vld [vmem:[#allocation2 + $0x340] sm:$0xff] }
 0xda0   :  { %1813 = vmatpush.bf16.msra.mxu2 %v4222_v28  ;;  %v4209_v28 = vld [vmem:[#allocation2 + $0x2d8] sm:$0xff] }
 0xda1   :  { %v1555_v49 = vadd.f32 %v1554_v54, %v1553_v46  ;;  %v4201_v54 = vld [vmem:[#allocation2 + $0x298] sm:$0xff] }
 0xda2   :  { %v4193_v46 = vld [vmem:[#allocation2 + $0x258] sm:$0xff] }
 0xda3   :  { %v1556_v51 = vmax.f32 %v1555_v49, 0.0  ;;  %v4200_v49 = vld [vmem:[#allocation2 + $0x290] sm:$0xff] }
 0xda4   :  { %1814 = vmatpush.bf16.msra.mxu2 %v4221_v34 }
 0xda5   :  { %v1561_v32 = vpack.c.bf16 %v1556_v51, %v1556_v51  ;;  %v4215_v51 = vld [vmem:[#allocation2 + $0x308] sm:$0xff] }
 0xda7   :  { %v1567_v4 = vsel %vm5332_vm12, %v1561_v32, 0  ;;  %v4192_v32 = vld [vmem:[#allocation2 + $0x250] sm:$0xff] }
 0xda8   :  { %1576 = vmatpush.bf16.msrb.mxu0 %v1567_v4  ;;  %v4199_v4 = vld [vmem:[#allocation2 + $0x288] sm:$0xff] }
 0xdab   :  { %3760 = vmatmul.msk.bf16.vlgmr.msrb.gmra.mxu0 %vm1562_vm4, %v4962_v41 }
 0xdac   :  { %1669 = vmatpush.bf16.msra.mxu0 %v4941_v29 }
 0xdb0   :  { %1964 = vmatpush.bf16.msrb.mxu0 %v4196_v18 }
 0xdb4   :  { %1965 = vmatpush.bf16.msrb.mxu0 %v4195_v53  ;;  %v4189_v53 = vld [vmem:[#allocation2 + $0x238] sm:$0xff] }
 0xdb8   :  { %1966 = vmatpush.bf16.msrb.mxu0 %v4194_v38  ;;  %v4210_v38 = vld [vmem:[#allocation2 + $0x2e0] sm:$0xff] }
 0xdbb   :  { %3763 = vmatmul.msk.bf16.vlgmr.msra.gmra.mxu0 %vm961_vm14, %v4913_v47 }
 0xdbc   :  { %1967 = vmatpush.bf16.msrb.mxu0 %v4193_v46  ;;  %v4205_v46 = vld [vmem:[#allocation2 + $0x2b8] sm:$0xff] }
 0xdc0   :  { %1968 = vmatpush.bf16.msrb.mxu0 %v4192_v32 }
 0xdc4   :  { %1969 = vmatpush.bf16.msrb.mxu0 %v4191_v35 }
 0xe28   :  { %v1578_v58 = vpop.f32.mrf.mxu0 }
 0xe29   :  { %v1582_v30 = vpack.c.bf16 %v1578_v58, %v1578_v58 }
 0xe2b   :  { %v1584_v15 = vsel %vm5333_vm15, %v1582_v30, 0 }
 0xe2c   :  { %1593 = vmatpush.bf16.msra.mxu3 %v1584_v15  ;;  %1606 = vmatpush.bf16.msra.mxu1 %v1584_v15  ;;  %v4198_v15 = vld [vmem:[#allocation2 + $0x280] sm:$0xff] }
 0xe2f   :  { %3761 = vmatmul.msk.bf16.vlgmr.msra.gmra.mxu3 %vm961_vm14, %v4913_v47  ;;  %3762 = vmatmul.msk.bf16.vlgmr.msra.gmra.mxu1 %vm961_vm14, %v4915_v48 }
 0xe30   :  { %1682 = vmatpush.bf16.msrb.mxu3 %v4941_v29  ;;  %1794 = vmatpush.bf16.msrb.mxu1 %v4220_v2  ;;  %v1580_v43 = vpop.f32.mrf.mxu0  ;;  %v4202_v29 = vld [vmem:[#allocation2 + $0x2a0] sm:$0xff] }
 0xe31   :  { %v4214_v2 = vld [vmem:[#allocation2 + $0x300] sm:$0xff]  ;;  %v4197_v43 = vld [vmem:[#allocation2 + $0x278] sm:$0xff] }
 0xe34   :  { %1977 = vmatpush.bf16.msra.mxu3 %v4204_v16  ;;  %1795 = vmatpush.bf16.msrb.mxu1 %v4219_v14  ;;  %v4213_v16 = vld [vmem:[#allocation2 + $0x2f8] sm:$0xff]  ;;  %v1690_v14 = vpop.permute.xlu0 %1689 }
 0xe38   :  { %1978 = vmatpush.bf16.msra.mxu3 %v4203_v11  ;;  %1796 = vmatpush.bf16.msrb.mxu1 %v4218_v3  ;;  %v1671_v13 = vpop.f32.mrf.mxu0  ;;  %v4190_v3 = vld [vmem:[#allocation2 + $0x240] sm:$0xff] }
 0xe39   :  { %v1692_v18 = vsel %vm5334_vm8, %v1671_v13, %v1690_v14  ;;  %1970 = vmatpush.bf16.msrb.mxu0 %v4190_v3  ;;  %v4208_v13 = vld [vmem:[#allocation2 + $0x2d0] sm:$0xff]  ;;  %vm5336_vm8 = vmmov %vm5335_vm7 }
 0xe3a   :  { %v1693_v11 = vpack.c.bf16 %v1692_v18, %v1692_v18 }
 0xe3c   :  { %1979 = vmatpush.bf16.msra.mxu3 %v4202_v29  ;;  %1797 = vmatpush.bf16.msrb.mxu1 %v4217_v37  ;;  %v4212_v29 = vld [vmem:[#allocation2 + $0x2f0] sm:$0xff]  ;;  %v4211_v37 = vld [vmem:[#allocation2 + $0x2e8] sm:$0xff] }
 0xe3d   :  { %1971 = vmatpush.bf16.msrb.mxu0 %v4189_v53  ;;  %1990 = vmatpush.bf16.msrb.mxu2 %v4212_v29 }
 0xe3f   :  { %3764 = vmatmul.msk.bf16.vlgmr.msrb.gmra.mxu3 %vm961_vm14, %v4915_v48 }
 0xe40   :  { %1980 = vmatpush.bf16.msra.mxu3 %v4201_v54  ;;  %1798 = vmatpush.bf16.msrb.mxu1 %v4216_v42  ;;  %v1673_v58 = vpop.f32.mrf.mxu0  ;;  %v4207_v54 = vld [vmem:[#allocation2 + $0x2c8] sm:$0xff] }
 0xe41   :  { %1991 = vmatpush.bf16.msrb.mxu2 %v4211_v37 }
 0xe44   :  { %1981 = vmatpush.bf16.msra.mxu3 %v4200_v49  ;;  %1799 = vmatpush.bf16.msrb.mxu1 %v4215_v51 }
 0xe45   :  { %1992 = vmatpush.bf16.msrb.mxu2 %v4210_v38  ;;  %v2003_v38 = vld [vmem:[#allocation4 + $0x50] sm:$0xff] }
 0xe48   :  { %1982 = vmatpush.bf16.msra.mxu3 %v4199_v4  ;;  %1800 = vmatpush.bf16.msrb.mxu1 %v4214_v2 }
 0xe49   :  { %1993 = vmatpush.bf16.msrb.mxu2 %v4209_v28 }
 0xe4c   :  { %1983 = vmatpush.bf16.msra.mxu3 %v4198_v15  ;;  %1801 = vmatpush.bf16.msrb.mxu1 %v4213_v16 }
 0xe4d   :  { %1994 = vmatpush.bf16.msrb.mxu2 %v4208_v13  ;;  %v2004_v13 = vperm.slane %v2003_v38, 0 }
 0xe4f   :  { %1802 = vmatmul.bf16.vlgmr.msrb.gmra.mxu1 %v1693_v11 }
 0xe50   :  { %1984 = vmatpush.bf16.msra.mxu3 %v4197_v43 }
 0xe51   :  { %1995 = vmatpush.bf16.msrb.mxu2 %v4207_v54 }
 0xe53   :  { %1985 = vmatmul.bf16.vlgmr.msra.gmra.mxu3 %v1582_v30  ;;  %v4206_v30 = vld [vmem:[#allocation2 + $0x2c0] sm:$0xff] }
 0xe55   :  { %1996 = vmatpush.bf16.msrb.mxu2 %v4206_v30 }
 0xe59   :  { %1997 = vmatpush.bf16.msrb.mxu2 %v4205_v46 }
 0xeac   :  { %v1608_v42 = vpop.f32.mrf.mxu1 }
 0xead   :  { %v1613_v14 = vpack.c.bf16 %v1608_v42, %v1608_v42 }
 0xeb2   :  { %v1595_v49 = vpop.f32.mrf.mxu3 }
 0xeb3   :  { %v1612_v51 = vpack.c.bf16 %v1595_v49, %v1595_v49 }
 0xeb4   :  { %v1610_v32 = vpop.f32.mrf.mxu1 }
 0xeb5   :  { %1972 = vmatmul.bf16.vlgmr.msrb.gmra.mxu0 %v1612_v51 }
 0xeba   :  { %v1597_v4 = vpop.f32.mrf.mxu3 }
 0xec2   :  { %v1684_v58 = vpop.f32.mrf.mxu3 }
 0xec3   :  { %v1694_v2 = vpack.c.bf16 %v1684_v58, %v1684_v58 }
 0xec5   :  { %3813 = vmatmul.msk.bf16.vlgmr.msra.gmra.mxu2 %vm5335_vm7, %v1694_v2 }
 0xeca   :  { %v1686_v16 = vpop.f32.mrf.mxu3 }
 0xecc   :  { %v1803_v15 = vpop.f32.mrf.mxu1 }
 0xed4   :  { %v1805_v18 = vpop.f32.mrf.mxu1 }
 0xed5   :  { %1998 = vmatmul.bf16.vlgmr.msrb.gmra.mxu2 %v1613_v14 }
 0xed6   :  { %v1986_v43 = vpop.f32.mrf.mxu3 }
 0xede   :  { %v1988_v11 = vpop.f32.mrf.mxu3 }
 0xf32   :  { %v1973_v35 = vpop.f32.mrf.mxu0 }
 0xf3a   :  { %v1975_v3 = vpop.f32.mrf.mxu0 }
 0xf48   :  { %v1816_v53 = vpop.f32.mrf.mxu2 }
 0xf49   :  { %v1817_v34 = vadd.f32 %v1816_v53, %v1803_v15 }
 0xf4b   :  { %v1974_v37 = vadd.f32 %v1973_v35, %v1817_v34 }
 0xf4d   :  { %v1987_v28 = vadd.f32 %v1986_v43, %v1974_v37 }
 0xf50   :  { %v1818_v29 = vpop.f32.mrf.mxu2 }
 0xf58   :  { %v1999_v54 = vpop.f32.mrf.mxu2 }
 0xf59   :  { %v2000_v30 = vadd.f32 %v1999_v54, %v1987_v28 }
 0xf5b   :  { %v2005_v46 = vadd.f32 %v2004_v13, %v2000_v30  ;;  %v4232_v30 = vld [vmem:[#allocation2 + $0x390] sm:$0xff] }
 0xf5c   :  { %2182 = vmatpush.bf16.msrb.mxu3 %v4232_v30  ;;  %v4234_v30 = vld [vmem:[#allocation2 + $0x3a0] sm:$0xff] }
 0xf5d   :  { %v2006_v49 = vsel %vm1074_vm1, %v2005_v46, 0.0  ;;  %v2014_v51 = vmul.f32 %v2005_v46, %v2005_v46 }
 0xf5e   :  { %v2007_v42 = vrot.slane %v2006_v49, 4 }
 0xf5f   :  { %v2015_v32 = vsel %vm1074_vm1, %v2014_v51, 0.0 }
 0xf60   :  { %v2008_v4 = vadd.f32 %v2007_v42, %v2006_v49  ;;  %v2016_v58 = vrot.slane %v2015_v32, 4  ;;  %v2001_v2 = vpop.f32.mrf.mxu2  ;;  %v4231_v49 = vld [vmem:[#allocation2 + $0x388] sm:$0xff] }
 0xf61   :  { %2183 = vmatpush.bf16.msrb.mxu3 %v4231_v49  ;;  %v4225_v49 = vld [vmem:[#allocation2 + $0x358] sm:$0xff] }
 0xf62   :  { %v2009_v16 = vrot.slane %v2008_v4, 2  ;;  %v2017_v14 = vadd.f32 %v2016_v58, %v2015_v32  ;;  %v4230_v32 = vld [vmem:[#allocation2 + $0x380] sm:$0xff] }
 0xf64   :  { %v2010_v15 = vadd.f32 %v2009_v16, %v2008_v4  ;;  %v2018_v18 = vrot.slane %v2017_v14, 2 }
 0xf65   :  { %2184 = vmatpush.bf16.msrb.mxu3 %v4230_v32 }
 0xf66   :  { %v2019_v11 = vadd.f32 %v2018_v18, %v2017_v14  ;;  %v2011_v35 = vrot.slane %v2010_v15, 1 }
 0xf68   :  { %v2020_v43 = vrot.slane %v2019_v11, 1  ;;  %v2012_v3 = vadd.f32 %v2011_v35, %v2010_v15  ;;  %v2041_v35 = vperm.slane %v2003_v38, 2 }
 0xf6a   :  { %v2021_v53 = vadd.f32 %v2020_v43, %v2019_v11  ;;  %v2013_v34 = vmul.f32 0.25, %v2012_v3 }
 0xf6c   :  { %v2022_v29 = vmul.f32 0.25, %v2021_v53  ;;  %v2023_v37 = vmul.f32 %v2013_v34, %v2013_v34  ;;  %v2037_v18 = vsub.f32 %v2005_v46, %v2013_v34  ;;  %v4236_v46 = vld [vmem:[#allocation2 + $0x3b0] sm:$0xff]  ;;  %v4227_v34 = vld [vmem:[#allocation2 + $0x368] sm:$0xff] }
 0xf6e   :  { %v2024_v28 = vsub.f32 %v2022_v29, %v2023_v37 }
 0xf70   :  { %v2025_v13 = vmax.f32 %v2024_v28, 0.0  ;;  %v4229_v28 = vld [vmem:[#allocation2 + $0x378] sm:$0xff] }
 0xf71   :  { %2185 = vmatpush.bf16.msrb.mxu3 %v4229_v28 }
 0xf72   :  { %v2026_v54 = vadd.f32 1e-05, %v2025_v13  ;;  %v4235_v13 = vld [vmem:[#allocation2 + $0x3a8] sm:$0xff] }
 0xf74   :  { %4444 = vrsqrt.f32 %v2026_v54  ;;  %vm2033_vm12 = vweird.f32 %v2026_v54 }
 0xf7a   :  { %v4445_v51 = vpop.eup %4444 }
 0xf7b   :  { %v2028_v42 = vmul.f32 %v4445_v51, %v2026_v54  ;;  %vm2034_vm9 = vweird.f32 %v4445_v51  ;;  %v4226_v54 = vld [vmem:[#allocation2 + $0x360] sm:$0xff] }
 0xf7c   :  { %vm2035_vm4 = vmor %vm2033_vm12, %vm2034_vm9 }
 0xf7d   :  { %v2029_v4 = vmul.f32 %v4445_v51, %v2028_v42 }
 0xf7f   :  { %v2030_v58 = vmul.f32 0.5, %v2029_v4 }
 0xf81   :  { %v2031_v2 = vsub.f32 1.5, %v2030_v58 }
 0xf83   :  { %v2032_v16 = vmul.f32 %v4445_v51, %v2031_v2 }
 0xf85   :  { %v2036_v14 = vsel %vm2035_vm4, %v4445_v51, %v2032_v16  ;;  %v4233_v51 = vld [vmem:[#allocation2 + $0x398] sm:$0xff]  ;;  %vm5337_vm4 = vmmov %vm5333_vm15 }
 0xf86   :  { %v2038_v15 = vmul.f32 %v2036_v14, %v2003_v38  ;;  %v4228_v38 = vld [vmem:[#allocation2 + $0x370] sm:$0xff] }
 0xf87   :  { %2186 = vmatpush.bf16.msrb.mxu3 %v4228_v38 }
 0xf88   :  { %v2039_v11 = vperm.slane %v2038_v15, 1  ;;  %v2105_v15 = vld [vmem:[#allocation4 + $0x58] sm:$0xff] }
 0xf8a   :  { %v2040_v43 = vmul.f32 %v2039_v11, %v2037_v18  ;;  %v2106_v18 = vperm.slane %v2105_v15, 0 }
 0xf8b   :  { %2187 = vmatpush.bf16.msrb.mxu3 %v4227_v34 }
 0xf8c   :  { %v2042_v3 = vadd.f32 %v2041_v35, %v2040_v43 }
 0xf8e   :  { %v2043_v53 = vmax.f32 %v2042_v3, 0.0 }
 0xf8f   :  { %2188 = vmatpush.bf16.msrb.mxu3 %v4226_v54 }
 0xf90   :  { %2075 = vrot.lane.b32.xlu1 %v2043_v53, %s4513_s20  ;;  %v2044_v29 = vpack.c.bf16 %v2043_v53, %v2043_v53 }
 0xf92   :  { %v2046_v37 = vsel %vm5333_vm15, %v2044_v29, 0  ;;  %vm5339_vm15 = vcmask 261120  }
 0xf93   :  { %2055 = vmatpush.bf16.msra.mxu1 %v2046_v37  ;;  %2068 = vmatpush.bf16.msra.mxu0 %v2046_v37 }
 0xf94   :  { %2189 = vmatpush.bf16.msrb.mxu3 %v4225_v49 }
 0xf96   :  { %3910 = vmatmul.msk.bf16.vlgmr.msra.gmra.mxu1 %vm961_vm14, %v4913_v47  ;;  %3911 = vmatmul.msk.bf16.vlgmr.msra.gmra.mxu0 %vm961_vm14, %v4915_v48 }
 0xf97   :  { %2199 = vmatpush.bf16.msrb.mxu1 %v4236_v46 }
 0xf9b   :  { %2200 = vmatpush.bf16.msrb.mxu1 %v4235_v13 }
 0xf9f   :  { %2201 = vmatpush.bf16.msrb.mxu1 %v4234_v30 }
 0xfa3   :  { %2202 = vmatpush.bf16.msrb.mxu1 %v4233_v51 }
0x1002   :  { %v2076_v47 = vpop.permute.xlu1 %2075 }
0x1013   :  { %v2057_v48 = vpop.f32.mrf.mxu1  ;;  %v2070_v42 = vpop.f32.mrf.mxu0 }
0x1014   :  { %v2078_v32 = vsel %vm5336_vm8, %v2057_v48, %v2076_v47  ;;  %v2080_v4 = vpack.c.bf16 %v2070_v42, %v2070_v42  ;;  %vm5340_vm8 = vmmov %vm5335_vm7 }
0x1015   :  { %v2079_v58 = vpack.c.bf16 %v2078_v32, %v2078_v32 }
0x1016   :  { %3960 = vmatmul.msk.bf16.vlgmr.msrb.gmra.mxu1 %vm5335_vm7, %v2080_v4 }
0x1017   :  { %2190 = vmatmul.bf16.vlgmr.msrb.gmra.mxu3 %v2079_v58 }
0x101b   :  { %v2059_v2 = vpop.f32.mrf.mxu1  ;;  %v2072_v16 = vpop.f32.mrf.mxu0 }
0x1093   :  { %v2204_v14 = vpop.f32.mrf.mxu1 }
0x109a   :  { %v2191_v11 = vpop.f32.mrf.mxu3 }
0x109b   :  { %v2192_v35 = vadd.f32 %v2191_v11, %v2106_v18  ;;  %v2206_v43 = vpop.f32.mrf.mxu1 }
0x109d   :  { %v2205_v3 = vadd.f32 %v2204_v14, %v2192_v35 }
0x109f   :  { %v2208_v53 = vsel %vm1074_vm1, %v2205_v3, 0.0  ;;  %v2216_v29 = vmul.f32 %v2205_v3, %v2205_v3 }
0x10a0   :  { %v2209_v37 = vrot.slane %v2208_v53, 4 }
0x10a1   :  { %v2217_v28 = vsel %vm1074_vm1, %v2216_v29, 0.0 }
0x10a2   :  { %v2210_v46 = vadd.f32 %v2209_v37, %v2208_v53  ;;  %v2218_v38 = vrot.slane %v2217_v28, 4  ;;  %v2193_v34 = vpop.f32.mrf.mxu3 }
0x10a4   :  { %v2211_v13 = vrot.slane %v2210_v46, 2  ;;  %v2219_v54 = vadd.f32 %v2218_v38, %v2217_v28  ;;  %v2243_v38 = vperm.slane %v2105_v15, 2 }
0x10a6   :  { %v2212_v30 = vadd.f32 %v2211_v13, %v2210_v46  ;;  %v2220_v49 = vrot.slane %v2219_v54, 2 }
0x10a8   :  { %v2213_v51 = vrot.slane %v2212_v30, 1  ;;  %v2221_v47 = vadd.f32 %v2220_v49, %v2219_v54 }
0x10aa   :  { %v2214_v48 = vadd.f32 %v2213_v51, %v2212_v30  ;;  %v2222_v42 = vrot.slane %v2221_v47, 1 }
0x10ac   :  { %v2215_v32 = vmul.f32 0.25, %v2214_v48  ;;  %v2223_v4 = vadd.f32 %v2222_v42, %v2221_v47  ;;  %v4248_v47 = vld [vmem:[#allocation2 + $0x410] sm:$0xff]  ;;  %v4247_v42 = vld [vmem:[#allocation2 + $0x408] sm:$0xff] }
0x10ae   :  { %v2224_v58 = vmul.f32 0.25, %v2223_v4  ;;  %v2225_v2 = vmul.f32 %v2215_v32, %v2215_v32  ;;  %v2239_v34 = vsub.f32 %v2205_v3, %v2215_v32  ;;  %v4246_v4 = vld [vmem:[#allocation2 + $0x400] sm:$0xff]  ;;  %v4243_v32 = vld [vmem:[#allocation2 + $0x3e8] sm:$0xff] }
0x10af   :  { %v4254_v3 = vld [vmem:[#allocation2 + $0x440] sm:$0xff] }
0x10b0   :  { %v2226_v16 = vsub.f32 %v2224_v58, %v2225_v2  ;;  %v4245_v58 = vld [vmem:[#allocation2 + $0x3f8] sm:$0xff]  ;;  %2368 = vmatpush.bf16.msrb.mxu0 %v4254_v3 }
0x10b1   :  { %v4253_v2 = vld [vmem:[#allocation2 + $0x438] sm:$0xff] }
0x10b2   :  { %v2227_v14 = vmax.f32 %v2226_v16, 0.0  ;;  %v4242_v16 = vld [vmem:[#allocation2 + $0x3e0] sm:$0xff] }
0x10b4   :  { %v2228_v18 = vadd.f32 1e-05, %v2227_v14  ;;  %2369 = vmatpush.bf16.msrb.mxu0 %v4253_v2  ;;  %v4252_v14 = vld [vmem:[#allocation2 + $0x430] sm:$0xff] }
0x10b6   :  { %4446 = vrsqrt.f32 %v2228_v18  ;;  %vm2235_vm9 = vweird.f32 %v2228_v18 }
0x10b8   :  { %2370 = vmatpush.bf16.msrb.mxu0 %v4252_v14  ;;  %v2480_v14 = vld [vmem:[#allocation4 + $0x60] sm:$0xff] }
0x10bc   :  { %v4447_v11 = vpop.eup %4446 }
0x10bd   :  { %v2230_v35 = vmul.f32 %v4447_v11, %v2228_v18  ;;  %vm2236_vm1 = vweird.f32 %v4447_v11  ;;  %v4241_v18 = vld [vmem:[#allocation2 + $0x3d8] sm:$0xff] }
0x10be   :  { %vm2237_vm12 = vmor %vm2235_vm9, %vm2236_vm1  ;;  %vm5341_vm1 = vcmask 785408  }
0x10bf   :  { %v2231_v43 = vmul.f32 %v4447_v11, %v2230_v35  ;;  %v4250_v35 = vld [vmem:[#allocation2 + $0x420] sm:$0xff]  ;;  %vm5342_vm9 = vmmov %vm5339_vm15 }
0x10c1   :  { %v2232_v53 = vmul.f32 0.5, %v2231_v43  ;;  %v2302_v43 = vrot.slane %v4895_v27, 1 }
0x10c3   :  { %v2233_v29 = vsub.f32 1.5, %v2232_v53  ;;  %v4239_v53 = vld [vmem:[#allocation2 + $0x3c8] sm:$0xff] }
0x10c5   :  { %v2234_v37 = vmul.f32 %v4447_v11, %v2233_v29 }
0x10c7   :  { %v2238_v28 = vsel %vm2237_vm12, %v4447_v11, %v2234_v37  ;;  %v4240_v11 = vld [vmem:[#allocation2 + $0x3d0] sm:$0xff]  ;;  %v2303_v37 = vsel %vm4865_vm11, 0.0, %v2302_v43  ;;  %vm5343_vm12 = vmmov %vm5342_vm9 }
0x10c8   :  { %v2240_v46 = vmul.f32 %v2238_v28, %v2105_v15  ;;  %v4244_v15 = vld [vmem:[#allocation2 + $0x3f0] sm:$0xff] }
0x10c9   :  { %2454 = vmatpush.bf16.msra.mxu1 %v4244_v15 }
0x10ca   :  { %v2241_v13 = vperm.slane %v2240_v46, 1 }
0x10cc   :  { %v2242_v54 = vmul.f32 %v2241_v13, %v2239_v34 }
0x10cd   :  { %2455 = vmatpush.bf16.msra.mxu1 %v4243_v32 }
0x10ce   :  { %v2244_v30 = vadd.f32 %v2243_v38, %v2242_v54  ;;  %v4238_v38 = vld [vmem:[#allocation2 + $0x3c0] sm:$0xff] }
0x10d0   :  { %v2245_v49 = vmax.f32 %v2244_v30, 0.0  ;;  %v4249_v30 = vld [vmem:[#allocation2 + $0x418] sm:$0xff] }
0x10d1   :  { %2456 = vmatpush.bf16.msra.mxu1 %v4242_v16 }
0x10d2   :  { %v2246_v51 = vpack.c.bf16 %v2245_v49, %v2245_v49  ;;  %v4237_v49 = vld [vmem:[#allocation2 + $0x3b8] sm:$0xff] }
0x10d4   :  { %v2250_v48 = vsel %vm5337_vm4, %v2246_v51, 0  ;;  %v2300_v51 = vrot.slane %v4895_v27, 7 }
0x10d5   :  { %2259 = vmatpush.bf16.msra.mxu2 %v2250_v48  ;;  %2457 = vmatpush.bf16.msra.mxu1 %v4241_v18  ;;  %v2306_v48 = vpop.permute.xlu2 %2305 }
0x10d8   :  { %3961 = vmatmul.msk.bf16.vlgmr.msra.gmra.mxu2 %vm961_vm14, %v4962_v41  ;;  %v4251_v41 = vld [vmem:[#allocation2 + $0x428] sm:$0xff]  ;;  %vm5338_vm14 = vmmov %vm5335_vm7 }
0x10d9   :  { %2471 = vmatpush.bf16.msrb.mxu2 %v4248_v47  ;;  %2371 = vmatpush.bf16.msrb.mxu0 %v4251_v41 }
0x10da   :  { %2458 = vmatpush.bf16.msra.mxu1 %v4240_v11 }
0x10dd   :  { %2472 = vmatpush.bf16.msrb.mxu2 %v4247_v42  ;;  %2372 = vmatpush.bf16.msrb.mxu0 %v4250_v35  ;;  %v2481_v35 = vperm.slane %v2480_v14, 0 }
0x10de   :  { %2459 = vmatpush.bf16.msra.mxu1 %v4239_v53 }
0x10e1   :  { %2473 = vmatpush.bf16.msrb.mxu2 %v4246_v4  ;;  %2373 = vmatpush.bf16.msrb.mxu0 %v4249_v30  ;;  %v2301_v4 = vsel %vm4873_vm3, 0.0, %v2300_v51 }
0x10e2   :  { %2460 = vmatpush.bf16.msra.mxu1 %v4238_v38  ;;  %v2312_v3 = vsel %vm5339_vm15, %v2301_v4, %v2306_v48 }
0x10e5   :  { %2474 = vmatpush.bf16.msrb.mxu2 %v4245_v58 }
0x10e6   :  { %2461 = vmatpush.bf16.msra.mxu1 %v4237_v49 }
0x115b   :  { %v2261_v29 = vpop.f32.mrf.mxu2 }
0x115c   :  { %v2267_v28 = vrot.slane %v2261_v29, 1  ;;  %v4328_v46 = vpack.i.bf16 %v2303_v37, %v2261_v29  ;;  %v2265_v47 = vrot.slane %v2261_v29, 7 }
0x115e   :  { %v2268_v34 = vsel %vm4865_vm11, 0.0, %v2267_v28  ;;  %4329 = vrot.lane.b32.xlu0 %v4328_v46, %s4513_s20  ;;  %v2266_v19 = vsel %vm4873_vm3, 0.0, %v2265_v47 }
0x115f   :  { %v2275_v13 = vpack.c.bf16 %v2268_v34, %v2268_v34 }
0x1161   :  { %4035 = vmatmul.msk.bf16.vlgmr.msrb.gmra.mxu2 %vm5338_vm14, %v2275_v13 }
0x1163   :  { %v2263_v54 = vpop.f32.mrf.mxu2 }
0x1166   :  { %4334 = vrot.lane.b32.xlu0 %v4333_v63, %s4519_s0 }
0x11d0   :  { %v4330_v42 = vpop.permute.xlu0 %4329 }
0x11d1   :  { %v4332_v58 = vunpack.i.h.bf16 %v4330_v42  ;;  %v4331_v15 = vunpack.i.l.bf16 %v4330_v42 }
0x11d3   :  { %v2313_v24 = vsel %vm5340_vm8, %v2312_v3, %v4332_v58  ;;  %v2273_v63 = vsel %vm5335_vm7, %v2266_v19, %v4331_v15  ;;  %vm5345_vm8 = vmmov %vm5335_vm7 }
0x11d4   :  { %v2314_v32 = vpack.c.bf16 %v2313_v24, %v2313_v24  ;;  %v2274_v2 = vpack.c.bf16 %v2273_v63, %v2273_v63  ;;  %vm5346_vm7 = vmmov %vm5341_vm1 }
0x11d6   :  { %3986 = vmatmul.msk.bf16.vlgmr.msrb.gmra.mxu0 %vm5341_vm1, %v2314_v32  ;;  %2462 = vmatmul.bf16.vlgmr.msra.gmra.mxu1 %v2274_v2 }
0x11e4   :  { %v2476_v27 = vpop.f32.mrf.mxu2 }
0x11ec   :  { %v2478_v16 = vpop.f32.mrf.mxu2 }
0x1253   :  { %v2375_v18 = vpop.f32.mrf.mxu0  ;;  %v2463_v41 = vpop.f32.mrf.mxu1 }
0x1254   :  { %v2464_v11 = vadd.f32 %v2463_v41, %v2375_v18 }
0x1256   :  { %v2477_v43 = vadd.f32 %v2476_v27, %v2464_v11 }
0x1258   :  { %v2482_v53 = vadd.f32 %v2481_v35, %v2477_v43 }
0x125a   :  { %v2483_v29 = vsel %vm5342_vm9, %v2482_v53, 0.0  ;;  %v2491_v37 = vmul.f32 %v2482_v53, %v2482_v53 }
0x125b   :  { %v2484_v28 = vrot.slane %v2483_v29, 4  ;;  %v2377_v46 = vpop.f32.mrf.mxu0  ;;  %v2465_v38 = vpop.f32.mrf.mxu1 }
0x125c   :  { %v2492_v34 = vsel %vm5343_vm12, %v2491_v37, 0.0  ;;  %v2518_v46 = vperm.slane %v2480_v14, 2  ;;  %vm5349_vm12 = vmmov %vm5342_vm9 }
0x125d   :  { %v2485_v13 = vadd.f32 %v2484_v28, %v2483_v29  ;;  %v2493_v54 = vrot.slane %v2492_v34, 4 }
0x125f   :  { %v2486_v30 = vrot.slane %v2485_v13, 2  ;;  %v2494_v49 = vadd.f32 %v2493_v54, %v2492_v34 }
0x1261   :  { %v2487_v51 = vadd.f32 %v2486_v30, %v2485_v13  ;;  %v2495_v47 = vrot.slane %v2494_v49, 2 }
0x1263   :  { %v2496_v48 = vadd.f32 %v2495_v47, %v2494_v49  ;;  %v2488_v42 = vrot.slane %v2487_v51, 1  ;;  %v4260_v49 = vld [vmem:[#allocation2 + $0x470] sm:$0xff] }
0x1264   :  { %2591 = vmatpush.bf16.msra.mxu3 %v4260_v49  ;;  %v4256_v47 = vld [vmem:[#allocation2 + $0x450] sm:$0xff] }
0x1265   :  { %v2497_v4 = vrot.slane %v2496_v48, 1  ;;  %v2489_v58 = vadd.f32 %v2488_v42, %v2487_v51  ;;  %v4259_v51 = vld [vmem:[#allocation2 + $0x468] sm:$0xff]  ;;  %v4269_v42 = vld [vmem:[#allocation2 + $0x4b8] sm:$0xff] }
0x1266   :  { %2775 = vmatpush.bf16.msra.mxu2 %v4269_v42 }
0x1267   :  { %v2498_v15 = vadd.f32 %v2497_v4, %v2496_v48  ;;  %v2490_v3 = vmul.f32 0.125, %v2489_v58  ;;  %v4255_v48 = vld [vmem:[#allocation2 + $0x448] sm:$0xff] }
0x1268   :  { %2592 = vmatpush.bf16.msra.mxu3 %v4259_v51  ;;  %v4267_v4 = vld [vmem:[#allocation2 + $0x4a8] sm:$0xff] }
0x1269   :  { %v2499_v19 = vmul.f32 0.125, %v2498_v15  ;;  %v2500_v24 = vmul.f32 %v2490_v3, %v2490_v3  ;;  %v2514_v37 = vsub.f32 %v2482_v53, %v2490_v3  ;;  %v4258_v53 = vld [vmem:[#allocation2 + $0x460] sm:$0xff] }
0x126a   :  { %2776 = vmatpush.bf16.msra.mxu2 %v4268_v22 }
0x126b   :  { %v2501_v63 = vsub.f32 %v2499_v19, %v2500_v24 }
0x126c   :  { %2593 = vmatpush.bf16.msra.mxu3 %v4258_v53 }
0x126d   :  { %v2502_v32 = vmax.f32 %v2501_v63, 0.0  ;;  %v4335_v63 = vpop.permute.xlu0 %4334 }
0x126e   :  { %2777 = vmatpush.bf16.msra.mxu2 %v4267_v4 }
0x126f   :  { %v2503_v2 = vadd.f32 1e-05, %v2502_v32 }
0x1271   :  { %4448 = vrsqrt.f32 %v2503_v2  ;;  %vm2510_vm14 = vweird.f32 %v2503_v2 }
0x1277   :  { %v4449_v27 = vpop.eup %4448 }
0x1278   :  { %v2505_v16 = vmul.f32 %v4449_v27, %v2503_v2  ;;  %vm2511_vm4 = vweird.f32 %v4449_v27  ;;  %v4337_v2 = vunpack.i.h.bf16 %v4335_v63 }
0x1279   :  { %vm2512_vm15 = vmor %vm2510_vm14, %vm2511_vm4  ;;  %vm5350_vm4 = vcmask 392192  }
0x127a   :  { %v2506_v18 = vmul.f32 %v4449_v27, %v2505_v16  ;;  %vm5351_vm14 = vmmov %vm5342_vm9 }
0x127c   :  { %v2507_v41 = vmul.f32 0.5, %v2506_v18  ;;  %v2714_v18 = vsel %vm4774_vm6, 0.0, %v4848_v8 }
0x127e   :  { %v2508_v11 = vsub.f32 1.5, %v2507_v41 }
0x1280   :  { %v2509_v35 = vmul.f32 %v4449_v27, %v2508_v11 }
0x1282   :  { %v2513_v43 = vsel %vm2512_vm15, %v4449_v27, %v2509_v35  ;;  %v4336_v27 = vunpack.i.l.bf16 %v4335_v63  ;;  %vm5352_vm15 = vmmov %vm5342_vm9 }
0x1283   :  { %v2515_v29 = vmul.f32 %v2513_v43, %v2480_v14  ;;  %v4257_v14 = vld [vmem:[#allocation2 + $0x458] sm:$0xff] }
0x1284   :  { %2594 = vmatpush.bf16.msra.mxu3 %v4257_v14 }
0x1285   :  { %v2516_v28 = vperm.slane %v2515_v29, 1 }
0x1287   :  { %v2517_v38 = vmul.f32 %v2516_v28, %v2514_v37 }
0x1288   :  { %2595 = vmatpush.bf16.msra.mxu3 %v4256_v47 }
0x1289   :  { %v2519_v34 = vadd.f32 %v2518_v46, %v2517_v38  ;;  %v2548_v46 = vld [vmem:[#allocation4 + $0x68] sm:$0xff] }
0x128a   :  { %v2549_v38 = vperm.slane %v2548_v46, 0 }
0x128b   :  { %v2520_v13 = vmax.f32 %v2519_v34, 0.0 }
0x128c   :  { %2596 = vmatpush.bf16.msra.mxu3 %v4255_v48 }
0x128d   :  { %2526 = vrot.lane.b32.xlu1 %v2520_v13, %s4521_s28  ;;  %v2523_v54 = vrot.slane %v2520_v13, 1  ;;  %v2521_v58 = vrot.slane %v2520_v13, 7 }
0x128f   :  { %v2524_v30 = vsel %vm4865_vm11, 0.0, %v2523_v54  ;;  %v2522_v15 = vsel %vm4873_vm3, 0.0, %v2521_v58  ;;  %vm5344_vm11 = vmmov %vm5342_vm9  ;;  %vm5347_vm3 = vcmask 130048  }
0x1290   :  { %2530 = vrot.lane.b32.xlu2 %v2524_v30, %s4513_s20  ;;  %v2739_v35 = vsel %vm5347_vm3, %v2715_v45, %v4337_v2  ;;  %vm5348_vm1 = vmmov %vm5347_vm3 }
0x1291   :  { %v2738_v43 = vsel %vm5348_vm1, %v2714_v18, %v4336_v27  ;;  %vm5353_vm1 = vcmask 1043456  }
0x1295   :  { %4339 = vrot.lane.b32.xlu1 %v4862_v9, %s4521_s28 }
0x12ea   :  { %v2531_v3 = vpop.permute.xlu2 %2530 }
0x12ff   :  { %v2527_v9 = vpop.permute.xlu1 %2526 }
0x1300   :  { %v2533_v19 = vsel %vm5344_vm11, %v2522_v15, %v2527_v9 }
0x1301   :  { %v2534_v24 = vsel %vm5345_vm8, %v2533_v19, %v2531_v3 }
0x1302   :  { %v2535_v32 = vpack.c.bf16 %v2534_v24, %v2534_v24 }
0x1304   :  { %4060 = vmatmul.msk.bf16.vlgmr.msra.gmra.mxu3 %vm5346_vm7, %v2535_v32 }
0x1307   :  { %v4340_v16 = vpop.permute.xlu1 %4339 }
0x1308   :  { %v4342_v41 = vunpack.i.h.bf16 %v4340_v16  ;;  %v4341_v11 = vunpack.i.l.bf16 %v4340_v16 }
0x130a   :  { %v2741_v29 = vsel %vm5342_vm9, %v2739_v35, %v4342_v41  ;;  %v2740_v37 = vsel %vm5349_vm12, %v2738_v43, %v4341_v11  ;;  %vm5354_vm9 = vcmask 64512   ;;  %vm5355_vm12 = vcmp.lt.s32.totalorder %v4578_v61, 7 }
0x130b   :  { %v2742_v28 = vpack.c.bf16 %v2741_v29, %v2740_v37 }
0x130d   :  { %4074 = vmatmul.msk.bf16.vlgmr.msra.gmra.mxu2 %vm5350_vm4, %v2742_v28  ;;  %v2637_v28 = vperm.slane %v2548_v46, 2  ;;  %vm5356_vm4 = vmmov %vm5355_vm12 }
0x1387   :  { %v2598_v8 = vpop.f32.mrf.mxu3 }
0x1388   :  { %v2599_v34 = vadd.f32 %v2598_v8, %v2549_v38  ;;  %v2640_v38 = vshra.s32 %v4586_v12, 1 }
0x138a   :  { %v2602_v13 = vsel %vm5351_vm14, %v2599_v34, 0.0  ;;  %v2610_v6 = vmul.f32 %v2599_v34, %v2599_v34  ;;  %vm2641_vm3 = vcmp.eq.s32.totalorder %v4671_v20, %v2640_v38  ;;  %vm5357_vm14 = vcmp.lt.s32.totalorder %v4578_v61, 1 }
0x138b   :  { %v2603_v54 = vrot.slane %v2602_v13, 4 }
0x138c   :  { %v2611_v30 = vsel %vm5352_vm15, %v2610_v6, 0.0  ;;  %vm5358_vm15 = vmmov %vm5357_vm14 }
0x138d   :  { %v2604_v49 = vadd.f32 %v2603_v54, %v2602_v13  ;;  %v2612_v51 = vrot.slane %v2611_v30, 4  ;;  %v2642_v54 = vsel %vm2641_vm3, 1.0, %v4520_v40 }
0x138f   :  { %v2605_v53 = vrot.slane %v2604_v49, 2  ;;  %v2613_v14 = vadd.f32 %v2612_v51, %v2611_v30  ;;  %v2600_v47 = vpop.f32.mrf.mxu3  ;;  %v5044_v51 = vpack.c.bf16 %v2642_v54, %v4957_v17 }
0x1391   :  { %v2606_v48 = vadd.f32 %v2605_v53, %v2604_v49  ;;  %v2614_v42 = vrot.slane %v2613_v14, 2 }
0x1393   :  { %v2607_v22 = vrot.slane %v2606_v48, 1  ;;  %v2615_v4 = vadd.f32 %v2614_v42, %v2613_v14 }
0x1395   :  { %v2608_v58 = vadd.f32 %v2607_v22, %v2606_v48  ;;  %v2616_v9 = vrot.slane %v2615_v4, 1 }
0x1397   :  { %v2609_v15 = vmul.f32 0.125, %v2608_v58  ;;  %v2617_v3 = vadd.f32 %v2616_v9, %v2615_v4  ;;  %v4266_v4 = vld [vmem:[#allocation2 + $0x4a0] sm:$0xff]  ;;  %v4265_v58 = vld [vmem:[#allocation2 + $0x498] sm:$0xff]  ;;  %v4264_v9 = vld [vmem:[#allocation2 + $0x490] sm:$0xff] }
0x1399   :  { %v2618_v19 = vmul.f32 0.125, %v2617_v3  ;;  %v2619_v24 = vmul.f32 %v2609_v15, %v2609_v15  ;;  %v2633_v29 = vsub.f32 %v2599_v34, %v2609_v15  ;;  %v4263_v15 = vld [vmem:[#allocation2 + $0x488] sm:$0xff]  ;;  %v4262_v3 = vld [vmem:[#allocation2 + $0x480] sm:$0xff] }
0x139b   :  { %v2620_v63 = vsub.f32 %v2618_v19, %v2619_v24  ;;  %v4261_v19 = vld [vmem:[#allocation2 + $0x478] sm:$0xff] }
0x139d   :  { %v2621_v32 = vmax.f32 %v2620_v63, 0.0 }
0x139f   :  { %v2622_v2 = vadd.f32 1e-05, %v2621_v32 }
0x13a1   :  { %4450 = vrsqrt.f32 %v2622_v2  ;;  %vm2629_vm8 = vweird.f32 %v2622_v2 }
0x13a7   :  { %v4451_v27 = vpop.eup %4450 }
0x13a8   :  { %v2624_v16 = vmul.f32 %v4451_v27, %v2622_v2  ;;  %vm2630_vm11 = vweird.f32 %v4451_v27 }
0x13a9   :  { %vm2631_vm7 = vmor %vm2629_vm8, %vm2630_vm11  ;;  %vm5359_vm11 = vcmask 261120  }
0x13aa   :  { %v2625_v18 = vmul.f32 %v4451_v27, %v2624_v16  ;;  %vm5360_vm8 = vmmov %vm5359_vm11 }
0x13ac   :  { %v2626_v45 = vmul.f32 0.5, %v2625_v18 }
0x13ae   :  { %v2627_v41 = vsub.f32 1.5, %v2626_v45 }
0x13b0   :  { %v2628_v11 = vmul.f32 %v4451_v27, %v2627_v41 }
0x13b2   :  { %v2632_v35 = vsel %vm2631_vm7, %v4451_v27, %v2628_v11  ;;  %vm5361_vm7 = vcmask 523264  }
0x13b3   :  { %v2634_v43 = vmul.f32 %v2632_v35, %v2548_v46  ;;  %vm5362_vm3 = vmmov %vm5361_vm7 }
0x13b5   :  { %v2635_v37 = vperm.slane %v2634_v43, 1 }
0x13b7   :  { %v2636_v8 = vmul.f32 %v2635_v37, %v2633_v29 }
0x13b9   :  { %v2638_v13 = vadd.f32 %v2637_v28, %v2636_v8  ;;  %v2779_v28 = vpop.f32.mrf.mxu2  ;;  %v2837_v8 = vld [vmem:[#allocation4 + $0x70] sm:$0xff] }
0x13bb   :  { %v2639_v6 = vmax.f32 %v2638_v13, 0.0 }
0x13bd   :  { %v2644_v30 = vpack.c.bf16 %v2639_v6, %v2639_v6  ;;  %v2838_v6 = vperm.slane %v2837_v8, 0 }
0x13bf   :  { %v2649_v49 = vsel %vm5353_vm1, %v2644_v30, 0  ;;  %vm5363_vm1 = vcmask 785408  }
0x13c0   :  { %2658 = vmatpush.bf16.msra.mxu0 %v2649_v49 }
0x13c1   :  { %v2781_v30 = vpop.f32.mrf.mxu2 }
0x13c3   :  { %4061 = vmatmul.msk.bf16.vlgmr.msra.gmra.mxu0 %vm5354_vm9, %v5044_v51  ;;  %vm5364_vm9 = vcmask 130048  }
0x13c4   :  { %2825 = vmatpush.bf16.msrb.mxu0 %v4266_v4 }
0x13c8   :  { %2826 = vmatpush.bf16.msrb.mxu0 %v4265_v58 }
0x13cc   :  { %2827 = vmatpush.bf16.msrb.mxu0 %v4264_v9 }
0x13d0   :  { %2828 = vmatpush.bf16.msrb.mxu0 %v4263_v15 }
0x13d4   :  { %2829 = vmatpush.bf16.msrb.mxu0 %v4262_v3 }
0x13d8   :  { %2830 = vmatpush.bf16.msrb.mxu0 %v4261_v19 }
0x1440   :  { %v2660_v46 = vpop.f32.mrf.mxu0 }
0x1441   :  { %v2671_v12 = vrot.slane %v2660_v46, 1  ;;  %v2665_v32 = vrot.slane %v2660_v46, 7 }
0x1448   :  { %v2662_v34 = vpop.f32.mrf.mxu0 }
0x1449   :  { %v4343_v53 = vpack.i.bf16 %v2662_v34, %v2660_v46  ;;  %v2672_v14 = vrot.slane %v2662_v34, 1  ;;  %v2666_v24 = vrot.slane %v2662_v34, 7 }
0x144b   :  { %4344 = vrot.lane.b32.xlu2 %v4343_v53, %s4521_s28  ;;  %v2673_v47 = vsel %vm5355_vm12, %v2671_v12, %v2672_v14  ;;  %v2674_v48 = vsel %vm5356_vm4, %v2672_v14, %v2671_v12  ;;  %v2667_v2 = vsel %vm5357_vm14, %v2665_v32, %v2666_v24  ;;  %v2668_v25 = vsel %vm5358_vm15, %v2666_v24, %v2665_v32  ;;  %vm5365_vm12 = vmmov %vm5364_vm9 }
0x144c   :  { %v2675_v17 = vsel %vm4751_vm2, 0.0, %v2673_v47  ;;  %v2676_v42 = vsel %vm4755_vm5, 0.0, %v2674_v48  ;;  %v2669_v16 = vsel %vm4774_vm6, 0.0, %v2668_v25  ;;  %v2670_v18 = vsel %vm4778_vm0, 0.0, %v2667_v2  ;;  %vm5366_vm4 = vmmov %vm5364_vm9 }
0x144d   :  { %v4348_v22 = vpack.i.bf16 %v2676_v42, %v2675_v17  ;;  %vm5367_vm14 = vmmov %vm5366_vm4 }
0x144f   :  { %4349 = vrot.lane.b32.xlu0 %v4348_v22, %s4513_s20 }
0x1457   :  { %4364 = vrot.lane.b32.xlu0 %v4363_v44, %s4517_s1 }
0x14a5   :  { %v4345_v63 = vpop.permute.xlu2 %4344 }
0x14a6   :  { %v4347_v23 = vunpack.i.h.bf16 %v4345_v63  ;;  %v4346_v44 = vunpack.i.l.bf16 %v4345_v63 }
0x14a8   :  { %v2693_v11 = vsel %vm5359_vm11, %v2669_v16, %v4346_v44  ;;  %v2694_v35 = vsel %vm5360_vm8, %v2670_v18, %v4347_v23 }
0x14c1   :  { %v4350_v27 = vpop.permute.xlu0 %4349 }
0x14c2   :  { %v4352_v45 = vunpack.i.h.bf16 %v4350_v27  ;;  %v4351_v41 = vunpack.i.l.bf16 %v4350_v27 }
0x14c4   :  { %v2695_v43 = vsel %vm5361_vm7, %v2693_v11, %v4351_v41  ;;  %v2696_v29 = vsel %vm5362_vm3, %v2694_v35, %v4352_v45  ;;  %vm5368_vm7 = vcmp.lt.s32.totalorder %v4578_v61, 1 }
0x14c5   :  { %v2697_v37 = vpack.c.bf16 %v2696_v29, %v2695_v43  ;;  %vm5369_vm3 = vmmov %vm5368_vm7 }
0x14c7   :  { %4099 = vmatmul.msk.bf16.vlgmr.msrb.gmra.mxu0 %vm5363_vm1, %v2697_v37  ;;  %vm5370_vm1 = vcmp.lt.s32.totalorder %v4578_v61, 7 }
0x1544   :  { %v2832_v38 = vpop.f32.mrf.mxu0 }
0x1545   :  { %v2833_v13 = vadd.f32 %v2832_v38, %v2779_v28 }
0x1547   :  { %v2839_v54 = vadd.f32 %v2838_v6, %v2833_v13 }
0x1549   :  { %v2851_v34 = vmul.f32 %v2839_v54, %v2839_v54  ;;  %v2841_v53 = vsel %vm5364_vm9, %v2839_v54, 0.0  ;;  %vm5371_vm9 = vmmov %vm5370_vm1 }
0x154b   :  { %v2853_v17 = vsel %vm5366_vm4, %v2851_v34, 0.0 }
0x154c   :  { %v2834_v49 = vpop.f32.mrf.mxu0 }
0x154d   :  { %v2835_v46 = vadd.f32 %v2834_v49, %v2781_v30 }
0x154f   :  { %v2840_v12 = vadd.f32 %v2838_v6, %v2835_v46  ;;  %v2883_v6 = vperm.slane %v2837_v8, 2 }
0x1551   :  { %v2842_v14 = vsel %vm5365_vm12, %v2840_v12, 0.0  ;;  %v2852_v47 = vmul.f32 %v2840_v12, %v2840_v12  ;;  %vm5374_vm12 = vmmov %vm5366_vm4 }
0x1552   :  { %v2843_v48 = vadd.f32 %v2842_v14, %v2841_v53 }
0x1553   :  { %v2854_v42 = vsel %vm5367_vm14, %v2852_v47, 0.0 }
0x1554   :  { %v2844_v22 = vrot.slane %v2843_v48, 4  ;;  %v2855_v4 = vadd.f32 %v2854_v42, %v2853_v17 }
0x1556   :  { %v2845_v58 = vadd.f32 %v2844_v22, %v2843_v48  ;;  %v2856_v9 = vrot.slane %v2855_v4, 4 }
0x1558   :  { %v2846_v15 = vrot.slane %v2845_v58, 2  ;;  %v2857_v3 = vadd.f32 %v2856_v9, %v2855_v4 }
0x155a   :  { %v2847_v19 = vadd.f32 %v2846_v15, %v2845_v58  ;;  %v2858_v24 = vrot.slane %v2857_v3, 2 }
0x155c   :  { %v2848_v63 = vrot.slane %v2847_v19, 1  ;;  %v2859_v32 = vadd.f32 %v2858_v24, %v2857_v3 }
0x155e   :  { %v2849_v2 = vadd.f32 %v2848_v63, %v2847_v19  ;;  %v2860_v25 = vrot.slane %v2859_v32, 1  ;;  %v4272_v63 = vld [vmem:[#allocation2 + $0x4d0] sm:$0xff] }
0x155f   :  { %2955 = vmatpush.bf16.msrb.mxu1 %v4272_v63 }
0x1560   :  { %v2850_v23 = vmul.f32 0.0625, %v2849_v2  ;;  %v2861_v44 = vadd.f32 %v2860_v25, %v2859_v32  ;;  %v4271_v32 = vld [vmem:[#allocation2 + $0x4c8] sm:$0xff]  ;;  %v4270_v2 = vld [vmem:[#allocation2 + $0x4c0] sm:$0xff]  ;;  %v3189_v25 = vunpack.c.l.b16 %v3183_v36 }
0x1562   :  { %v2862_v27 = vmul.f32 0.0625, %v2861_v44  ;;  %v2863_v16 = vmul.f32 %v2850_v23, %v2850_v23  ;;  %v2878_v30 = vsub.f32 %v2840_v12, %v2850_v23  ;;  %v2877_v46 = vsub.f32 %v2839_v54, %v2850_v23  ;;  %v4276_v44 = vld [vmem:[#allocation2 + $0x4f0] sm:$0xff] }
0x1563   :  { %2956 = vmatpush.bf16.msrb.mxu1 %v4271_v32  ;;  %v3191_v21 = vpack.c.b16 %v3189_v25, %v3189_v25 }
0x1564   :  { %v2864_v18 = vsub.f32 %v2862_v27, %v2863_v16 }
0x1566   :  { %v2865_v45 = vmax.f32 %v2864_v18, 0.0 }
0x1567   :  { %2957 = vmatpush.bf16.msrb.mxu1 %v4270_v2 }
0x1568   :  { %v2866_v41 = vadd.f32 1e-05, %v2865_v45 }
0x156a   :  { %4452 = vrsqrt.f32 %v2866_v41  ;;  %vm2873_vm11 = vweird.f32 %v2866_v41 }
0x1570   :  { %v4453_v11 = vpop.eup %4452 }
0x1571   :  { %v2868_v35 = vmul.f32 %v4453_v11, %v2866_v41  ;;  %vm2874_vm15 = vweird.f32 %v4453_v11  ;;  %v4365_v41 = vpop.permute.xlu0 %4364 }
0x1572   :  { %vm2875_vm8 = vmor %vm2873_vm11, %vm2874_vm15  ;;  %vm5377_vm15 = vcmask 392192  }
0x1573   :  { %v2869_v43 = vmul.f32 %v4453_v11, %v2868_v35 }
0x1575   :  { %v2870_v29 = vmul.f32 0.5, %v2869_v43 }
0x1577   :  { %v2871_v37 = vsub.f32 1.5, %v2870_v29 }
0x1579   :  { %v2872_v28 = vmul.f32 %v4453_v11, %v2871_v37 }
0x157b   :  { %v2876_v38 = vsel %vm2875_vm8, %v4453_v11, %v2872_v28  ;;  %v4367_v28 = vunpack.i.h.bf16 %v4365_v41 }
0x157c   :  { %v2879_v13 = vmul.f32 %v2876_v38, %v2837_v8  ;;  %v4366_v38 = vunpack.i.l.bf16 %v4365_v41 }
0x157e   :  { %v2880_v49 = vperm.slane %v2879_v13, 1 }
0x1580   :  { %v2882_v34 = vmul.f32 %v2880_v49, %v2878_v30  ;;  %v2881_v53 = vmul.f32 %v2880_v49, %v2877_v46 }
0x1582   :  { %v2884_v14 = vadd.f32 %v2883_v6, %v2881_v53  ;;  %v2885_v47 = vadd.f32 %v2883_v6, %v2882_v34 }
0x1584   :  { %v2886_v48 = vmax.f32 %v2884_v14, 0.0  ;;  %v2887_v17 = vmax.f32 %v2885_v47, 0.0  ;;  %v2927_v14 = vld [vmem:[#allocation4 + $0x78] sm:$0xff] }
0x1586   :  { %v2889_v42 = vrot.slane %v2887_v17, 7  ;;  %v4353_v22 = vpack.i.bf16 %v2887_v17, %v2886_v48  ;;  %v2888_v4 = vrot.slane %v2886_v48, 7  ;;  %v2894_v58 = vrot.slane %v2886_v48, 1 }
0x1587   :  { %v2895_v9 = vrot.slane %v2887_v17, 1  ;;  %v2928_v48 = vperm.slane %v2927_v14, 0 }
0x1588   :  { %4354 = vrot.lane.b32.xlu1 %v4353_v22, %s4519_s0  ;;  %v2890_v15 = vsel %vm5368_vm7, %v2888_v4, %v2889_v42  ;;  %v2891_v8 = vsel %vm5369_vm3, %v2889_v42, %v2888_v4  ;;  %vm5382_vm7 = vcmask 195584  }
0x1589   :  { %v2896_v54 = vsel %vm5370_vm1, %v2894_v58, %v2895_v9  ;;  %v2897_v12 = vsel %vm5371_vm9, %v2895_v9, %v2894_v58  ;;  %v2893_v45 = vsel %vm4778_vm0, 0.0, %v2890_v15  ;;  %vm5378_vm0 = vcmask 64512  }
0x158a   :  { %v2898_v3 = vsel %vm4751_vm2, 0.0, %v2896_v54  ;;  %v2899_v19 = vsel %vm4755_vm5, 0.0, %v2897_v12  ;;  %vm5372_vm2 = vcmask 1043456   ;;  %vm5373_vm5 = vmmov %vm5366_vm4  ;;  %vm5375_vm4 = vcmask 261120  }
0x158b   :  { %v4358_v24 = vpack.i.bf16 %v2899_v19, %v2898_v3  ;;  %v3200_v23 = vsel %vm5372_vm2, %v3191_v21, 0  ;;  %vm5376_vm14 = vmmov %vm5375_vm4  ;;  %v3172_v30 = vsel %vm5378_vm0, %v4707_v56, %v4367_v28  ;;  %v3006_v28 = vperm.slane %v2927_v14, 2 }
0x158c   :  { %3208 = vmatpush.bf16.msrb.mxu3 %v3200_v23  ;;  %vm5380_vm11 = vmmov %vm5373_vm5 }
0x158d   :  { %4359 = vrot.lane.b32.xlu2 %v4358_v24, %s4521_s28  ;;  %vm5381_vm8 = vmmov %vm5373_vm5 }
0x158e   :  { %vm5383_vm3 = vmmov %vm5373_vm5 }
0x158f   :  { %vm5384_vm1 = vmmov %vm5383_vm3 }
0x1590   :  { %4369 = vrot.lane.b32.xlu1 %v4734_v7, %s4519_s0  ;;  %3209 = vmatpush.bf16.msrb.mxu3 %v4276_v44  ;;  %vm5385_vm9 = vmmov %vm5384_vm1 }
0x1591   :  { %vm5386_vm2 = vmmov %vm5384_vm1 }
0x1598   :  { %4384 = vrot.lane.b32.xlu1 %v4383_v52, %s4517_s1  ;;  %v2892_v52 = vsel %vm4774_vm6, 0.0, %v2891_v8  ;;  %vm5379_vm6 = vmmov %vm5378_vm0 }
0x1599   :  { %v3171_v49 = vsel %vm5379_vm6, %v3123_v60, %v4366_v38  ;;  %vm5388_vm6 = vmmov %vm5384_vm1 }
0x15e7   :  { %v4360_v7 = vpop.permute.xlu2 %4359 }
0x15e8   :  { %v4362_v39 = vunpack.i.h.bf16 %v4360_v7  ;;  %v4361_v26 = vunpack.i.l.bf16 %v4360_v7 }
0x15fa   :  { %v4355_v27 = vpop.permute.xlu1 %4354 }
0x15fb   :  { %v4357_v16 = vunpack.i.h.bf16 %v4355_v27  ;;  %v4356_v18 = vunpack.i.l.bf16 %v4355_v27 }
0x15fd   :  { %v2916_v11 = vsel %vm5373_vm5, %v2892_v52, %v4356_v18  ;;  %v2917_v35 = vsel %vm5374_vm12, %v2893_v45, %v4357_v16 }
0x15fe   :  { %v2918_v43 = vsel %vm5375_vm4, %v2916_v11, %v4361_v26  ;;  %v2919_v29 = vsel %vm5376_vm14, %v2917_v35, %v4362_v39  ;;  %vm5387_vm14 = vmmov %vm5384_vm1 }
0x15ff   :  { %v2920_v37 = vpack.c.bf16 %v2919_v29, %v2918_v43 }
0x1601   :  { %4112 = vmatmul.msk.bf16.vlgmr.msrb.gmra.mxu1 %vm5377_vm15, %v2920_v37 }
0x1602   :  { %v4370_v13 = vpop.permute.xlu1 %4369 }
0x1603   :  { %v4372_v62 = vunpack.i.h.bf16 %v4370_v13  ;;  %v4371_v6 = vunpack.i.l.bf16 %v4370_v13 }
0x1605   :  { %v3176_v46 = vsel %vm5380_vm11, %v3172_v30, %v4372_v62  ;;  %v3175_v34 = vsel %vm5381_vm8, %v3171_v49, %v4371_v6  ;;  %vm5389_vm11 = vcmp.lt.s32.totalorder %v4578_v61, 1 }
0x1606   :  { %v3179_v53 = vpack.c.bf16 %v3176_v46, %v3175_v34  ;;  %vm5390_vm8 = vmmov %vm5389_vm11 }
0x1608   :  { %4119 = vmatmul.msk.bf16.vlgmr.msrb.gmra.mxu3 %vm5382_vm7, %v3179_v53  ;;  %vm5391_vm7 = vcmp.lt.s32.totalorder %v4578_v61, 7 }
0x167e   :  { %v2959_v47 = vpop.f32.mrf.mxu1 }
0x167f   :  { %v2960_v17 = vadd.f32 %v2959_v47, %v2928_v48  ;;  %v3011_v47 = vshra.s32 %v4626_v50, 1 }
0x1681   :  { %v2974_v57 = vmul.f32 %v2960_v17, %v2960_v17  ;;  %v2964_v4 = vsel %vm5383_vm3, %v2960_v17, 0.0  ;;  %vm3013_vm15 = vcmp.eq.s32.totalorder %v4671_v20, %v3011_v47  ;;  %vm5392_vm3 = vmmov %vm5391_vm7 }
0x1683   :  { %v2976_v15 = vsel %vm5385_vm9, %v2974_v57, 0.0 }
0x1686   :  { %v2961_v42 = vpop.f32.mrf.mxu1 }
0x1687   :  { %v2962_v22 = vadd.f32 %v2961_v42, %v2928_v48  ;;  %v3012_v48 = vshra.s32 %v4583_v5, 1 }
0x1689   :  { %v2965_v56 = vsel %vm5384_vm1, %v2962_v22, 0.0  ;;  %v2975_v58 = vmul.f32 %v2962_v22, %v2962_v22  ;;  %vm3014_vm0 = vcmp.eq.s32.totalorder %v4671_v20, %v3012_v48  ;;  %vm5393_vm1 = vmmov %vm5392_vm3 }
0x168a   :  { %v2966_v9 = vadd.f32 %v2965_v56, %v2964_v4  ;;  %vm5394_vm9 = vmmov %vm5393_vm1 }
0x168b   :  { %v2977_v8 = vsel %vm5386_vm2, %v2975_v58, 0.0  ;;  %vm5395_vm2 = vnez %v5300_v31 }
0x168c   :  { %v2967_v54 = vrot.slane %v2966_v9, 4  ;;  %v2978_v12 = vadd.f32 %v2977_v8, %v2976_v15 }
0x168e   :  { %v2968_v3 = vadd.f32 %v2967_v54, %v2966_v9  ;;  %v2979_v19 = vrot.slane %v2978_v12, 4 }
0x1690   :  { %v2969_v24 = vrot.slane %v2968_v3, 2  ;;  %v2980_v63 = vadd.f32 %v2979_v19, %v2978_v12 }
0x1692   :  { %v2970_v32 = vadd.f32 %v2969_v24, %v2968_v3  ;;  %v2981_v36 = vrot.slane %v2980_v63, 2 }
0x1694   :  { %v2971_v2 = vrot.slane %v2970_v32, 1  ;;  %v2982_v25 = vadd.f32 %v2981_v36, %v2980_v63 }
0x1696   :  { %v2972_v21 = vadd.f32 %v2971_v2, %v2970_v32  ;;  %v2983_v23 = vrot.slane %v2982_v25, 1 }
0x1698   :  { %v2973_v44 = vmul.f32 0.0625, %v2972_v21  ;;  %v2984_v7 = vadd.f32 %v2983_v23, %v2982_v25  ;;  %v4275_v25 = vld [vmem:[#allocation2 + $0x4e8] sm:$0xff]  ;;  %v4274_v21 = vld [vmem:[#allocation2 + $0x4e0] sm:$0xff] }
0x1699   :  { %3250 = vmatpush.bf16.msra.mxu1 %v4275_v25 }
0x169a   :  { %v2985_v27 = vmul.f32 0.0625, %v2984_v7  ;;  %v2986_v16 = vmul.f32 %v2973_v44, %v2973_v44  ;;  %v3000_v38 = vsub.f32 %v2960_v17, %v2973_v44  ;;  %v3001_v13 = vsub.f32 %v2962_v22, %v2973_v44  ;;  %v4385_v44 = vpop.permute.xlu1 %4384 }
0x169b   :  { %v3016_v17 = vsel %vm3014_vm0, 1.0, %v4520_v40  ;;  %v4387_v7 = vunpack.i.h.bf16 %v4385_v44  ;;  %vm5401_vm0 = vcmask 195584  }
0x169c   :  { %v2987_v18 = vsub.f32 %v2985_v27, %v2986_v16  ;;  %v4386_v27 = vunpack.i.l.bf16 %v4385_v44  ;;  %v4273_v16 = vld [vmem:[#allocation2 + $0x4d8] sm:$0xff] }
0x169d   :  { %3251 = vmatpush.bf16.msra.mxu1 %v4274_v21 }
0x169e   :  { %v2988_v39 = vmax.f32 %v2987_v18, 0.0 }
0x16a0   :  { %v2989_v26 = vadd.f32 1e-05, %v2988_v39 }
0x16a1   :  { %3252 = vmatpush.bf16.msra.mxu1 %v4273_v16 }
0x16a2   :  { %4454 = vrsqrt.f32 %v2989_v26  ;;  %vm2996_vm12 = vweird.f32 %v2989_v26 }
0x16a8   :  { %v4455_v52 = vpop.eup %4454 }
0x16a9   :  { %v2991_v45 = vmul.f32 %v4455_v52, %v2989_v26  ;;  %vm2997_vm5 = vweird.f32 %v4455_v52 }
0x16aa   :  { %vm2998_vm4 = vmor %vm2996_vm12, %vm2997_vm5  ;;  %vm5396_vm5 = vnez %v5304_v55  ;;  %vm5397_vm12 = vcmask 64512  }
0x16ab   :  { %v2992_v41 = vmul.f32 %v4455_v52, %v2991_v45  ;;  %v3125_v39 = vsel %vm5396_vm5, 0.0, %v4725_v1  ;;  %v3174_v45 = vsel %vm5397_vm12, %v4721_v0, %v4387_v7 }
0x16ad   :  { %v2993_v11 = vmul.f32 0.5, %v2992_v41 }
0x16af   :  { %v2994_v35 = vsub.f32 1.5, %v2993_v11 }
0x16b1   :  { %v2995_v43 = vmul.f32 %v4455_v52, %v2994_v35 }
0x16b3   :  { %v2999_v29 = vsel %vm2998_vm4, %v4455_v52, %v2995_v43  ;;  %vm5398_vm4 = vmmov %vm5397_vm12 }
0x16b4   :  { %v3002_v37 = vmul.f32 %v2999_v29, %v2927_v14  ;;  %v3015_v14 = vsel %vm3013_vm15, 1.0, %v4520_v40  ;;  %v3173_v41 = vsel %vm5398_vm4, %v3125_v39, %v4386_v27  ;;  %vm5400_vm15 = vmmov %vm5388_vm6 }
0x16b5   :  { %v3017_v42 = vpack.c.bf16 %v3016_v17, %v3015_v14 }
0x16b6   :  { %v3003_v60 = vperm.slane %v3002_v37, 1 }
0x16b8   :  { %v3004_v62 = vmul.f32 %v3003_v60, %v3000_v38  ;;  %v3005_v6 = vmul.f32 %v3003_v60, %v3001_v13 }
0x16ba   :  { %v3008_v30 = vadd.f32 %v3006_v28, %v3005_v6  ;;  %v3007_v49 = vadd.f32 %v3006_v28, %v3004_v62 }
0x16bc   :  { %v3009_v46 = vmax.f32 %v3007_v49, 0.0  ;;  %v3010_v34 = vmax.f32 %v3008_v30, 0.0 }
0x16be   :  { %v3018_v53 = vpack.c.bf16 %v3010_v34, %v3009_v46 }
0x16c0   :  { %3031 = vmatpush.bf16.msrb.mxu2 %v3018_v53 }
0x16c3   :  { %4113 = vmatmul.msk.bf16.vlgmr.msrb.gmra.mxu2 %vm5387_vm14, %v5044_v51  ;;  %vm5399_vm14 = vmmov %vm5388_vm6 }
0x16d3   :  { %4114 = vmatmul.msk.bf16.gmra.mxu2 %vm5388_vm6, %v3017_v42  ;;  %vm5402_vm6 = vmmov %vm5390_vm8 }
0x1746   :  { %v3033_v57 = vpop.f32.mrf.mxu2 }
0x1747   :  { %v3043_v4 = vrot.slane %v3033_v57, 7  ;;  %v3055_v15 = vrot.slane %v3033_v57, 1 }
0x174e   :  { %v3035_v22 = vpop.f32.mrf.mxu2 }
0x174f   :  { %v4373_v56 = vpack.i.bf16 %v3035_v22, %v3033_v57  ;;  %v3044_v51 = vrot.slane %v3035_v22, 7  ;;  %v3056_v5 = vrot.slane %v3035_v22, 1 }
0x1751   :  { %v3049_v50 = vsel %vm5389_vm11, %v3043_v4, %v3044_v51  ;;  %4374 = vrot.lane.b32.xlu2 %v4373_v56, %s4519_s0  ;;  %v3061_v54 = vsel %vm5392_vm3, %v3055_v15, %v3056_v5  ;;  %vm5403_vm11 = vmmov %vm5399_vm14 }
0x1756   :  { %v3038_v58 = vpop.f32.mrf.mxu2 }
0x1757   :  { %v3045_v20 = vrot.slane %v3038_v58, 7  ;;  %v3057_v9 = vrot.slane %v3038_v58, 1 }
0x1759   :  { %v3048_v40 = vsel %vm5390_vm8, %v3044_v51, %v3045_v20  ;;  %4389 = vrot.lane.b32.xlu2 %v4738_v10, %s4519_s0  ;;  %v3060_v8 = vsel %vm5391_vm7, %v3056_v5, %v3057_v9  ;;  %vm5404_vm8 = vmmov %vm5403_vm11  ;;  %vm5405_vm7 = vcmask 261120   ;;  %v3211_v5 = vpop.f32.mrf.mxu3 }
0x175a   :  { %v3064_v12 = vsel %vm4600_vm10, 0.0, %v3060_v8  ;;  %vm5406_vm3 = vmmov %vm5405_vm7  ;;  %v3053_v57 = vsel %vm5396_vm5, 0.0, %v3048_v40  ;;  %v5180_v8 = vld [vmem:[#allocation4 + $0x80] sm:$0xff] }
0x175b   :  { %v4378_v3 = vpack.i.bf16 %v3064_v12, %v3061_v54  ;;  %vm5409_vm12 = vmmov %vm5404_vm8  ;;  %v3265_v12 = vperm.slane %v5180_v8, 0 }
0x175c   :  { %vm5410_vm4 = vmmov %vm5404_vm8 }
0x175d   :  { %4379 = vrot.lane.b32.xlu0 %v4378_v3, %s4521_s28 }
0x175e   :  { %v3040_v19 = vpop.f32.mrf.mxu2 }
0x175f   :  { %v3058_v24 = vrot.slane %v3040_v19, 1  ;;  %v4393_v36 = vpack.i.bf16 %v3040_v19, %v3038_v58  ;;  %v3046_v29 = vrot.slane %v3040_v19, 7 }
0x1761   :  { %v3059_v63 = vsel %vm5393_vm1, %v3057_v9, %v3058_v24  ;;  %v3062_v10 = vsel %vm5394_vm9, %v3058_v24, %v3055_v15  ;;  %v3050_v37 = vsel %vm5402_vm6, %v3046_v29, %v3043_v4  ;;  %vm5407_vm1 = vcmask 392192   ;;  %vm5408_vm9 = vmmov %vm5402_vm6  ;;  %v3213_v9 = vpop.f32.mrf.mxu3 }
0x1762   :  { %v3066_v32 = vsel %vm5395_vm2, 0.0, %v3062_v10  ;;  %v3051_v13 = vsel %vm4634_vm13, 0.0, %v3050_v37  ;;  %v3047_v42 = vsel %vm5408_vm9, %v3045_v20, %v3046_v29  ;;  %vm5414_vm6 = vcmask 64512  }
0x1763   :  { %v4398_v2 = vpack.i.bf16 %v3066_v32, %v3059_v63 }
0x1765   :  { %4394 = vrot.lane.b32.xlu0 %v4393_v36, %s4519_s0  ;;  %4399 = vrot.lane.b32.xlu1 %v4398_v2, %s4521_s28 }
0x17ab   :  { %v4375_v23 = vpop.permute.xlu2 %4374 }
0x17ac   :  { %v4377_v1 = vunpack.i.h.bf16 %v4375_v23  ;;  %v4376_v28 = vunpack.i.l.bf16 %v4375_v23 }
0x17ae   :  { %v3099_v62 = vsel %vm5403_vm11, %v3051_v13, %v4376_v28  ;;  %v3100_v6 = vsel %vm5404_vm8, %v3049_v50, %v4377_v1  ;;  %vm5415_vm11 = vmmov %vm5414_vm6 }
0x17af   :  { %vm5416_vm8 = vmmov %vm5414_vm6 }
0x17b3   :  { %v4390_v18 = vpop.permute.xlu2 %4389 }
0x17b4   :  { %v4392_v26 = vunpack.i.h.bf16 %v4390_v18  ;;  %v4391_v52 = vunpack.i.l.bf16 %v4390_v18 }
0x17b6   :  { %v3178_v11 = vsel %vm5399_vm14, %v3174_v45, %v4392_v26  ;;  %v3177_v35 = vsel %vm5400_vm15, %v3173_v41, %v4391_v52  ;;  %vm5411_vm14 = vmmov %vm5406_vm3 }
0x17b7   :  { %v3180_v43 = vpack.c.bf16 %v3178_v11, %v3177_v35  ;;  %vm5412_vm15 = vmmov %vm5406_vm3 }
0x17b9   :  { %4120 = vmatmul.msk.bf16.gmra.mxu3 %vm5401_vm0, %v3180_v43  ;;  %vm5413_vm0 = vmmov %vm5407_vm1 }
0x17cf   :  { %v4380_v38 = vpop.permute.xlu0 %4379 }
0x17d0   :  { %v4382_v0 = vunpack.i.h.bf16 %v4380_v38  ;;  %v4381_v60 = vunpack.i.l.bf16 %v4380_v38 }
0x17d2   :  { %v3104_v30 = vsel %vm5405_vm7, %v3100_v6, %v4382_v0  ;;  %v3103_v49 = vsel %vm5406_vm3, %v3099_v62, %v4381_v60  ;;  %vm5417_vm7 = vmmov %vm5414_vm6 }
0x17d3   :  { %v3107_v46 = vpack.c.bf16 %v3104_v30, %v3103_v49  ;;  %vm5418_vm3 = vmmov %vm5414_vm6 }
0x17d5   :  { %4133 = vmatmul.msk.bf16.vlgmr.msra.gmra.mxu1 %vm5407_vm1, %v3107_v46  ;;  %vm5419_vm1 = vmmov %vm5418_vm3 }
0x17d6   :  { %vm5420_vm9 = vmmov %vm5419_vm1 }
0x17d7   :  { %v4395_v34 = vpop.permute.xlu0 %4394  ;;  %v4400_v53 = vpop.permute.xlu1 %4399 }
0x17d8   :  { %v4397_v47 = vunpack.i.h.bf16 %v4395_v34  ;;  %v4396_v48 = vunpack.i.l.bf16 %v4395_v34  ;;  %v4402_v14 = vunpack.i.h.bf16 %v4400_v53  ;;  %v4401_v17 = vunpack.i.l.bf16 %v4400_v53 }
0x17da   :  { %v3101_v22 = vsel %vm5409_vm12, %v3053_v57, %v4396_v48  ;;  %v3102_v4 = vsel %vm5410_vm4, %v3047_v42, %v4397_v47  ;;  %vm5421_vm12 = vmmov %vm5419_vm1 }
0x17db   :  { %v3105_v56 = vsel %vm5411_vm14, %v3101_v22, %v4401_v17  ;;  %v3106_v51 = vsel %vm5412_vm15, %v3102_v4, %v4402_v14 }
0x17dc   :  { %v3108_v50 = vpack.c.bf16 %v3106_v51, %v3105_v56 }
0x17e5   :  { %4134 = vmatmul.msk.bf16.gmra.mxu1 %vm5413_vm0, %v3108_v50  ;;  %vm5422_vm0 = vcmp.lt.s32.totalorder %v4578_v61, 1 }
0x183c   :  { %v3216_v54 = vpop.f32.mrf.mxu3 }
0x1844   :  { %v3218_v21 = vpop.f32.mrf.mxu3 }
0x1852   :  { %v3254_v58 = vpop.f32.mrf.mxu1 }
0x1853   :  { %v3255_v40 = vadd.f32 %v3254_v58, %v3211_v5 }
0x1855   :  { %v5185_v63 = vadd.f32 %v3265_v12, %v3255_v40 }
0x1857   :  { %v3284_v36 = vmul.f32 %v5185_v63, %v5185_v63  ;;  %v3270_v44 = vsel %vm5415_vm11, %v5185_v63, 0.0  ;;  %vm5424_vm11 = vcmp.lt.s32.totalorder %v4578_v61, 7 }
0x1859   :  { %v3288_v39 = vsel %vm5418_vm3, %v3284_v36, 0.0  ;;  %vm5427_vm3 = vmmov %vm5424_vm11 }
0x185a   :  { %v3256_v15 = vpop.f32.mrf.mxu1 }
0x185b   :  { %v3257_v20 = vadd.f32 %v3256_v15, %v3213_v9 }
0x185d   :  { %v5183_v19 = vadd.f32 %v3265_v12, %v3257_v20  ;;  %v3326_v20 = vperm.slane %v5180_v8, 2 }
0x185f   :  { %v3285_v32 = vmul.f32 %v5183_v19, %v5183_v19  ;;  %v3271_v2 = vsel %vm5414_vm6, %v5183_v19, 0.0  ;;  %vm5423_vm6 = vmmov %vm5422_vm0 }
0x1860   :  { %v3272_v18 = vadd.f32 %v3271_v2, %v3270_v44 }
0x1861   :  { %v3289_v7 = vsel %vm5416_vm8, %v3285_v32, 0.0  ;;  %vm5425_vm8 = vmmov %vm5422_vm0 }
0x1862   :  { %v3259_v3 = vpop.f32.mrf.mxu1  ;;  %v3290_v45 = vadd.f32 %v3289_v7, %v3288_v39 }
0x1863   :  { %v3260_v24 = vadd.f32 %v3259_v3, %v3216_v54 }
0x1865   :  { %v3268_v10 = vadd.f32 %v3265_v12, %v3260_v24 }
0x1867   :  { %v3286_v25 = vmul.f32 %v3268_v10, %v3268_v10  ;;  %v3273_v27 = vsel %vm5417_vm7, %v3268_v10, 0.0  ;;  %vm5426_vm7 = vmmov %vm5422_vm0 }
0x1868   :  { %v3274_v41 = vadd.f32 %v3273_v27, %v3272_v18 }
0x1869   :  { %v3291_v26 = vsel %vm5419_vm1, %v3286_v25, 0.0  ;;  %vm5428_vm1 = vmmov %vm5427_vm3 }
0x186a   :  { %v3261_v23 = vpop.f32.mrf.mxu1  ;;  %v3292_v43 = vadd.f32 %v3291_v26, %v3290_v45 }
0x186b   :  { %v3262_v16 = vadd.f32 %v3261_v23, %v3218_v21 }
0x186d   :  { %v3269_v52 = vadd.f32 %v3265_v12, %v3262_v16 }
0x186f   :  { %v3275_v11 = vsel %vm5420_vm9, %v3269_v52, 0.0  ;;  %v3287_v35 = vmul.f32 %v3269_v52, %v3269_v52  ;;  %vm5429_vm9 = vmmov %vm5428_vm1 }
0x1870   :  { %v3276_v29 = vadd.f32 %v3275_v11, %v3274_v41 }
0x1871   :  { %v3293_v37 = vsel %vm5421_vm12, %v3287_v35, 0.0  ;;  %vm5430_vm12 = vcmask 1043456  }
0x1872   :  { %v3277_v1 = vrot.slane %v3276_v29, 4  ;;  %v3294_v28 = vadd.f32 %v3293_v37, %v3292_v43 }
0x1874   :  { %v3278_v38 = vadd.f32 %v3277_v1, %v3276_v29  ;;  %v3295_v13 = vrot.slane %v3294_v28, 4 }
0x1876   :  { %v3279_v0 = vrot.slane %v3278_v38, 2  ;;  %v3296_v60 = vadd.f32 %v3295_v13, %v3294_v28 }
0x1878   :  { %v3280_v62 = vadd.f32 %v3279_v0, %v3278_v38  ;;  %v3297_v6 = vrot.slane %v3296_v60, 2 }
0x187a   :  { %v3281_v30 = vrot.slane %v3280_v62, 1  ;;  %v3298_v49 = vadd.f32 %v3297_v6, %v3296_v60 }
0x187c   :  { %v3282_v46 = vadd.f32 %v3281_v30, %v3280_v62  ;;  %v3299_v34 = vrot.slane %v3298_v49, 1  ;;  %v3403_v30 = vld [vmem:[#allocation2 + $0x508] sm:$0xf] }
0x187e   :  { %v3283_v53 = vmul.f32 0.03125, %v3282_v46  ;;  %v3300_v47 = vadd.f32 %v3299_v34, %v3298_v49  ;;  %v3411_v49 = vunpack.c.l.b16 %v3403_v30 }
0x1880   :  { %v3301_v48 = vmul.f32 0.03125, %v3300_v47  ;;  %v3302_v14 = vmul.f32 %v3283_v53, %v3283_v53  ;;  %v3319_v15 = vsub.f32 %v3269_v52, %v3283_v53  ;;  %v3318_v54 = vsub.f32 %v3268_v10, %v3283_v53 }
0x1881   :  { %v3316_v12 = vsub.f32 %v5185_v63, %v3283_v53  ;;  %v3317_v3 = vsub.f32 %v5183_v19, %v3283_v53  ;;  %v3413_v46 = vpack.c.b16 %v3411_v49, %v3411_v49 }
0x1882   :  { %v3303_v17 = vsub.f32 %v3301_v48, %v3302_v14 }
0x1883   :  { %v3422_v34 = vsel %vm5430_vm12, %v3413_v46, 0 }
0x1884   :  { %v3304_v42 = vmax.f32 %v3303_v17, 0.0  ;;  %3430 = vmatpush.bf16.msra.mxu0 %v3422_v34 }
0x1886   :  { %v3305_v57 = vadd.f32 1e-05, %v3304_v42 }
0x1888   :  { %4456 = vrsqrt.f32 %v3305_v57  ;;  %vm3312_vm14 = vweird.f32 %v3305_v57  ;;  %3431 = vmatpush.bf16.msra.mxu0 %v4277_v33 }
0x188e   :  { %v4457_v22 = vpop.eup %4456 }
0x188f   :  { %v3307_v4 = vmul.f32 %v4457_v22, %v3305_v57  ;;  %vm3313_vm4 = vweird.f32 %v4457_v22 }
0x1890   :  { %vm3314_vm15 = vmor %vm3312_vm14, %vm3313_vm4  ;;  %vm5433_vm4 = vcmask 130048  }
0x1891   :  { %v3308_v56 = vmul.f32 %v4457_v22, %v3307_v4  ;;  %vm5434_vm14 = vmmov %vm5433_vm4 }
0x1893   :  { %v3309_v51 = vmul.f32 0.5, %v3308_v56 }
0x1895   :  { %v3310_v50 = vsub.f32 1.5, %v3309_v51 }
0x1897   :  { %v3311_v5 = vmul.f32 %v4457_v22, %v3310_v50 }
0x1899   :  { %v3315_v58 = vsel %vm3314_vm15, %v4457_v22, %v3311_v5 }
0x189a   :  { %v3320_v9 = vmul.f32 %v3315_v58, %v5180_v8 }
0x189c   :  { %v3321_v40 = vperm.slane %v3320_v9, 1 }
0x189e   :  { %v3324_v24 = vmul.f32 %v3321_v40, %v3318_v54  ;;  %v3325_v32 = vmul.f32 %v3321_v40, %v3319_v15  ;;  %v3322_v36 = vmul.f32 %v3321_v40, %v3316_v12  ;;  %v3323_v2 = vmul.f32 %v3321_v40, %v3317_v3 }
0x18a0   :  { %v3329_v25 = vadd.f32 %v3326_v20, %v3324_v24  ;;  %v3330_v21 = vadd.f32 %v3326_v20, %v3325_v32  ;;  %v3327_v23 = vadd.f32 %v3326_v20, %v3322_v36  ;;  %v3328_v44 = vadd.f32 %v3326_v20, %v3323_v2  ;;  %v3404_v36 = vld [vmem:[#allocation4 + $0x88] sm:$0xff] }
0x18a1   :  { %v3405_v59 = vperm.slane %v3404_v36, 0 }
0x18a2   :  { %v3333_v7 = vmax.f32 %v3329_v25, 0.0  ;;  %v3334_v27 = vmax.f32 %v3330_v21, 0.0  ;;  %v3331_v16 = vmax.f32 %v3327_v23, 0.0  ;;  %v3332_v18 = vmax.f32 %v3328_v44, 0.0 }
0x18a4   :  { %v3338_v39 = vrot.slane %v3334_v27, 7  ;;  %v4413_v8 = vpack.i.bf16 %v3334_v27, %v3333_v7  ;;  %v3337_v10 = vrot.slane %v3333_v7, 7  ;;  %v3336_v26 = vrot.slane %v3332_v18, 7 }
0x18a5   :  { %v4403_v52 = vpack.i.bf16 %v3332_v18, %v3331_v16  ;;  %v3335_v63 = vrot.slane %v3331_v16, 7  ;;  %v3347_v45 = vrot.slane %v3331_v16, 1  ;;  %v3348_v19 = vrot.slane %v3332_v18, 1 }
0x18a6   :  { %4414 = vrot.lane.b32.xlu1 %v4413_v8, %s4517_s1  ;;  %v3349_v41 = vrot.slane %v3333_v7, 1  ;;  %v3350_v11 = vrot.slane %v3334_v27, 1  ;;  %v3339_v35 = vsel %vm5422_vm0, %v3337_v10, %v3338_v39  ;;  %v3340_v43 = vsel %vm5423_vm6, %v3336_v26, %v3337_v10  ;;  %vm5437_vm0 = vmmov %vm5433_vm4 }
0x18a7   :  { %4404 = vrot.lane.b32.xlu2 %v4403_v52, %s4517_s1  ;;  %v3353_v29 = vsel %vm5424_vm11, %v3347_v45, %v3348_v19  ;;  %v3341_v37 = vsel %vm5425_vm8, %v3335_v63, %v3336_v26  ;;  %v3342_v1 = vsel %vm5426_vm7, %v3338_v39, %v3335_v63  ;;  %v3345_v42 = vsel %vm5396_vm5, 0.0, %v3340_v43  ;;  %vm5438_vm6 = vmmov %vm5437_vm0 }
0x18a8   :  { %v3352_v28 = vsel %vm5427_vm3, %v3348_v19, %v3349_v41  ;;  %v3354_v38 = vsel %vm5428_vm1, %v3350_v11, %v3347_v45  ;;  %v3351_v60 = vsel %vm5429_vm9, %v3349_v41, %v3350_v11  ;;  %v3343_v9 = vsel %vm4634_vm13, 0.0, %v3342_v1 }
0x18a9   :  { %v3356_v13 = vsel %vm4600_vm10, 0.0, %v3352_v28  ;;  %v3358_v62 = vsel %vm5395_vm2, 0.0, %v3354_v38  ;;  %vm5431_vm10 = vcmask 64512   ;;  %vm5439_vm11 = vcmask 195584  }
0x18aa   :  { %v4408_v0 = vpack.i.bf16 %v3356_v13, %v3353_v29  ;;  %v4418_v6 = vpack.i.bf16 %v3358_v62, %v3351_v60  ;;  %vm5432_vm2 = vmmov %vm5431_vm10 }
0x18ab   :  { %vm5435_vm15 = vmmov %vm5432_vm2 }
0x18ac   :  { %4409 = vrot.lane.b32.xlu0 %v4408_v0, %s4519_s0  ;;  %vm5436_vm5 = vmmov %vm5432_vm2 }
0x18ad   :  { %vm5440_vm8 = vmmov %vm5439_vm11 }
0x18ae   :  { %vm5441_vm13 = vmmov %vm5432_vm2 }
0x18af   :  { %4419 = vrot.lane.b32.xlu2 %v4418_v6, %s4519_s0  ;;  %vm5442_vm7 = vmmov %vm5432_vm2 }
0x18b0   :  { %vm5443_vm3 = vmmov %vm5432_vm2 }
0x18b1   :  { %vm5444_vm1 = vmmov %vm5432_vm2 }
0x18b2   :  { %vm5445_vm9 = vmmov %vm5444_vm1 }
0x18b3   :  { %vm5446_vm12 = vmmov %vm5444_vm1 }
0x1901   :  { %v4405_v53 = vpop.permute.xlu2 %4404 }
0x1902   :  { %v4407_v4 = vunpack.i.h.bf16 %v4405_v53  ;;  %v4406_v56 = vunpack.i.l.bf16 %v4405_v53 }
0x1904   :  { %v3391_v55 = vsel %vm5435_vm15, %v3343_v9, %v4406_v56  ;;  %v3392_v54 = vsel %vm5436_vm5, %v3341_v37, %v4407_v4  ;;  %v3499_v9 = vperm.slane %v3404_v36, 2 }
0x1909   :  { %v4420_v47 = vpop.permute.xlu2 %4419 }
0x190a   :  { %v4422_v31 = vunpack.i.h.bf16 %v4420_v47  ;;  %v4421_v17 = vunpack.i.l.bf16 %v4420_v47 }
0x1918   :  { %v4415_v61 = vpop.permute.xlu1 %4414 }
0x1919   :  { %v4417_v48 = vunpack.i.h.bf16 %v4415_v61  ;;  %v4416_v14 = vunpack.i.l.bf16 %v4415_v61 }
0x191b   :  { %v3393_v57 = vsel %vm5431_vm10, %v3345_v42, %v4416_v14  ;;  %v3394_v22 = vsel %vm5432_vm2, %v3339_v35, %v4417_v48  ;;  %vm5447_vm10 = vmmov %vm5444_vm1  ;;  %v3508_v48 = vld [vmem:[#allocation2 + $0x510] sm:$0xf] }
0x191c   :  { %v3397_v51 = vsel %vm5433_vm4, %v3393_v57, %v4421_v17  ;;  %v3398_v50 = vsel %vm5434_vm14, %v3394_v22, %v4422_v31  ;;  %vm5448_vm2 = vmmov %vm5444_vm1  ;;  %vm5449_vm4 = vcmask 1043456  }
0x191d   :  { %v3400_v5 = vpack.c.bf16 %v3398_v50, %v3397_v51  ;;  %v3520_v14 = vsel %vm5449_vm4, %v3508_v48, 0 }
0x191e   :  { %v4410_v58 = vpop.permute.xlu0 %4409  ;;  %3529 = vmatpush.bf16.msra.mxu2 %v3520_v14 }
0x191f   :  { %v4412_v15 = vunpack.i.h.bf16 %v4410_v58  ;;  %v4411_v20 = vunpack.i.l.bf16 %v4410_v58 }
0x1921   :  { %v3395_v40 = vsel %vm5437_vm0, %v3391_v55, %v4411_v20  ;;  %v3396_v12 = vsel %vm5438_vm6, %v3392_v54, %v4412_v15  ;;  %vm5450_vm0 = vmmov %vm5444_vm1 }
0x1922   :  { %v3399_v3 = vpack.c.bf16 %v3396_v12, %v3395_v40  ;;  %vm5451_vm6 = vmmov %vm5450_vm0 }
0x1924   :  { %4139 = vmatmul.msk.bf16.vlgmr.msra.gmra.mxu0 %vm5439_vm11, %v3399_v3  ;;  %vm3541_vm11 = vcmask 7168  }
0x1934   :  { %4140 = vmatmul.msk.bf16.gmra.mxu0 %vm5440_vm8, %v3400_v5 }
0x19a1   :  { %v3433_v24 = vpop.f32.mrf.mxu0 }
0x19a2   :  { %v3434_v21 = vadd.f32 %v3433_v24, %v3405_v59 }
0x19a4   :  { %v3457_v7 = vmul.f32 %v3434_v21, %v3434_v21  ;;  %v3443_v18 = vsel %vm5442_vm7, %v3434_v21, 0.0 }
0x19a6   :  { %v3461_v52 = vsel %vm5445_vm9, %v3457_v7, 0.0 }
0x19a9   :  { %v3435_v32 = vpop.f32.mrf.mxu0 }
0x19aa   :  { %v5244_v2 = vadd.f32 %v3435_v32, %v3405_v59 }
0x19ac   :  { %v3458_v44 = vmul.f32 %v5244_v2, %v5244_v2  ;;  %v3444_v27 = vsel %vm5441_vm13, %v5244_v2, 0.0 }
0x19ad   :  { %v3445_v10 = vadd.f32 %v3444_v27, %v3443_v18 }
0x19ae   :  { %v3462_v39 = vsel %vm5443_vm3, %v3458_v44, 0.0 }
0x19af   :  { %v3463_v19 = vadd.f32 %v3462_v39, %v3461_v52 }
0x19b1   :  { %v3438_v25 = vpop.f32.mrf.mxu0 }
0x19b2   :  { %v5246_v23 = vadd.f32 %v3438_v25, %v3405_v59 }
0x19b4   :  { %v3459_v16 = vmul.f32 %v5246_v23, %v5246_v23  ;;  %v3446_v8 = vsel %vm5444_vm1, %v5246_v23, 0.0 }
0x19b5   :  { %v3447_v41 = vadd.f32 %v3446_v8, %v3445_v10 }
0x19b6   :  { %v3464_v63 = vsel %vm5446_vm12, %v3459_v16, 0.0 }
0x19b7   :  { %v3465_v43 = vadd.f32 %v3464_v63, %v3463_v19 }
0x19b9   :  { %v3440_v26 = vpop.f32.mrf.mxu0 }
0x19ba   :  { %v3441_v45 = vadd.f32 %v3440_v26, %v3405_v59 }
0x19bc   :  { %v3448_v11 = vsel %vm5447_vm10, %v3441_v45, 0.0  ;;  %v3460_v35 = vmul.f32 %v3441_v45, %v3441_v45 }
0x19bd   :  { %v3449_v29 = vadd.f32 %v3448_v11, %v3447_v41 }
0x19be   :  { %v3466_v37 = vsel %vm5448_vm2, %v3460_v35, 0.0 }
0x19bf   :  { %v3450_v1 = vrot.slane %v3449_v29, 4  ;;  %v3467_v28 = vadd.f32 %v3466_v37, %v3465_v43 }
0x19c1   :  { %v3451_v38 = vadd.f32 %v3450_v1, %v3449_v29  ;;  %v3468_v13 = vrot.slane %v3467_v28, 4 }
0x19c3   :  { %v3452_v0 = vrot.slane %v3451_v38, 2  ;;  %v3469_v60 = vadd.f32 %v3468_v13, %v3467_v28 }
0x19c5   :  { %v3453_v62 = vadd.f32 %v3452_v0, %v3451_v38  ;;  %v3470_v6 = vrot.slane %v3469_v60, 2 }
0x19c7   :  { %v3454_v30 = vrot.slane %v3453_v62, 1  ;;  %v3471_v49 = vadd.f32 %v3470_v6, %v3469_v60 }
0x19c9   :  { %v3455_v46 = vadd.f32 %v3454_v30, %v3453_v62  ;;  %v3472_v34 = vrot.slane %v3471_v49, 1 }
0x19cb   :  { %v3456_v33 = vmul.f32 0.03125, %v3455_v46  ;;  %v3473_v53 = vadd.f32 %v3472_v34, %v3471_v49 }
0x19cd   :  { %v3474_v47 = vmul.f32 0.03125, %v3473_v53  ;;  %v3475_v61 = vmul.f32 %v3456_v33, %v3456_v33  ;;  %v3489_v20 = vsub.f32 %v3434_v21, %v3456_v33  ;;  %v3490_v55 = vsub.f32 %v5244_v2, %v3456_v33  ;;  %v4423_v2 = vld [vmem:[#allocation4 + $0x90] ss:$0 sm:$0xff] }
0x19ce   :  { %v3492_v25 = vsub.f32 %v3441_v45, %v3456_v33  ;;  %v3491_v44 = vsub.f32 %v5246_v23, %v3456_v33 }
0x19cf   :  { %v3476_v31 = vsub.f32 %v3474_v47, %v3475_v61 }
0x19d1   :  { %v3477_v17 = vmax.f32 %v3476_v31, 0.0 }
0x19d3   :  { %v3478_v42 = vadd.f32 1e-05, %v3477_v17 }
0x19d5   :  { %4458 = vrsqrt.f32 %v3478_v42  ;;  %vm3485_vm15 = vweird.f32 %v3478_v42 }
0x19db   :  { %v4459_v57 = vpop.eup %4458 }
0x19dc   :  { %v3480_v22 = vmul.f32 %v4459_v57, %v3478_v42  ;;  %vm3486_vm14 = vweird.f32 %v4459_v57 }
0x19dd   :  { %vm3487_vm5 = vmor %vm3485_vm15, %vm3486_vm14 }
0x19de   :  { %v3481_v4 = vmul.f32 %v4459_v57, %v3480_v22 }
0x19e0   :  { %v3482_v56 = vmul.f32 0.5, %v3481_v4 }
0x19e2   :  { %v3483_v51 = vsub.f32 1.5, %v3482_v56 }
0x19e4   :  { %v3484_v50 = vmul.f32 %v4459_v57, %v3483_v51 }
0x19e6   :  { %v3488_v5 = vsel %vm3487_vm5, %v4459_v57, %v3484_v50 }
0x19e7   :  { %v3493_v58 = vmul.f32 %v3488_v5, %v3404_v36 }
0x19e9   :  { %v3494_v15 = vperm.slane %v3493_v58, 1 }
0x19eb   :  { %v3495_v54 = vmul.f32 %v3494_v15, %v3489_v20  ;;  %v3496_v40 = vmul.f32 %v3494_v15, %v3490_v55  ;;  %v3498_v7 = vmul.f32 %v3494_v15, %v3492_v25  ;;  %v3497_v27 = vmul.f32 %v3494_v15, %v3491_v44 }
0x19ed   :  { %v3500_v12 = vadd.f32 %v3499_v9, %v3495_v54  ;;  %v3501_v3 = vadd.f32 %v3499_v9, %v3496_v40  ;;  %v3503_v16 = vadd.f32 %v3499_v9, %v3498_v7  ;;  %v3502_v36 = vadd.f32 %v3499_v9, %v3497_v27 }
0x19ef   :  { %v3504_v24 = vmax.f32 %v3500_v12, 0.0  ;;  %v3505_v32 = vmax.f32 %v3501_v3, 0.0  ;;  %v3506_v18 = vmax.f32 %v3502_v36, 0.0  ;;  %v3507_v21 = vmax.f32 %v3503_v16, 0.0 }
0x19f1   :  { %v3510_v59 = vpack.c.bf16 %v3505_v32, %v3504_v24  ;;  %v3511_v39 = vpack.c.bf16 %v3507_v21, %v3506_v18 }
0x19f3   :  { %4141 = vmatmul.msk.bf16.vlgmr.msra.gmra.mxu2 %vm5450_vm0, %v3510_v59 }
0x1a03   :  { %4142 = vmatmul.msk.bf16.gmra.mxu2 %vm5451_vm6, %v3511_v39 }
0x1a76   :  { %v3531_v8 = vpop.f32.mrf.mxu2 }
0x1a77   :  { %v3532_v10 = vadd.f32 %v4423_v2, %v3531_v8 }
0x1a79   :  { %3542 = vst.msk [vmem:[%s5282_s3] sm:$0xff] %vm3541_vm11, %v3532_v10 }
0x1a7e   :  { %v3533_v26 = vpop.f32.mrf.mxu2 }
0x1a7f   :  { %v3534_v52 = vadd.f32 %v4423_v2, %v3533_v26 }
0x1a81   :  { %3543 = vst.msk [vmem:[%s5282_s3 + $0x8] sm:$0xff] %vm3541_vm11, %v3534_v52 }
0x1a86   :  { %v3536_v23 = vpop.f32.mrf.mxu2 }
0x1a87   :  { %v3537_v63 = vadd.f32 %v4423_v2, %v3536_v23 }
0x1a89   :  { %3544 = vst.msk [vmem:[%s5282_s3 + $0x10] sm:$0xff] %vm3541_vm11, %v3537_v63 }
0x1a8e   :  { %v3538_v45 = vpop.f32.mrf.mxu2 }
0x1a8f   :  { %v3539_v19 = vadd.f32 %v4423_v2, %v3538_v45 }
0x1a91   :  { %3545 = vst.msk [vmem:[%s5282_s3 + $0x18] sm:$0xff] %vm3541_vm11, %v3539_v19 }
0x1a92   :  { %3550 = vsyncpa [#allocation3], 1 }
0x1a93   :  { %3551 = vsyncpa [#allocation5], 1 }

</bundles_post_ra>
